<compile_context>
chip_gen: v5e
topology: v5e:2x2
jax: 0.10.0
libtpu: 0.0.40
codegen_flags: <defaults>
</compile_context>

<pallas_src>
import functools
import math

import jax
import jax.numpy as jnp
from jax import lax
from jax.experimental import pallas as pl

EPS = 1e-5  # nn.LayerNorm default

_PER_LAYER_KEYS = ("ln1_w", "ln1_b", "wqkv", "bqkv", "wo", "bo",
                   "ln2_w", "ln2_b", "w1", "b1", "w2", "b2")


# ----------------------------------------------------------------------------
# Shared math (used both inside the kernel and in the plain-JAX references)
# ----------------------------------------------------------------------------
def _layer_norm(v, w, b):
    mu = jnp.mean(v, axis=-1, keepdims=True)
    var = jnp.mean(jnp.square(v - mu), axis=-1, keepdims=True)
    return (v - mu) * lax.rsqrt(var + EPS) * w + b


# ----------------------------------------------------------------------------
# Fused encoder kernel (single invocation, layers unrolled, weights in VMEM)
# ----------------------------------------------------------------------------
def _encoder_kernel(num_heads,
                    x0_ref,
                    ln1w_ref, ln1b_ref, wqkv_ref, bqkv_ref, wo_ref, bo_ref,
                    ln2w_ref, ln2b_ref, w1_ref, b1_ref, w2_ref, b2_ref,
                    o_ref):
    bf = jnp.bfloat16
    f32 = jnp.float32

    x = x0_ref[...]                       # (N, E) f32 residual stream
    n, e = x.shape
    h = num_heads
    hd = e // h
    num_layers = ln1w_ref.shape[0]

    # Static unroll over layers: L is small and every weight slab is VMEM-resident.
    for l in range(num_layers):
        # ---------------- attention sublayer ----------------
        xn = _layer_norm(x, ln1w_ref[l], ln1b_ref[l])

        # Fused Q/K/V projection: one lane-dense (N,E) @ (E,3E) MXU matmul.
        # (1/sqrt(hd) is pre-folded into the Q columns and bias at prep time.)
        qkv = jnp.dot(xn.astype(bf), wqkv_ref[l],
                      preferred_element_type=f32) + bqkv_ref[l]      # (N, 3E) f32

        # Head split in SUBLANE space: lane-tile-aligned splits + 2-D transpose,
        # then per-head 16-row (tile-aligned) slabs.
        qT = qkv[:, :e].T                 # (E, N)
        kT = qkv[:, e:2 * e].T            # (E, N)
        vT = qkv[:, 2 * e:].T             # (E, N)

        ctx_t_parts = []
        for hh in range(h):
            r0, r1 = hh * hd, (hh + 1) * hd
            qT_h = qT[r0:r1, :]           # (hd, N) f32
            kT_h = kT[r0:r1, :]           # (hd, N)
            vT_h = vT[r0:r1, :]           # (hd, N)

            # scores: (N, hd) @ (hd, N) -> (N, N); scale already folded into Wq.
            s = jnp.dot(qT_h.T.astype(bf), kT_h.astype(bf),
                        preferred_element_type=f32)
            s = s - jnp.max(s, axis=-1, keepdims=True)
            p = jnp.exp(s)
            p = p * pl.reciprocal(jnp.sum(p, axis=-1, keepdims=True),
                                  approx=True)

            # context kept transposed (hd, N) so heads re-merge along sublanes.
            ctx_t_parts.append(jnp.dot(vT_h.astype(bf), p.T.astype(bf),
                                       preferred_element_type=f32))

        ctxT = jnp.concatenate(ctx_t_parts, axis=0)     # (E, N) f32
        ctx = ctxT.T                                    # (N, E) lane-dense

        # Fused output projection: concat(heads) @ Wo as ONE dense matmul;
        # head reduction happens inside the 128-deep MXU contraction.
        attn = jnp.dot(ctx.astype(bf), wo_ref[l],
                       preferred_element_type=f32) + bo_ref[l]

        y = attn + x                                    # residual 1

        # ---------------- feedforward sublayer ----------------
        yn = _layer_norm(y, ln2w_ref[l], ln2b_ref[l])
        h1 = jnp.maximum(
            jnp.dot(yn.astype(bf), w1_ref[l],
                    preferred_element_type=f32) + b1_ref[l], 0.0)
        h2 = (jnp.dot(h1.astype(bf), w2_ref[l],
                      preferred_element_type=f32) + b2_ref[l])

        x = y + h2                                      # residual 2

    o_ref[...] = x                                      # single final store


# ----------------------------------------------------------------------------
# Wrapper
# ----------------------------------------------------------------------------
def attention_encoder(inputs, prepped, num_heads):
    """AttentionEncoder.forward as a single fused Pallas kernel invocation."""
    # Embedding Linear hoisted out of the kernel (plain XLA, f32).
    x0 = inputs @ prepped["emb_w"] + prepped["emb_b"]   # (N, E) f32
    n, e = x0.shape

    slabs = [prepped[k] for k in _PER_LAYER_KEYS]
    # No grid / no BlockSpecs: every operand is a whole-array VMEM block
    # (total ~1.2 MiB of weights, well under any generation's VMEM limit).
    return pl.pallas_call(
        functools.partial(_encoder_kernel, num_heads),
        out_shape=jax.ShapeDtypeStruct((n, e), jnp.float32),
    )(x0, *slabs)


# ----------------------------------------------------------------------------
# Parameter init (PyTorch-equivalent shapes) and one-time kernel prep
# ----------------------------------------------------------------------------
def init_params(key, input_size, embedding_dim, hidden_dim, num_attn_layers):
    dff = hidden_dim * 4  # dim_feedforward = hidden_dim * 4

    def dense(k, fan_in, fan_out):
        k1, k2 = jax.random.split(k)
        lim = 1.0 / (fan_in ** 0.5)
        w = jax.random.uniform(k1, (fan_in, fan_out), jnp.float32, -lim, lim)
        b = jax.random.uniform(k2, (1, fan_out), jnp.float32, -lim, lim)
        return w, b

    keys = jax.random.split(key, num_attn_layers + 1)
    emb_w, emb_b = dense(keys[0], input_size, embedding_dim)

    layers = []
    for li in range(num_attn_layers):
        ks = jax.random.split(keys[li + 1], 6)
        wq, bq = dense(ks[0], embedding_dim, embedding_dim)
        wk, bk = dense(ks[1], embedding_dim, embedding_dim)
        wv, bv = dense(ks[2], embedding_dim, embedding_dim)
        wo, bo = dense(ks[3], embedding_dim, embedding_dim)
        w1, b1 = dense(ks[4], embedding_dim, dff)
        w2, b2 = dense(ks[5], dff, embedding_dim)
        layers.append(dict(
            ln1_w=jnp.ones((1, embedding_dim), jnp.float32),
            ln1_b=jnp.zeros((1, embedding_dim), jnp.float32),
            wq=wq, bq=bq, wk=wk, bk=bk, wv=wv, bv=bv, wo=wo, bo=bo,
            ln2_w=jnp.ones((1, embedding_dim), jnp.float32),
            ln2_b=jnp.zeros((1, embedding_dim), jnp.float32),
            w1=w1, b1=b1, w2=w2, b2=b2,
        ))
    return dict(emb_w=emb_w, emb_b=emb_b, layers=layers)


def prep_params(params, num_heads):
    """One-time weight transform for the fused kernel:
       - concatenate q/k/v into one (E, 3E) slab (single dense projection),
       - fold 1/sqrt(head_dim) into the Q columns and bias,
       - keep Wo flat (E, E) for the fused out-projection,
       - stack per-layer tensors into (L, ...) slabs,
       - cast MXU weight operands to bfloat16 (biases / LayerNorm stay f32)."""
    e = params["emb_w"].shape[1]
    hd = e // num_heads
    scale = 1.0 / math.sqrt(hd)
    bf = jnp.bfloat16

    out = dict(emb_w=params["emb_w"], emb_b=params["emb_b"])   # f32, used in wrapper
    acc = {k: [] for k in _PER_LAYER_KEYS}
    for p in params["layers"]:
        wqkv = jnp.concatenate([p["wq"] * scale, p["wk"], p["wv"]], axis=1)
        bqkv = jnp.concatenate([p["bq"] * scale, p["bk"], p["bv"]], axis=1)
        acc["ln1_w"].append(p["ln1_w"]); acc["ln1_b"].append(p["ln1_b"])
        acc["wqkv"].append(wqkv.astype(bf)); acc["bqkv"].append(bqkv)
        acc["wo"].append(p["wo"].astype(bf)); acc["bo"].append(p["bo"])
        acc["ln2_w"].append(p["ln2_w"]); acc["ln2_b"].append(p["ln2_b"])
        acc["w1"].append(p["w1"].astype(bf)); acc["b1"].append(p["b1"])
        acc["w2"].append(p["w2"].astype(bf)); acc["b2"].append(p["b2"])
    for k, v in acc.items():
        out[k] = jnp.stack(v, axis=0)
    return out


# ----------------------------------------------------------------------------
# References
# ----------------------------------------------------------------------------
def ref_encoder_f32(inputs, params, num_heads):
    """Full-precision reference mirroring the PyTorch forward."""
    x = inputs @ params["emb_w"] + params["emb_b"]
    n, e = x.shape
    hd = e // num_heads
    for p in params["layers"]:
        xn = _layer_norm(x, p["ln1_w"], p["ln1_b"])
        q = (xn @ p["wq"] + p["bq"]).reshape(n, num_heads, hd)
        k = (xn @ p["wk"] + p["bk"]).reshape(n, num_heads, hd)
        v = (xn @ p["wv"] + p["bv"]).reshape(n, num_heads, hd)
        s = jnp.einsum("qhd,khd->hqk", q, k) / math.sqrt(hd)
        a = jax.nn.softmax(s, axis=-1)
        o = jnp.einsum("hqk,khd->qhd", a, v).reshape(n, e)
        y = o @ p["wo"] + p["bo"] + x
        yn = _layer_norm(y, p["ln2_w"], p["ln2_b"])
        x = y + jax.nn.relu(yn @ p["w1"] + p["b1"]) @ p["w2"] + p["b2"]
    return x


def ref_encoder_matched(inputs, pp, num_heads):
    """Reference mirroring the kernel's precision policy (bf16 matmul operands,
    f32 accumulation, scale folded into wq/bq) for a tight numerical check."""
    bf = jnp.bfloat16
    f32 = jnp.float32
    x = inputs @ pp["emb_w"] + pp["emb_b"]
    n, e = x.shape
    hd = e // num_heads
    num_layers = pp["ln1_w"].shape[0]
    for l in range(num_layers):
        xn = _layer_norm(x, pp["ln1_w"][l], pp["ln1_b"][l])
        qkv = jnp.dot(xn.astype(bf), pp["wqkv"][l],
                      preferred_element_type=f32) + pp["bqkv"][l]
        q = qkv[:, :e].reshape(n, num_heads, hd)
        k = qkv[:, e:2 * e].reshape(n, num_heads, hd)
        v = qkv[:, 2 * e:].reshape(n, num_heads, hd)
        s = jnp.einsum("ihd,jhd->hij", q.astype(bf), k.astype(bf),
                       preferred_element_type=f32)
        p = jax.nn.softmax(s, axis=-1)
        ctx = jnp.einsum("hij,jhd->ihd", p.astype(bf), v.astype(bf),
                         preferred_element_type=f32).reshape(n, e)
        attn = jnp.dot(ctx.astype(bf), pp["wo"][l],
                       preferred_element_type=f32) + pp["bo"][l]
        y = attn + x
        yn = _layer_norm(y, pp["ln2_w"][l], pp["ln2_b"][l])
        h1 = jax.nn.relu(jnp.dot(yn.astype(bf), pp["w1"][l],
                                 preferred_element_type=f32) + pp["b1"][l])
        x = y + jnp.dot(h1.astype(bf), pp["w2"][l],
                        preferred_element_type=f32) + pp["b2"][l]
    return x


if __name__ == "__main__":
    key = jax.random.PRNGKey(0)
    k_in, k_p = jax.random.split(key)

    # Small shapes consistent with the module (E and hidden_dim divisible by H).
    N, INPUT_SIZE = 8, 16
    EMBEDDING_DIM, NUM_HEADS, HIDDEN_DIM, NUM_LAYERS = 128, 8, 128, 3

    inputs = jax.random.normal(k_in, (N, INPUT_SIZE), jnp.float32)
    params = init_params(k_p, INPUT_SIZE, EMBEDDING_DIM, HIDDEN_DIM, NUM_LAYERS)
    prepped = prep_params(params, NUM_HEADS)

    out = attention_encoder(inputs, prepped, NUM_HEADS)
    out = jax.block_until_ready(out)
    assert out.shape == (N, EMBEDDING_DIM), out.shape

    # Tight check vs a reference using the same bf16/f32 precision policy
    # (only remaining delta: approx-reciprocal softmax normalization).
    ref_mp = ref_encoder_matched(inputs, prepped, NUM_HEADS)
    err_mp = float(jnp.max(jnp.abs(out - ref_mp)))
    assert jnp.allclose(out, ref_mp, atol=2e-2, rtol=2e-2), err_mp

    # Sanity check vs the full-f32 PyTorch-equivalent forward (looser tolerance
    # because the kernel feeds bf16 operands to the MXU).
    ref_hi = ref_encoder_f32(inputs, params, NUM_HEADS)
    err_hi = float(jnp.max(jnp.abs(out - ref_hi)))
    assert jnp.allclose(out, ref_hi, atol=5e-2, rtol=5e-2), err_hi

    print("KERNEL_OK")
</pallas_src>

<mosaic_0001>
module attributes {stable_mosaic.version = 11 : i64} {
  func.func @_encoder_kernel(%arg0: memref<8x128xf32, #tpu.memory_space<vmem>>, %arg1: memref<3x1x128xf32, #tpu.memory_space<vmem>>, %arg2: memref<3x1x128xf32, #tpu.memory_space<vmem>>, %arg3: memref<3x128x384xbf16, #tpu.memory_space<vmem>>, %arg4: memref<3x1x384xf32, #tpu.memory_space<vmem>>, %arg5: memref<3x128x128xbf16, #tpu.memory_space<vmem>>, %arg6: memref<3x1x128xf32, #tpu.memory_space<vmem>>, %arg7: memref<3x1x128xf32, #tpu.memory_space<vmem>>, %arg8: memref<3x1x128xf32, #tpu.memory_space<vmem>>, %arg9: memref<3x128x512xbf16, #tpu.memory_space<vmem>>, %arg10: memref<3x1x512xf32, #tpu.memory_space<vmem>>, %arg11: memref<3x512x128xbf16, #tpu.memory_space<vmem>>, %arg12: memref<3x1x128xf32, #tpu.memory_space<vmem>>, %arg13: memref<8x128xf32, #tpu.memory_space<vmem>>) attributes {dimension_semantics = [], scalar_prefetch = 0 : i64, scratch_operands = 0 : i64, tpu.core_type = #tpu.core_type<tc>} {
    %c0 = arith.constant 0 : index
    %c0_0 = arith.constant 0 : index
    %0 = vector.load %arg0[%c0, %c0_0] : memref<8x128xf32, #tpu.memory_space<vmem>>, vector<8x128xf32>
    %c0_1 = arith.constant 0 : index
    %c0_2 = arith.constant 0 : index
    %c0_3 = arith.constant 0 : index
    %1 = vector.load %arg1[%c0_1, %c0_2, %c0_3] : memref<3x1x128xf32, #tpu.memory_space<vmem>>, vector<1x1x128xf32>
    %2 = vector.shape_cast %1 : vector<1x1x128xf32> to vector<1x128xf32>
    %c0_4 = arith.constant 0 : index
    %c0_5 = arith.constant 0 : index
    %c0_6 = arith.constant 0 : index
    %3 = vector.load %arg2[%c0_4, %c0_5, %c0_6] : memref<3x1x128xf32, #tpu.memory_space<vmem>>, vector<1x1x128xf32>
    %4 = vector.shape_cast %3 : vector<1x1x128xf32> to vector<1x128xf32>
    %cst = arith.constant dense<0.000000e+00> : vector<8xf32>
    %5 = vector.multi_reduction <add>, %0, %cst [1] : vector<8x128xf32> to vector<8xf32>
    %6 = vector.shape_cast %5 : vector<8xf32> to vector<8x1xf32>
    %cst_7 = arith.constant 1.280000e+02 : f32
    %7 = vector.broadcast %cst_7 : f32 to vector<8x1xf32>
    %8 = arith.divf %6, %7 : vector<8x1xf32>
    %9 = vector.broadcast %8 : vector<8x1xf32> to vector<8x128xf32>
    %10 = arith.subf %0, %9 : vector<8x128xf32>
    %11 = arith.mulf %10, %10 : vector<8x128xf32>
    %cst_8 = arith.constant dense<0.000000e+00> : vector<8xf32>
    %12 = vector.multi_reduction <add>, %11, %cst_8 [1] : vector<8x128xf32> to vector<8xf32>
    %13 = vector.shape_cast %12 : vector<8xf32> to vector<8x1xf32>
    %cst_9 = arith.constant 1.280000e+02 : f32
    %14 = vector.broadcast %cst_9 : f32 to vector<8x1xf32>
    %15 = arith.divf %13, %14 : vector<8x1xf32>
    %16 = vector.broadcast %8 : vector<8x1xf32> to vector<8x128xf32>
    %17 = arith.subf %0, %16 : vector<8x128xf32>
    %cst_10 = arith.constant 9.99999974E-6 : f32
    %18 = vector.broadcast %cst_10 : f32 to vector<8x1xf32>
    %19 = arith.addf %15, %18 : vector<8x1xf32>
    %20 = math.rsqrt %19 : vector<8x1xf32>
    %21 = vector.broadcast %20 : vector<8x1xf32> to vector<8x128xf32>
    %22 = arith.mulf %17, %21 : vector<8x128xf32>
    %23 = vector.broadcast %2 : vector<1x128xf32> to vector<8x128xf32>
    %24 = arith.mulf %22, %23 : vector<8x128xf32>
    %25 = vector.broadcast %4 : vector<1x128xf32> to vector<8x128xf32>
    %26 = arith.addf %24, %25 : vector<8x128xf32>
    %27 = arith.truncf %26 : vector<8x128xf32> to vector<8x128xbf16>
    %c0_11 = arith.constant 0 : index
    %c0_12 = arith.constant 0 : index
    %c0_13 = arith.constant 0 : index
    %28 = vector.load %arg3[%c0_11, %c0_12, %c0_13] : memref<3x128x384xbf16, #tpu.memory_space<vmem>>, vector<1x128x384xbf16>
    %29 = vector.shape_cast %28 : vector<1x128x384xbf16> to vector<128x384xbf16>
    %cst_14 = arith.constant dense<0.000000e+00> : vector<8x384xf32>
    %30 = tpu.matmul %27, %29, %cst_14 {dimension_numbers = #tpu.dot_dimension_numbers<[1], [0], [0], [1], [0, 0, 1, 1], [], []>} : vector<8x128xbf16>, vector<128x384xbf16>, vector<8x384xf32> -> vector<8x384xf32>
    %c0_15 = arith.constant 0 : index
    %c0_16 = arith.constant 0 : index
    %c0_17 = arith.constant 0 : index
    %31 = vector.load %arg4[%c0_15, %c0_16, %c0_17] : memref<3x1x384xf32, #tpu.memory_space<vmem>>, vector<1x1x384xf32>
    %32 = vector.shape_cast %31 : vector<1x1x384xf32> to vector<1x384xf32>
    %33 = vector.broadcast %32 : vector<1x384xf32> to vector<8x384xf32>
    %34 = arith.addf %30, %33 : vector<8x384xf32>
    %35 = vector.extract_strided_slice %34 {offsets = [0, 0], sizes = [8, 128], strides = [1, 1]} : vector<8x384xf32> to vector<8x128xf32>
    %36 = tpu.transpose %35, [1, 0] : vector<8x128xf32> -> vector<128x8xf32>
    %37 = vector.extract_strided_slice %34 {offsets = [0, 128], sizes = [8, 128], strides = [1, 1]} : vector<8x384xf32> to vector<8x128xf32>
    %38 = tpu.transpose %37, [1, 0] : vector<8x128xf32> -> vector<128x8xf32>
    %39 = vector.extract_strided_slice %34 {offsets = [0, 256], sizes = [8, 128], strides = [1, 1]} : vector<8x384xf32> to vector<8x128xf32>
    %40 = tpu.transpose %39, [1, 0] : vector<8x128xf32> -> vector<128x8xf32>
    %41 = vector.extract_strided_slice %36 {offsets = [0, 0], sizes = [16, 8], strides = [1, 1]} : vector<128x8xf32> to vector<16x8xf32>
    %42 = vector.extract_strided_slice %38 {offsets = [0, 0], sizes = [16, 8], strides = [1, 1]} : vector<128x8xf32> to vector<16x8xf32>
    %43 = vector.extract_strided_slice %40 {offsets = [0, 0], sizes = [16, 8], strides = [1, 1]} : vector<128x8xf32> to vector<16x8xf32>
    %44 = tpu.transpose %41, [1, 0] : vector<16x8xf32> -> vector<8x16xf32>
    %45 = arith.truncf %44 : vector<8x16xf32> to vector<8x16xbf16>
    %46 = arith.truncf %42 : vector<16x8xf32> to vector<16x8xbf16>
    %cst_18 = arith.constant dense<0.000000e+00> : vector<8x8xf32>
    %47 = tpu.matmul %45, %46, %cst_18 {dimension_numbers = #tpu.dot_dimension_numbers<[1], [0], [0], [1], [0, 0, 1, 1], [], []>} : vector<8x16xbf16>, vector<16x8xbf16>, vector<8x8xf32> -> vector<8x8xf32>
    %cst_19 = arith.constant dense<0xFF800000> : vector<8xf32>
    %48 = vector.multi_reduction <maximumf>, %47, %cst_19 [1] : vector<8x8xf32> to vector<8xf32>
    %49 = vector.shape_cast %48 : vector<8xf32> to vector<8x1xf32>
    %50 = vector.broadcast %49 : vector<8x1xf32> to vector<8x8xf32>
    %51 = arith.subf %47, %50 : vector<8x8xf32>
    %52 = math.exp %51 : vector<8x8xf32>
    %cst_20 = arith.constant dense<0.000000e+00> : vector<8xf32>
    %53 = vector.multi_reduction <add>, %52, %cst_20 [1] : vector<8x8xf32> to vector<8xf32>
    %54 = vector.shape_cast %53 : vector<8xf32> to vector<8x1xf32>
    %55 = tpu.reciprocal %54 {approx = true} : vector<8x1xf32> -> vector<8x1xf32>
    %56 = vector.broadcast %55 : vector<8x1xf32> to vector<8x8xf32>
    %57 = arith.mulf %52, %56 : vector<8x8xf32>
    %58 = arith.truncf %43 : vector<16x8xf32> to vector<16x8xbf16>
    %59 = tpu.transpose %57, [1, 0] : vector<8x8xf32> -> vector<8x8xf32>
    %60 = arith.truncf %59 : vector<8x8xf32> to vector<8x8xbf16>
    %cst_21 = arith.constant dense<0.000000e+00> : vector<16x8xf32>
    %61 = tpu.matmul %58, %60, %cst_21 {dimension_numbers = #tpu.dot_dimension_numbers<[1], [0], [0], [1], [0, 0, 1, 1], [], []>} : vector<16x8xbf16>, vector<8x8xbf16>, vector<16x8xf32> -> vector<16x8xf32>
    %62 = vector.extract_strided_slice %36 {offsets = [16, 0], sizes = [16, 8], strides = [1, 1]} : vector<128x8xf32> to vector<16x8xf32>
    %63 = vector.extract_strided_slice %38 {offsets = [16, 0], sizes = [16, 8], strides = [1, 1]} : vector<128x8xf32> to vector<16x8xf32>
    %64 = vector.extract_strided_slice %40 {offsets = [16, 0], sizes = [16, 8], strides = [1, 1]} : vector<128x8xf32> to vector<16x8xf32>
    %65 = tpu.transpose %62, [1, 0] : vector<16x8xf32> -> vector<8x16xf32>
    %66 = arith.truncf %65 : vector<8x16xf32> to vector<8x16xbf16>
    %67 = arith.truncf %63 : vector<16x8xf32> to vector<16x8xbf16>
    %cst_22 = arith.constant dense<0.000000e+00> : vector<8x8xf32>
    %68 = tpu.matmul %66, %67, %cst_22 {dimension_numbers = #tpu.dot_dimension_numbers<[1], [0], [0], [1], [0, 0, 1, 1], [], []>} : vector<8x16xbf16>, vector<16x8xbf16>, vector<8x8xf32> -> vector<8x8xf32>
    %cst_23 = arith.constant dense<0xFF800000> : vector<8xf32>
    %69 = vector.multi_reduction <maximumf>, %68, %cst_23 [1] : vector<8x8xf32> to vector<8xf32>
    %70 = vector.shape_cast %69 : vector<8xf32> to vector<8x1xf32>
    %71 = vector.broadcast %70 : vector<8x1xf32> to vector<8x8xf32>
    %72 = arith.subf %68, %71 : vector<8x8xf32>
    %73 = math.exp %72 : vector<8x8xf32>
    %cst_24 = arith.constant dense<0.000000e+00> : vector<8xf32>
    %74 = vector.multi_reduction <add>, %73, %cst_24 [1] : vector<8x8xf32> to vector<8xf32>
    %75 = vector.shape_cast %74 : vector<8xf32> to vector<8x1xf32>
    %76 = tpu.reciprocal %75 {approx = true} : vector<8x1xf32> -> vector<8x1xf32>
    %77 = vector.broadcast %76 : vector<8x1xf32> to vector<8x8xf32>
    %78 = arith.mulf %73, %77 : vector<8x8xf32>
    %79 = arith.truncf %64 : vector<16x8xf32> to vector<16x8xbf16>
    %80 = tpu.transpose %78, [1, 0] : vector<8x8xf32> -> vector<8x8xf32>
    %81 = arith.truncf %80 : vector<8x8xf32> to vector<8x8xbf16>
    %cst_25 = arith.constant dense<0.000000e+00> : vector<16x8xf32>
    %82 = tpu.matmul %79, %81, %cst_25 {dimension_numbers = #tpu.dot_dimension_numbers<[1], [0], [0], [1], [0, 0, 1, 1], [], []>} : vector<16x8xbf16>, vector<8x8xbf16>, vector<16x8xf32> -> vector<16x8xf32>
    %83 = vector.extract_strided_slice %36 {offsets = [32, 0], sizes = [16, 8], strides = [1, 1]} : vector<128x8xf32> to vector<16x8xf32>
    %84 = vector.extract_strided_slice %38 {offsets = [32, 0], sizes = [16, 8], strides = [1, 1]} : vector<128x8xf32> to vector<16x8xf32>
    %85 = vector.extract_strided_slice %40 {offsets = [32, 0], sizes = [16, 8], strides = [1, 1]} : vector<128x8xf32> to vector<16x8xf32>
    %86 = tpu.transpose %83, [1, 0] : vector<16x8xf32> -> vector<8x16xf32>
    %87 = arith.truncf %86 : vector<8x16xf32> to vector<8x16xbf16>
    %88 = arith.truncf %84 : vector<16x8xf32> to vector<16x8xbf16>
    %cst_26 = arith.constant dense<0.000000e+00> : vector<8x8xf32>
    %89 = tpu.matmul %87, %88, %cst_26 {dimension_numbers = #tpu.dot_dimension_numbers<[1], [0], [0], [1], [0, 0, 1, 1], [], []>} : vector<8x16xbf16>, vector<16x8xbf16>, vector<8x8xf32> -> vector<8x8xf32>
    %cst_27 = arith.constant dense<0xFF800000> : vector<8xf32>
    %90 = vector.multi_reduction <maximumf>, %89, %cst_27 [1] : vector<8x8xf32> to vector<8xf32>
    %91 = vector.shape_cast %90 : vector<8xf32> to vector<8x1xf32>
    %92 = vector.broadcast %91 : vector<8x1xf32> to vector<8x8xf32>
    %93 = arith.subf %89, %92 : vector<8x8xf32>
    %94 = math.exp %93 : vector<8x8xf32>
    %cst_28 = arith.constant dense<0.000000e+00> : vector<8xf32>
    %95 = vector.multi_reduction <add>, %94, %cst_28 [1] : vector<8x8xf32> to vector<8xf32>
    %96 = vector.shape_cast %95 : vector<8xf32> to vector<8x1xf32>
    %97 = tpu.reciprocal %96 {approx = true} : vector<8x1xf32> -> vector<8x1xf32>
    %98 = vector.broadcast %97 : vector<8x1xf32> to vector<8x8xf32>
    %99 = arith.mulf %94, %98 : vector<8x8xf32>
    %100 = arith.truncf %85 : vector<16x8xf32> to vector<16x8xbf16>
    %101 = tpu.transpose %99, [1, 0] : vector<8x8xf32> -> vector<8x8xf32>
    %102 = arith.truncf %101 : vector<8x8xf32> to vector<8x8xbf16>
    %cst_29 = arith.constant dense<0.000000e+00> : vector<16x8xf32>
    %103 = tpu.matmul %100, %102, %cst_29 {dimension_numbers = #tpu.dot_dimension_numbers<[1], [0], [0], [1], [0, 0, 1, 1], [], []>} : vector<16x8xbf16>, vector<8x8xbf16>, vector<16x8xf32> -> vector<16x8xf32>
    %104 = vector.extract_strided_slice %36 {offsets = [48, 0], sizes = [16, 8], strides = [1, 1]} : vector<128x8xf32> to vector<16x8xf32>
    %105 = vector.extract_strided_slice %38 {offsets = [48, 0], sizes = [16, 8], strides = [1, 1]} : vector<128x8xf32> to vector<16x8xf32>
    %106 = vector.extract_strided_slice %40 {offsets = [48, 0], sizes = [16, 8], strides = [1, 1]} : vector<128x8xf32> to vector<16x8xf32>
    %107 = tpu.transpose %104, [1, 0] : vector<16x8xf32> -> vector<8x16xf32>
    %108 = arith.truncf %107 : vector<8x16xf32> to vector<8x16xbf16>
    %109 = arith.truncf %105 : vector<16x8xf32> to vector<16x8xbf16>
    %cst_30 = arith.constant dense<0.000000e+00> : vector<8x8xf32>
    %110 = tpu.matmul %108, %109, %cst_30 {dimension_numbers = #tpu.dot_dimension_numbers<[1], [0], [0], [1], [0, 0, 1, 1], [], []>} : vector<8x16xbf16>, vector<16x8xbf16>, vector<8x8xf32> -> vector<8x8xf32>
    %cst_31 = arith.constant dense<0xFF800000> : vector<8xf32>
    %111 = vector.multi_reduction <maximumf>, %110, %cst_31 [1] : vector<8x8xf32> to vector<8xf32>
    %112 = vector.shape_cast %111 : vector<8xf32> to vector<8x1xf32>
    %113 = vector.broadcast %112 : vector<8x1xf32> to vector<8x8xf32>
    %114 = arith.subf %110, %113 : vector<8x8xf32>
    %115 = math.exp %114 : vector<8x8xf32>
    %cst_32 = arith.constant dense<0.000000e+00> : vector<8xf32>
    %116 = vector.multi_reduction <add>, %115, %cst_32 [1] : vector<8x8xf32> to vector<8xf32>
    %117 = vector.shape_cast %116 : vector<8xf32> to vector<8x1xf32>
    %118 = tpu.reciprocal %117 {approx = true} : vector<8x1xf32> -> vector<8x1xf32>
    %119 = vector.broadcast %118 : vector<8x1xf32> to vector<8x8xf32>
    %120 = arith.mulf %115, %119 : vector<8x8xf32>
    %121 = arith.truncf %106 : vector<16x8xf32> to vector<16x8xbf16>
    %122 = tpu.transpose %120, [1, 0] : vector<8x8xf32> -> vector<8x8xf32>
    %123 = arith.truncf %122 : vector<8x8xf32> to vector<8x8xbf16>
    %cst_33 = arith.constant dense<0.000000e+00> : vector<16x8xf32>
    %124 = tpu.matmul %121, %123, %cst_33 {dimension_numbers = #tpu.dot_dimension_numbers<[1], [0], [0], [1], [0, 0, 1, 1], [], []>} : vector<16x8xbf16>, vector<8x8xbf16>, vector<16x8xf32> -> vector<16x8xf32>
    %125 = vector.extract_strided_slice %36 {offsets = [64, 0], sizes = [16, 8], strides = [1, 1]} : vector<128x8xf32> to vector<16x8xf32>
    %126 = vector.extract_strided_slice %38 {offsets = [64, 0], sizes = [16, 8], strides = [1, 1]} : vector<128x8xf32> to vector<16x8xf32>
    %127 = vector.extract_strided_slice %40 {offsets = [64, 0], sizes = [16, 8], strides = [1, 1]} : vector<128x8xf32> to vector<16x8xf32>
    %128 = tpu.transpose %125, [1, 0] : vector<16x8xf32> -> vector<8x16xf32>
    %129 = arith.truncf %128 : vector<8x16xf32> to vector<8x16xbf16>
    %130 = arith.truncf %126 : vector<16x8xf32> to vector<16x8xbf16>
    %cst_34 = arith.constant dense<0.000000e+00> : vector<8x8xf32>
    %131 = tpu.matmul %129, %130, %cst_34 {dimension_numbers = #tpu.dot_dimension_numbers<[1], [0], [0], [1], [0, 0, 1, 1], [], []>} : vector<8x16xbf16>, vector<16x8xbf16>, vector<8x8xf32> -> vector<8x8xf32>
    %cst_35 = arith.constant dense<0xFF800000> : vector<8xf32>
    %132 = vector.multi_reduction <maximumf>, %131, %cst_35 [1] : vector<8x8xf32> to vector<8xf32>
    %133 = vector.shape_cast %132 : vector<8xf32> to vector<8x1xf32>
    %134 = vector.broadcast %133 : vector<8x1xf32> to vector<8x8xf32>
    %135 = arith.subf %131, %134 : vector<8x8xf32>
    %136 = math.exp %135 : vector<8x8xf32>
    %cst_36 = arith.constant dense<0.000000e+00> : vector<8xf32>
    %137 = vector.multi_reduction <add>, %136, %cst_36 [1] : vector<8x8xf32> to vector<8xf32>
    %138 = vector.shape_cast %137 : vector<8xf32> to vector<8x1xf32>
    %139 = tpu.reciprocal %138 {approx = true} : vector<8x1xf32> -> vector<8x1xf32>
    %140 = vector.broadcast %139 : vector<8x1xf32> to vector<8x8xf32>
    %141 = arith.mulf %136, %140 : vector<8x8xf32>
    %142 = arith.truncf %127 : vector<16x8xf32> to vector<16x8xbf16>
    %143 = tpu.transpose %141, [1, 0] : vector<8x8xf32> -> vector<8x8xf32>
    %144 = arith.truncf %143 : vector<8x8xf32> to vector<8x8xbf16>
    %cst_37 = arith.constant dense<0.000000e+00> : vector<16x8xf32>
    %145 = tpu.matmul %142, %144, %cst_37 {dimension_numbers = #tpu.dot_dimension_numbers<[1], [0], [0], [1], [0, 0, 1, 1], [], []>} : vector<16x8xbf16>, vector<8x8xbf16>, vector<16x8xf32> -> vector<16x8xf32>
    %146 = vector.extract_strided_slice %36 {offsets = [80, 0], sizes = [16, 8], strides = [1, 1]} : vector<128x8xf32> to vector<16x8xf32>
    %147 = vector.extract_strided_slice %38 {offsets = [80, 0], sizes = [16, 8], strides = [1, 1]} : vector<128x8xf32> to vector<16x8xf32>
    %148 = vector.extract_strided_slice %40 {offsets = [80, 0], sizes = [16, 8], strides = [1, 1]} : vector<128x8xf32> to vector<16x8xf32>
    %149 = tpu.transpose %146, [1, 0] : vector<16x8xf32> -> vector<8x16xf32>
    %150 = arith.truncf %149 : vector<8x16xf32> to vector<8x16xbf16>
    %151 = arith.truncf %147 : vector<16x8xf32> to vector<16x8xbf16>
    %cst_38 = arith.constant dense<0.000000e+00> : vector<8x8xf32>
    %152 = tpu.matmul %150, %151, %cst_38 {dimension_numbers = #tpu.dot_dimension_numbers<[1], [0], [0], [1], [0, 0, 1, 1], [], []>} : vector<8x16xbf16>, vector<16x8xbf16>, vector<8x8xf32> -> vector<8x8xf32>
    %cst_39 = arith.constant dense<0xFF800000> : vector<8xf32>
    %153 = vector.multi_reduction <maximumf>, %152, %cst_39 [1] : vector<8x8xf32> to vector<8xf32>
    %154 = vector.shape_cast %153 : vector<8xf32> to vector<8x1xf32>
    %155 = vector.broadcast %154 : vector<8x1xf32> to vector<8x8xf32>
    %156 = arith.subf %152, %155 : vector<8x8xf32>
    %157 = math.exp %156 : vector<8x8xf32>
    %cst_40 = arith.constant dense<0.000000e+00> : vector<8xf32>
    %158 = vector.multi_reduction <add>, %157, %cst_40 [1] : vector<8x8xf32> to vector<8xf32>
    %159 = vector.shape_cast %158 : vector<8xf32> to vector<8x1xf32>
    %160 = tpu.reciprocal %159 {approx = true} : vector<8x1xf32> -> vector<8x1xf32>
    %161 = vector.broadcast %160 : vector<8x1xf32> to vector<8x8xf32>
    %162 = arith.mulf %157, %161 : vector<8x8xf32>
    %163 = arith.truncf %148 : vector<16x8xf32> to vector<16x8xbf16>
    %164 = tpu.transpose %162, [1, 0] : vector<8x8xf32> -> vector<8x8xf32>
    %165 = arith.truncf %164 : vector<8x8xf32> to vector<8x8xbf16>
    %cst_41 = arith.constant dense<0.000000e+00> : vector<16x8xf32>
    %166 = tpu.matmul %163, %165, %cst_41 {dimension_numbers = #tpu.dot_dimension_numbers<[1], [0], [0], [1], [0, 0, 1, 1], [], []>} : vector<16x8xbf16>, vector<8x8xbf16>, vector<16x8xf32> -> vector<16x8xf32>
    %167 = vector.extract_strided_slice %36 {offsets = [96, 0], sizes = [16, 8], strides = [1, 1]} : vector<128x8xf32> to vector<16x8xf32>
    %168 = vector.extract_strided_slice %38 {offsets = [96, 0], sizes = [16, 8], strides = [1, 1]} : vector<128x8xf32> to vector<16x8xf32>
    %169 = vector.extract_strided_slice %40 {offsets = [96, 0], sizes = [16, 8], strides = [1, 1]} : vector<128x8xf32> to vector<16x8xf32>
    %170 = tpu.transpose %167, [1, 0] : vector<16x8xf32> -> vector<8x16xf32>
    %171 = arith.truncf %170 : vector<8x16xf32> to vector<8x16xbf16>
    %172 = arith.truncf %168 : vector<16x8xf32> to vector<16x8xbf16>
    %cst_42 = arith.constant dense<0.000000e+00> : vector<8x8xf32>
    %173 = tpu.matmul %171, %172, %cst_42 {dimension_numbers = #tpu.dot_dimension_numbers<[1], [0], [0], [1], [0, 0, 1, 1], [], []>} : vector<8x16xbf16>, vector<16x8xbf16>, vector<8x8xf32> -> vector<8x8xf32>
    %cst_43 = arith.constant dense<0xFF800000> : vector<8xf32>
    %174 = vector.multi_reduction <maximumf>, %173, %cst_43 [1] : vector<8x8xf32> to vector<8xf32>
    %175 = vector.shape_cast %174 : vector<8xf32> to vector<8x1xf32>
    %176 = vector.broadcast %175 : vector<8x1xf32> to vector<8x8xf32>
    %177 = arith.subf %173, %176 : vector<8x8xf32>
    %178 = math.exp %177 : vector<8x8xf32>
    %cst_44 = arith.constant dense<0.000000e+00> : vector<8xf32>
    %179 = vector.multi_reduction <add>, %178, %cst_44 [1] : vector<8x8xf32> to vector<8xf32>
    %180 = vector.shape_cast %179 : vector<8xf32> to vector<8x1xf32>
    %181 = tpu.reciprocal %180 {approx = true} : vector<8x1xf32> -> vector<8x1xf32>
    %182 = vector.broadcast %181 : vector<8x1xf32> to vector<8x8xf32>
    %183 = arith.mulf %178, %182 : vector<8x8xf32>
    %184 = arith.truncf %169 : vector<16x8xf32> to vector<16x8xbf16>
    %185 = tpu.transpose %183, [1, 0] : vector<8x8xf32> -> vector<8x8xf32>
    %186 = arith.truncf %185 : vector<8x8xf32> to vector<8x8xbf16>
    %cst_45 = arith.constant dense<0.000000e+00> : vector<16x8xf32>
    %187 = tpu.matmul %184, %186, %cst_45 {dimension_numbers = #tpu.dot_dimension_numbers<[1], [0], [0], [1], [0, 0, 1, 1], [], []>} : vector<16x8xbf16>, vector<8x8xbf16>, vector<16x8xf32> -> vector<16x8xf32>
    %188 = vector.extract_strided_slice %36 {offsets = [112, 0], sizes = [16, 8], strides = [1, 1]} : vector<128x8xf32> to vector<16x8xf32>
    %189 = vector.extract_strided_slice %38 {offsets = [112, 0], sizes = [16, 8], strides = [1, 1]} : vector<128x8xf32> to vector<16x8xf32>
    %190 = vector.extract_strided_slice %40 {offsets = [112, 0], sizes = [16, 8], strides = [1, 1]} : vector<128x8xf32> to vector<16x8xf32>
    %191 = tpu.transpose %188, [1, 0] : vector<16x8xf32> -> vector<8x16xf32>
    %192 = arith.truncf %191 : vector<8x16xf32> to vector<8x16xbf16>
    %193 = arith.truncf %189 : vector<16x8xf32> to vector<16x8xbf16>
    %cst_46 = arith.constant dense<0.000000e+00> : vector<8x8xf32>
    %194 = tpu.matmul %192, %193, %cst_46 {dimension_numbers = #tpu.dot_dimension_numbers<[1], [0], [0], [1], [0, 0, 1, 1], [], []>} : vector<8x16xbf16>, vector<16x8xbf16>, vector<8x8xf32> -> vector<8x8xf32>
    %cst_47 = arith.constant dense<0xFF800000> : vector<8xf32>
    %195 = vector.multi_reduction <maximumf>, %194, %cst_47 [1] : vector<8x8xf32> to vector<8xf32>
    %196 = vector.shape_cast %195 : vector<8xf32> to vector<8x1xf32>
    %197 = vector.broadcast %196 : vector<8x1xf32> to vector<8x8xf32>
    %198 = arith.subf %194, %197 : vector<8x8xf32>
    %199 = math.exp %198 : vector<8x8xf32>
    %cst_48 = arith.constant dense<0.000000e+00> : vector<8xf32>
    %200 = vector.multi_reduction <add>, %199, %cst_48 [1] : vector<8x8xf32> to vector<8xf32>
    %201 = vector.shape_cast %200 : vector<8xf32> to vector<8x1xf32>
    %202 = tpu.reciprocal %201 {approx = true} : vector<8x1xf32> -> vector<8x1xf32>
    %203 = vector.broadcast %202 : vector<8x1xf32> to vector<8x8xf32>
    %204 = arith.mulf %199, %203 : vector<8x8xf32>
    %205 = arith.truncf %190 : vector<16x8xf32> to vector<16x8xbf16>
    %206 = tpu.transpose %204, [1, 0] : vector<8x8xf32> -> vector<8x8xf32>
    %207 = arith.truncf %206 : vector<8x8xf32> to vector<8x8xbf16>
    %cst_49 = arith.constant dense<0.000000e+00> : vector<16x8xf32>
    %208 = tpu.matmul %205, %207, %cst_49 {dimension_numbers = #tpu.dot_dimension_numbers<[1], [0], [0], [1], [0, 0, 1, 1], [], []>} : vector<16x8xbf16>, vector<8x8xbf16>, vector<16x8xf32> -> vector<16x8xf32>
    %209 = tpu.concatenate %61, %82, %103, %124, %145, %166, %187, %208 in 0 : vector<16x8xf32>, vector<16x8xf32>, vector<16x8xf32>, vector<16x8xf32>, vector<16x8xf32>, vector<16x8xf32>, vector<16x8xf32>, vector<16x8xf32> -> vector<128x8xf32>
    %210 = tpu.transpose %209, [1, 0] : vector<128x8xf32> -> vector<8x128xf32>
    %211 = arith.truncf %210 : vector<8x128xf32> to vector<8x128xbf16>
    %c0_50 = arith.constant 0 : index
    %c0_51 = arith.constant 0 : index
    %c0_52 = arith.constant 0 : index
    %212 = vector.load %arg5[%c0_50, %c0_51, %c0_52] : memref<3x128x128xbf16, #tpu.memory_space<vmem>>, vector<1x128x128xbf16>
    %213 = vector.shape_cast %212 : vector<1x128x128xbf16> to vector<128x128xbf16>
    %cst_53 = arith.constant dense<0.000000e+00> : vector<8x128xf32>
    %214 = tpu.matmul %211, %213, %cst_53 {dimension_numbers = #tpu.dot_dimension_numbers<[1], [0], [0], [1], [0, 0, 1, 1], [], []>} : vector<8x128xbf16>, vector<128x128xbf16>, vector<8x128xf32> -> vector<8x128xf32>
    %c0_54 = arith.constant 0 : index
    %c0_55 = arith.constant 0 : index
    %c0_56 = arith.constant 0 : index
    %215 = vector.load %arg6[%c0_54, %c0_55, %c0_56] : memref<3x1x128xf32, #tpu.memory_space<vmem>>, vector<1x1x128xf32>
    %216 = vector.shape_cast %215 : vector<1x1x128xf32> to vector<1x128xf32>
    %217 = vector.broadcast %216 : vector<1x128xf32> to vector<8x128xf32>
    %218 = arith.addf %214, %217 : vector<8x128xf32>
    %219 = arith.addf %218, %0 : vector<8x128xf32>
    %c0_57 = arith.constant 0 : index
    %c0_58 = arith.constant 0 : index
    %c0_59 = arith.constant 0 : index
    %220 = vector.load %arg7[%c0_57, %c0_58, %c0_59] : memref<3x1x128xf32, #tpu.memory_space<vmem>>, vector<1x1x128xf32>
    %221 = vector.shape_cast %220 : vector<1x1x128xf32> to vector<1x128xf32>
    %c0_60 = arith.constant 0 : index
    %c0_61 = arith.constant 0 : index
    %c0_62 = arith.constant 0 : index
    %222 = vector.load %arg8[%c0_60, %c0_61, %c0_62] : memref<3x1x128xf32, #tpu.memory_space<vmem>>, vector<1x1x128xf32>
    %223 = vector.shape_cast %222 : vector<1x1x128xf32> to vector<1x128xf32>
    %cst_63 = arith.constant dense<0.000000e+00> : vector<8xf32>
    %224 = vector.multi_reduction <add>, %219, %cst_63 [1] : vector<8x128xf32> to vector<8xf32>
    %225 = vector.shape_cast %224 : vector<8xf32> to vector<8x1xf32>
    %cst_64 = arith.constant 1.280000e+02 : f32
    %226 = vector.broadcast %cst_64 : f32 to vector<8x1xf32>
    %227 = arith.divf %225, %226 : vector<8x1xf32>
    %228 = vector.broadcast %227 : vector<8x1xf32> to vector<8x128xf32>
    %229 = arith.subf %219, %228 : vector<8x128xf32>
    %230 = arith.mulf %229, %229 : vector<8x128xf32>
    %cst_65 = arith.constant dense<0.000000e+00> : vector<8xf32>
    %231 = vector.multi_reduction <add>, %230, %cst_65 [1] : vector<8x128xf32> to vector<8xf32>
    %232 = vector.shape_cast %231 : vector<8xf32> to vector<8x1xf32>
    %cst_66 = arith.constant 1.280000e+02 : f32
    %233 = vector.broadcast %cst_66 : f32 to vector<8x1xf32>
    %234 = arith.divf %232, %233 : vector<8x1xf32>
    %235 = vector.broadcast %227 : vector<8x1xf32> to vector<8x128xf32>
    %236 = arith.subf %219, %235 : vector<8x128xf32>
    %cst_67 = arith.constant 9.99999974E-6 : f32
    %237 = vector.broadcast %cst_67 : f32 to vector<8x1xf32>
    %238 = arith.addf %234, %237 : vector<8x1xf32>
    %239 = math.rsqrt %238 : vector<8x1xf32>
    %240 = vector.broadcast %239 : vector<8x1xf32> to vector<8x128xf32>
    %241 = arith.mulf %236, %240 : vector<8x128xf32>
    %242 = vector.broadcast %221 : vector<1x128xf32> to vector<8x128xf32>
    %243 = arith.mulf %241, %242 : vector<8x128xf32>
    %244 = vector.broadcast %223 : vector<1x128xf32> to vector<8x128xf32>
    %245 = arith.addf %243, %244 : vector<8x128xf32>
    %246 = arith.truncf %245 : vector<8x128xf32> to vector<8x128xbf16>
    %c0_68 = arith.constant 0 : index
    %c0_69 = arith.constant 0 : index
    %c0_70 = arith.constant 0 : index
    %247 = vector.load %arg9[%c0_68, %c0_69, %c0_70] : memref<3x128x512xbf16, #tpu.memory_space<vmem>>, vector<1x128x512xbf16>
    %248 = vector.shape_cast %247 : vector<1x128x512xbf16> to vector<128x512xbf16>
    %cst_71 = arith.constant dense<0.000000e+00> : vector<8x512xf32>
    %249 = tpu.matmul %246, %248, %cst_71 {dimension_numbers = #tpu.dot_dimension_numbers<[1], [0], [0], [1], [0, 0, 1, 1], [], []>} : vector<8x128xbf16>, vector<128x512xbf16>, vector<8x512xf32> -> vector<8x512xf32>
    %c0_72 = arith.constant 0 : index
    %c0_73 = arith.constant 0 : index
    %c0_74 = arith.constant 0 : index
    %250 = vector.load %arg10[%c0_72, %c0_73, %c0_74] : memref<3x1x512xf32, #tpu.memory_space<vmem>>, vector<1x1x512xf32>
    %251 = vector.shape_cast %250 : vector<1x1x512xf32> to vector<1x512xf32>
    %252 = vector.broadcast %251 : vector<1x512xf32> to vector<8x512xf32>
    %253 = arith.addf %249, %252 : vector<8x512xf32>
    %cst_75 = arith.constant 0.000000e+00 : f32
    %254 = vector.broadcast %cst_75 : f32 to vector<8x512xf32>
    %255 = arith.maximumf %253, %254 : vector<8x512xf32>
    %256 = arith.truncf %255 : vector<8x512xf32> to vector<8x512xbf16>
    %c0_76 = arith.constant 0 : index
    %c0_77 = arith.constant 0 : index
    %c0_78 = arith.constant 0 : index
    %257 = vector.load %arg11[%c0_76, %c0_77, %c0_78] : memref<3x512x128xbf16, #tpu.memory_space<vmem>>, vector<1x512x128xbf16>
    %258 = vector.shape_cast %257 : vector<1x512x128xbf16> to vector<512x128xbf16>
    %cst_79 = arith.constant dense<0.000000e+00> : vector<8x128xf32>
    %259 = tpu.matmul %256, %258, %cst_79 {dimension_numbers = #tpu.dot_dimension_numbers<[1], [0], [0], [1], [0, 0, 1, 1], [], []>} : vector<8x512xbf16>, vector<512x128xbf16>, vector<8x128xf32> -> vector<8x128xf32>
    %c0_80 = arith.constant 0 : index
    %c0_81 = arith.constant 0 : index
    %c0_82 = arith.constant 0 : index
    %260 = vector.load %arg12[%c0_80, %c0_81, %c0_82] : memref<3x1x128xf32, #tpu.memory_space<vmem>>, vector<1x1x128xf32>
    %261 = vector.shape_cast %260 : vector<1x1x128xf32> to vector<1x128xf32>
    %262 = vector.broadcast %261 : vector<1x128xf32> to vector<8x128xf32>
    %263 = arith.addf %259, %262 : vector<8x128xf32>
    %264 = arith.addf %219, %263 : vector<8x128xf32>
    %c1 = arith.constant 1 : index
    %c0_83 = arith.constant 0 : index
    %c0_84 = arith.constant 0 : index
    %265 = vector.load %arg1[%c1, %c0_83, %c0_84] : memref<3x1x128xf32, #tpu.memory_space<vmem>>, vector<1x1x128xf32>
    %266 = vector.shape_cast %265 : vector<1x1x128xf32> to vector<1x128xf32>
    %c1_85 = arith.constant 1 : index
    %c0_86 = arith.constant 0 : index
    %c0_87 = arith.constant 0 : index
    %267 = vector.load %arg2[%c1_85, %c0_86, %c0_87] : memref<3x1x128xf32, #tpu.memory_space<vmem>>, vector<1x1x128xf32>
    %268 = vector.shape_cast %267 : vector<1x1x128xf32> to vector<1x128xf32>
    %cst_88 = arith.constant dense<0.000000e+00> : vector<8xf32>
    %269 = vector.multi_reduction <add>, %264, %cst_88 [1] : vector<8x128xf32> to vector<8xf32>
    %270 = vector.shape_cast %269 : vector<8xf32> to vector<8x1xf32>
    %cst_89 = arith.constant 1.280000e+02 : f32
    %271 = vector.broadcast %cst_89 : f32 to vector<8x1xf32>
    %272 = arith.divf %270, %271 : vector<8x1xf32>
    %273 = vector.broadcast %272 : vector<8x1xf32> to vector<8x128xf32>
    %274 = arith.subf %264, %273 : vector<8x128xf32>
    %275 = arith.mulf %274, %274 : vector<8x128xf32>
    %cst_90 = arith.constant dense<0.000000e+00> : vector<8xf32>
    %276 = vector.multi_reduction <add>, %275, %cst_90 [1] : vector<8x128xf32> to vector<8xf32>
    %277 = vector.shape_cast %276 : vector<8xf32> to vector<8x1xf32>
    %cst_91 = arith.constant 1.280000e+02 : f32
    %278 = vector.broadcast %cst_91 : f32 to vector<8x1xf32>
    %279 = arith.divf %277, %278 : vector<8x1xf32>
    %280 = vector.broadcast %272 : vector<8x1xf32> to vector<8x128xf32>
    %281 = arith.subf %264, %280 : vector<8x128xf32>
    %cst_92 = arith.constant 9.99999974E-6 : f32
    %282 = vector.broadcast %cst_92 : f32 to vector<8x1xf32>
    %283 = arith.addf %279, %282 : vector<8x1xf32>
    %284 = math.rsqrt %283 : vector<8x1xf32>
    %285 = vector.broadcast %284 : vector<8x1xf32> to vector<8x128xf32>
    %286 = arith.mulf %281, %285 : vector<8x128xf32>
    %287 = vector.broadcast %266 : vector<1x128xf32> to vector<8x128xf32>
    %288 = arith.mulf %286, %287 : vector<8x128xf32>
    %289 = vector.broadcast %268 : vector<1x128xf32> to vector<8x128xf32>
    %290 = arith.addf %288, %289 : vector<8x128xf32>
    %291 = arith.truncf %290 : vector<8x128xf32> to vector<8x128xbf16>
    %c1_93 = arith.constant 1 : index
    %c0_94 = arith.constant 0 : index
    %c0_95 = arith.constant 0 : index
    %292 = vector.load %arg3[%c1_93, %c0_94, %c0_95] : memref<3x128x384xbf16, #tpu.memory_space<vmem>>, vector<1x128x384xbf16>
    %293 = vector.shape_cast %292 : vector<1x128x384xbf16> to vector<128x384xbf16>
    %cst_96 = arith.constant dense<0.000000e+00> : vector<8x384xf32>
    %294 = tpu.matmul %291, %293, %cst_96 {dimension_numbers = #tpu.dot_dimension_numbers<[1], [0], [0], [1], [0, 0, 1, 1], [], []>} : vector<8x128xbf16>, vector<128x384xbf16>, vector<8x384xf32> -> vector<8x384xf32>
    %c1_97 = arith.constant 1 : index
    %c0_98 = arith.constant 0 : index
    %c0_99 = arith.constant 0 : index
    %295 = vector.load %arg4[%c1_97, %c0_98, %c0_99] : memref<3x1x384xf32, #tpu.memory_space<vmem>>, vector<1x1x384xf32>
    %296 = vector.shape_cast %295 : vector<1x1x384xf32> to vector<1x384xf32>
    %297 = vector.broadcast %296 : vector<1x384xf32> to vector<8x384xf32>
    %298 = arith.addf %294, %297 : vector<8x384xf32>
    %299 = vector.extract_strided_slice %298 {offsets = [0, 0], sizes = [8, 128], strides = [1, 1]} : vector<8x384xf32> to vector<8x128xf32>
    %300 = tpu.transpose %299, [1, 0] : vector<8x128xf32> -> vector<128x8xf32>
    %301 = vector.extract_strided_slice %298 {offsets = [0, 128], sizes = [8, 128], strides = [1, 1]} : vector<8x384xf32> to vector<8x128xf32>
    %302 = tpu.transpose %301, [1, 0] : vector<8x128xf32> -> vector<128x8xf32>
    %303 = vector.extract_strided_slice %298 {offsets = [0, 256], sizes = [8, 128], strides = [1, 1]} : vector<8x384xf32> to vector<8x128xf32>
    %304 = tpu.transpose %303, [1, 0] : vector<8x128xf32> -> vector<128x8xf32>
    %305 = vector.extract_strided_slice %300 {offsets = [0, 0], sizes = [16, 8], strides = [1, 1]} : vector<128x8xf32> to vector<16x8xf32>
    %306 = vector.extract_strided_slice %302 {offsets = [0, 0], sizes = [16, 8], strides = [1, 1]} : vector<128x8xf32> to vector<16x8xf32>
    %307 = vector.extract_strided_slice %304 {offsets = [0, 0], sizes = [16, 8], strides = [1, 1]} : vector<128x8xf32> to vector<16x8xf32>
    %308 = tpu.transpose %305, [1, 0] : vector<16x8xf32> -> vector<8x16xf32>
    %309 = arith.truncf %308 : vector<8x16xf32> to vector<8x16xbf16>
    %310 = arith.truncf %306 : vector<16x8xf32> to vector<16x8xbf16>
    %cst_100 = arith.constant dense<0.000000e+00> : vector<8x8xf32>
    %311 = tpu.matmul %309, %310, %cst_100 {dimension_numbers = #tpu.dot_dimension_numbers<[1], [0], [0], [1], [0, 0, 1, 1], [], []>} : vector<8x16xbf16>, vector<16x8xbf16>, vector<8x8xf32> -> vector<8x8xf32>
    %cst_101 = arith.constant dense<0xFF800000> : vector<8xf32>
    %312 = vector.multi_reduction <maximumf>, %311, %cst_101 [1] : vector<8x8xf32> to vector<8xf32>
    %313 = vector.shape_cast %312 : vector<8xf32> to vector<8x1xf32>
    %314 = vector.broadcast %313 : vector<8x1xf32> to vector<8x8xf32>
    %315 = arith.subf %311, %314 : vector<8x8xf32>
    %316 = math.exp %315 : vector<8x8xf32>
    %cst_102 = arith.constant dense<0.000000e+00> : vector<8xf32>
    %317 = vector.multi_reduction <add>, %316, %cst_102 [1] : vector<8x8xf32> to vector<8xf32>
    %318 = vector.shape_cast %317 : vector<8xf32> to vector<8x1xf32>
    %319 = tpu.reciprocal %318 {approx = true} : vector<8x1xf32> -> vector<8x1xf32>
    %320 = vector.broadcast %319 : vector<8x1xf32> to vector<8x8xf32>
    %321 = arith.mulf %316, %320 : vector<8x8xf32>
    %322 = arith.truncf %307 : vector<16x8xf32> to vector<16x8xbf16>
    %323 = tpu.transpose %321, [1, 0] : vector<8x8xf32> -> vector<8x8xf32>
    %324 = arith.truncf %323 : vector<8x8xf32> to vector<8x8xbf16>
    %cst_103 = arith.constant dense<0.000000e+00> : vector<16x8xf32>
    %325 = tpu.matmul %322, %324, %cst_103 {dimension_numbers = #tpu.dot_dimension_numbers<[1], [0], [0], [1], [0, 0, 1, 1], [], []>} : vector<16x8xbf16>, vector<8x8xbf16>, vector<16x8xf32> -> vector<16x8xf32>
    %326 = vector.extract_strided_slice %300 {offsets = [16, 0], sizes = [16, 8], strides = [1, 1]} : vector<128x8xf32> to vector<16x8xf32>
    %327 = vector.extract_strided_slice %302 {offsets = [16, 0], sizes = [16, 8], strides = [1, 1]} : vector<128x8xf32> to vector<16x8xf32>
    %328 = vector.extract_strided_slice %304 {offsets = [16, 0], sizes = [16, 8], strides = [1, 1]} : vector<128x8xf32> to vector<16x8xf32>
    %329 = tpu.transpose %326, [1, 0] : vector<16x8xf32> -> vector<8x16xf32>
    %330 = arith.truncf %329 : vector<8x16xf32> to vector<8x16xbf16>
    %331 = arith.truncf %327 : vector<16x8xf32> to vector<16x8xbf16>
    %cst_104 = arith.constant dense<0.000000e+00> : vector<8x8xf32>
    %332 = tpu.matmul %330, %331, %cst_104 {dimension_numbers = #tpu.dot_dimension_numbers<[1], [0], [0], [1], [0, 0, 1, 1], [], []>} : vector<8x16xbf16>, vector<16x8xbf16>, vector<8x8xf32> -> vector<8x8xf32>
    %cst_105 = arith.constant dense<0xFF800000> : vector<8xf32>
    %333 = vector.multi_reduction <maximumf>, %332, %cst_105 [1] : vector<8x8xf32> to vector<8xf32>
    %334 = vector.shape_cast %333 : vector<8xf32> to vector<8x1xf32>
    %335 = vector.broadcast %334 : vector<8x1xf32> to vector<8x8xf32>
    %336 = arith.subf %332, %335 : vector<8x8xf32>
    %337 = math.exp %336 : vector<8x8xf32>
    %cst_106 = arith.constant dense<0.000000e+00> : vector<8xf32>
    %338 = vector.multi_reduction <add>, %337, %cst_106 [1] : vector<8x8xf32> to vector<8xf32>
    %339 = vector.shape_cast %338 : vector<8xf32> to vector<8x1xf32>
    %340 = tpu.reciprocal %339 {approx = true} : vector<8x1xf32> -> vector<8x1xf32>
    %341 = vector.broadcast %340 : vector<8x1xf32> to vector<8x8xf32>
    %342 = arith.mulf %337, %341 : vector<8x8xf32>
    %343 = arith.truncf %328 : vector<16x8xf32> to vector<16x8xbf16>
    %344 = tpu.transpose %342, [1, 0] : vector<8x8xf32> -> vector<8x8xf32>
    %345 = arith.truncf %344 : vector<8x8xf32> to vector<8x8xbf16>
    %cst_107 = arith.constant dense<0.000000e+00> : vector<16x8xf32>
    %346 = tpu.matmul %343, %345, %cst_107 {dimension_numbers = #tpu.dot_dimension_numbers<[1], [0], [0], [1], [0, 0, 1, 1], [], []>} : vector<16x8xbf16>, vector<8x8xbf16>, vector<16x8xf32> -> vector<16x8xf32>
    %347 = vector.extract_strided_slice %300 {offsets = [32, 0], sizes = [16, 8], strides = [1, 1]} : vector<128x8xf32> to vector<16x8xf32>
    %348 = vector.extract_strided_slice %302 {offsets = [32, 0], sizes = [16, 8], strides = [1, 1]} : vector<128x8xf32> to vector<16x8xf32>
    %349 = vector.extract_strided_slice %304 {offsets = [32, 0], sizes = [16, 8], strides = [1, 1]} : vector<128x8xf32> to vector<16x8xf32>
    %350 = tpu.transpose %347, [1, 0] : vector<16x8xf32> -> vector<8x16xf32>
    %351 = arith.truncf %350 : vector<8x16xf32> to vector<8x16xbf16>
    %352 = arith.truncf %348 : vector<16x8xf32> to vector<16x8xbf16>
    %cst_108 = arith.constant dense<0.000000e+00> : vector<8x8xf32>
    %353 = tpu.matmul %351, %352, %cst_108 {dimension_numbers = #tpu.dot_dimension_numbers<[1], [0], [0], [1], [0, 0, 1, 1], [], []>} : vector<8x16xbf16>, vector<16x8xbf16>, vector<8x8xf32> -> vector<8x8xf32>
    %cst_109 = arith.constant dense<0xFF800000> : vector<8xf32>
    %354 = vector.multi_reduction <maximumf>, %353, %cst_109 [1] : vector<8x8xf32> to vector<8xf32>
    %355 = vector.shape_cast %354 : vector<8xf32> to vector<8x1xf32>
    %356 = vector.broadcast %355 : vector<8x1xf32> to vector<8x8xf32>
    %357 = arith.subf %353, %356 : vector<8x8xf32>
    %358 = math.exp %357 : vector<8x8xf32>
    %cst_110 = arith.constant dense<0.000000e+00> : vector<8xf32>
    %359 = vector.multi_reduction <add>, %358, %cst_110 [1] : vector<8x8xf32> to vector<8xf32>
    %360 = vector.shape_cast %359 : vector<8xf32> to vector<8x1xf32>
    %361 = tpu.reciprocal %360 {approx = true} : vector<8x1xf32> -> vector<8x1xf32>
    %362 = vector.broadcast %361 : vector<8x1xf32> to vector<8x8xf32>
    %363 = arith.mulf %358, %362 : vector<8x8xf32>
    %364 = arith.truncf %349 : vector<16x8xf32> to vector<16x8xbf16>
    %365 = tpu.transpose %363, [1, 0] : vector<8x8xf32> -> vector<8x8xf32>
    %366 = arith.truncf %365 : vector<8x8xf32> to vector<8x8xbf16>
    %cst_111 = arith.constant dense<0.000000e+00> : vector<16x8xf32>
    %367 = tpu.matmul %364, %366, %cst_111 {dimension_numbers = #tpu.dot_dimension_numbers<[1], [0], [0], [1], [0, 0, 1, 1], [], []>} : vector<16x8xbf16>, vector<8x8xbf16>, vector<16x8xf32> -> vector<16x8xf32>
    %368 = vector.extract_strided_slice %300 {offsets = [48, 0], sizes = [16, 8], strides = [1, 1]} : vector<128x8xf32> to vector<16x8xf32>
    %369 = vector.extract_strided_slice %302 {offsets = [48, 0], sizes = [16, 8], strides = [1, 1]} : vector<128x8xf32> to vector<16x8xf32>
    %370 = vector.extract_strided_slice %304 {offsets = [48, 0], sizes = [16, 8], strides = [1, 1]} : vector<128x8xf32> to vector<16x8xf32>
    %371 = tpu.transpose %368, [1, 0] : vector<16x8xf32> -> vector<8x16xf32>
    %372 = arith.truncf %371 : vector<8x16xf32> to vector<8x16xbf16>
    %373 = arith.truncf %369 : vector<16x8xf32> to vector<16x8xbf16>
    %cst_112 = arith.constant dense<0.000000e+00> : vector<8x8xf32>
    %374 = tpu.matmul %372, %373, %cst_112 {dimension_numbers = #tpu.dot_dimension_numbers<[1], [0], [0], [1], [0, 0, 1, 1], [], []>} : vector<8x16xbf16>, vector<16x8xbf16>, vector<8x8xf32> -> vector<8x8xf32>
    %cst_113 = arith.constant dense<0xFF800000> : vector<8xf32>
    %375 = vector.multi_reduction <maximumf>, %374, %cst_113 [1] : vector<8x8xf32> to vector<8xf32>
    %376 = vector.shape_cast %375 : vector<8xf32> to vector<8x1xf32>
    %377 = vector.broadcast %376 : vector<8x1xf32> to vector<8x8xf32>
    %378 = arith.subf %374, %377 : vector<8x8xf32>
    %379 = math.exp %378 : vector<8x8xf32>
    %cst_114 = arith.constant dense<0.000000e+00> : vector<8xf32>
    %380 = vector.multi_reduction <add>, %379, %cst_114 [1] : vector<8x8xf32> to vector<8xf32>
    %381 = vector.shape_cast %380 : vector<8xf32> to vector<8x1xf32>
    %382 = tpu.reciprocal %381 {approx = true} : vector<8x1xf32> -> vector<8x1xf32>
    %383 = vector.broadcast %382 : vector<8x1xf32> to vector<8x8xf32>
    %384 = arith.mulf %379, %383 : vector<8x8xf32>
    %385 = arith.truncf %370 : vector<16x8xf32> to vector<16x8xbf16>
    %386 = tpu.transpose %384, [1, 0] : vector<8x8xf32> -> vector<8x8xf32>
    %387 = arith.truncf %386 : vector<8x8xf32> to vector<8x8xbf16>
    %cst_115 = arith.constant dense<0.000000e+00> : vector<16x8xf32>
    %388 = tpu.matmul %385, %387, %cst_115 {dimension_numbers = #tpu.dot_dimension_numbers<[1], [0], [0], [1], [0, 0, 1, 1], [], []>} : vector<16x8xbf16>, vector<8x8xbf16>, vector<16x8xf32> -> vector<16x8xf32>
    %389 = vector.extract_strided_slice %300 {offsets = [64, 0], sizes = [16, 8], strides = [1, 1]} : vector<128x8xf32> to vector<16x8xf32>
    %390 = vector.extract_strided_slice %302 {offsets = [64, 0], sizes = [16, 8], strides = [1, 1]} : vector<128x8xf32> to vector<16x8xf32>
    %391 = vector.extract_strided_slice %304 {offsets = [64, 0], sizes = [16, 8], strides = [1, 1]} : vector<128x8xf32> to vector<16x8xf32>
    %392 = tpu.transpose %389, [1, 0] : vector<16x8xf32> -> vector<8x16xf32>
    %393 = arith.truncf %392 : vector<8x16xf32> to vector<8x16xbf16>
    %394 = arith.truncf %390 : vector<16x8xf32> to vector<16x8xbf16>
    %cst_116 = arith.constant dense<0.000000e+00> : vector<8x8xf32>
    %395 = tpu.matmul %393, %394, %cst_116 {dimension_numbers = #tpu.dot_dimension_numbers<[1], [0], [0], [1], [0, 0, 1, 1], [], []>} : vector<8x16xbf16>, vector<16x8xbf16>, vector<8x8xf32> -> vector<8x8xf32>
    %cst_117 = arith.constant dense<0xFF800000> : vector<8xf32>
    %396 = vector.multi_reduction <maximumf>, %395, %cst_117 [1] : vector<8x8xf32> to vector<8xf32>
    %397 = vector.shape_cast %396 : vector<8xf32> to vector<8x1xf32>
    %398 = vector.broadcast %397 : vector<8x1xf32> to vector<8x8xf32>
    %399 = arith.subf %395, %398 : vector<8x8xf32>
    %400 = math.exp %399 : vector<8x8xf32>
    %cst_118 = arith.constant dense<0.000000e+00> : vector<8xf32>
    %401 = vector.multi_reduction <add>, %400, %cst_118 [1] : vector<8x8xf32> to vector<8xf32>
    %402 = vector.shape_cast %401 : vector<8xf32> to vector<8x1xf32>
    %403 = tpu.reciprocal %402 {approx = true} : vector<8x1xf32> -> vector<8x1xf32>
    %404 = vector.broadcast %403 : vector<8x1xf32> to vector<8x8xf32>
    %405 = arith.mulf %400, %404 : vector<8x8xf32>
    %406 = arith.truncf %391 : vector<16x8xf32> to vector<16x8xbf16>
    %407 = tpu.transpose %405, [1, 0] : vector<8x8xf32> -> vector<8x8xf32>
    %408 = arith.truncf %407 : vector<8x8xf32> to vector<8x8xbf16>
    %cst_119 = arith.constant dense<0.000000e+00> : vector<16x8xf32>
    %409 = tpu.matmul %406, %408, %cst_119 {dimension_numbers = #tpu.dot_dimension_numbers<[1], [0], [0], [1], [0, 0, 1, 1], [], []>} : vector<16x8xbf16>, vector<8x8xbf16>, vector<16x8xf32> -> vector<16x8xf32>
    %410 = vector.extract_strided_slice %300 {offsets = [80, 0], sizes = [16, 8], strides = [1, 1]} : vector<128x8xf32> to vector<16x8xf32>
    %411 = vector.extract_strided_slice %302 {offsets = [80, 0], sizes = [16, 8], strides = [1, 1]} : vector<128x8xf32> to vector<16x8xf32>
    %412 = vector.extract_strided_slice %304 {offsets = [80, 0], sizes = [16, 8], strides = [1, 1]} : vector<128x8xf32> to vector<16x8xf32>
    %413 = tpu.transpose %410, [1, 0] : vector<16x8xf32> -> vector<8x16xf32>
    %414 = arith.truncf %413 : vector<8x16xf32> to vector<8x16xbf16>
    %415 = arith.truncf %411 : vector<16x8xf32> to vector<16x8xbf16>
    %cst_120 = arith.constant dense<0.000000e+00> : vector<8x8xf32>
    %416 = tpu.matmul %414, %415, %cst_120 {dimension_numbers = #tpu.dot_dimension_numbers<[1], [0], [0], [1], [0, 0, 1, 1], [], []>} : vector<8x16xbf16>, vector<16x8xbf16>, vector<8x8xf32> -> vector<8x8xf32>
    %cst_121 = arith.constant dense<0xFF800000> : vector<8xf32>
    %417 = vector.multi_reduction <maximumf>, %416, %cst_121 [1] : vector<8x8xf32> to vector<8xf32>
    %418 = vector.shape_cast %417 : vector<8xf32> to vector<8x1xf32>
    %419 = vector.broadcast %418 : vector<8x1xf32> to vector<8x8xf32>
    %420 = arith.subf %416, %419 : vector<8x8xf32>
    %421 = math.exp %420 : vector<8x8xf32>
    %cst_122 = arith.constant dense<0.000000e+00> : vector<8xf32>
    %422 = vector.multi_reduction <add>, %421, %cst_122 [1] : vector<8x8xf32> to vector<8xf32>
    %423 = vector.shape_cast %422 : vector<8xf32> to vector<8x1xf32>
    %424 = tpu.reciprocal %423 {approx = true} : vector<8x1xf32> -> vector<8x1xf32>
    %425 = vector.broadcast %424 : vector<8x1xf32> to vector<8x8xf32>
    %426 = arith.mulf %421, %425 : vector<8x8xf32>
    %427 = arith.truncf %412 : vector<16x8xf32> to vector<16x8xbf16>
    %428 = tpu.transpose %426, [1, 0] : vector<8x8xf32> -> vector<8x8xf32>
    %429 = arith.truncf %428 : vector<8x8xf32> to vector<8x8xbf16>
    %cst_123 = arith.constant dense<0.000000e+00> : vector<16x8xf32>
    %430 = tpu.matmul %427, %429, %cst_123 {dimension_numbers = #tpu.dot_dimension_numbers<[1], [0], [0], [1], [0, 0, 1, 1], [], []>} : vector<16x8xbf16>, vector<8x8xbf16>, vector<16x8xf32> -> vector<16x8xf32>
    %431 = vector.extract_strided_slice %300 {offsets = [96, 0], sizes = [16, 8], strides = [1, 1]} : vector<128x8xf32> to vector<16x8xf32>
    %432 = vector.extract_strided_slice %302 {offsets = [96, 0], sizes = [16, 8], strides = [1, 1]} : vector<128x8xf32> to vector<16x8xf32>
    %433 = vector.extract_strided_slice %304 {offsets = [96, 0], sizes = [16, 8], strides = [1, 1]} : vector<128x8xf32> to vector<16x8xf32>
    %434 = tpu.transpose %431, [1, 0] : vector<16x8xf32> -> vector<8x16xf32>
    %435 = arith.truncf %434 : vector<8x16xf32> to vector<8x16xbf16>
    %436 = arith.truncf %432 : vector<16x8xf32> to vector<16x8xbf16>
    %cst_124 = arith.constant dense<0.000000e+00> : vector<8x8xf32>
    %437 = tpu.matmul %435, %436, %cst_124 {dimension_numbers = #tpu.dot_dimension_numbers<[1], [0], [0], [1], [0, 0, 1, 1], [], []>} : vector<8x16xbf16>, vector<16x8xbf16>, vector<8x8xf32> -> vector<8x8xf32>
    %cst_125 = arith.constant dense<0xFF800000> : vector<8xf32>
    %438 = vector.multi_reduction <maximumf>, %437, %cst_125 [1] : vector<8x8xf32> to vector<8xf32>
    %439 = vector.shape_cast %438 : vector<8xf32> to vector<8x1xf32>
    %440 = vector.broadcast %439 : vector<8x1xf32> to vector<8x8xf32>
    %441 = arith.subf %437, %440 : vector<8x8xf32>
    %442 = math.exp %441 : vector<8x8xf32>
    %cst_126 = arith.constant dense<0.000000e+00> : vector<8xf32>
    %443 = vector.multi_reduction <add>, %442, %cst_126 [1] : vector<8x8xf32> to vector<8xf32>
    %444 = vector.shape_cast %443 : vector<8xf32> to vector<8x1xf32>
    %445 = tpu.reciprocal %444 {approx = true} : vector<8x1xf32> -> vector<8x1xf32>
    %446 = vector.broadcast %445 : vector<8x1xf32> to vector<8x8xf32>
    %447 = arith.mulf %442, %446 : vector<8x8xf32>
    %448 = arith.truncf %433 : vector<16x8xf32> to vector<16x8xbf16>
    %449 = tpu.transpose %447, [1, 0] : vector<8x8xf32> -> vector<8x8xf32>
    %450 = arith.truncf %449 : vector<8x8xf32> to vector<8x8xbf16>
    %cst_127 = arith.constant dense<0.000000e+00> : vector<16x8xf32>
    %451 = tpu.matmul %448, %450, %cst_127 {dimension_numbers = #tpu.dot_dimension_numbers<[1], [0], [0], [1], [0, 0, 1, 1], [], []>} : vector<16x8xbf16>, vector<8x8xbf16>, vector<16x8xf32> -> vector<16x8xf32>
    %452 = vector.extract_strided_slice %300 {offsets = [112, 0], sizes = [16, 8], strides = [1, 1]} : vector<128x8xf32> to vector<16x8xf32>
    %453 = vector.extract_strided_slice %302 {offsets = [112, 0], sizes = [16, 8], strides = [1, 1]} : vector<128x8xf32> to vector<16x8xf32>
    %454 = vector.extract_strided_slice %304 {offsets = [112, 0], sizes = [16, 8], strides = [1, 1]} : vector<128x8xf32> to vector<16x8xf32>
    %455 = tpu.transpose %452, [1, 0] : vector<16x8xf32> -> vector<8x16xf32>
    %456 = arith.truncf %455 : vector<8x16xf32> to vector<8x16xbf16>
    %457 = arith.truncf %453 : vector<16x8xf32> to vector<16x8xbf16>
    %cst_128 = arith.constant dense<0.000000e+00> : vector<8x8xf32>
    %458 = tpu.matmul %456, %457, %cst_128 {dimension_numbers = #tpu.dot_dimension_numbers<[1], [0], [0], [1], [0, 0, 1, 1], [], []>} : vector<8x16xbf16>, vector<16x8xbf16>, vector<8x8xf32> -> vector<8x8xf32>
    %cst_129 = arith.constant dense<0xFF800000> : vector<8xf32>
    %459 = vector.multi_reduction <maximumf>, %458, %cst_129 [1] : vector<8x8xf32> to vector<8xf32>
    %460 = vector.shape_cast %459 : vector<8xf32> to vector<8x1xf32>
    %461 = vector.broadcast %460 : vector<8x1xf32> to vector<8x8xf32>
    %462 = arith.subf %458, %461 : vector<8x8xf32>
    %463 = math.exp %462 : vector<8x8xf32>
    %cst_130 = arith.constant dense<0.000000e+00> : vector<8xf32>
    %464 = vector.multi_reduction <add>, %463, %cst_130 [1] : vector<8x8xf32> to vector<8xf32>
    %465 = vector.shape_cast %464 : vector<8xf32> to vector<8x1xf32>
    %466 = tpu.reciprocal %465 {approx = true} : vector<8x1xf32> -> vector<8x1xf32>
    %467 = vector.broadcast %466 : vector<8x1xf32> to vector<8x8xf32>
    %468 = arith.mulf %463, %467 : vector<8x8xf32>
    %469 = arith.truncf %454 : vector<16x8xf32> to vector<16x8xbf16>
    %470 = tpu.transpose %468, [1, 0] : vector<8x8xf32> -> vector<8x8xf32>
    %471 = arith.truncf %470 : vector<8x8xf32> to vector<8x8xbf16>
    %cst_131 = arith.constant dense<0.000000e+00> : vector<16x8xf32>
    %472 = tpu.matmul %469, %471, %cst_131 {dimension_numbers = #tpu.dot_dimension_numbers<[1], [0], [0], [1], [0, 0, 1, 1], [], []>} : vector<16x8xbf16>, vector<8x8xbf16>, vector<16x8xf32> -> vector<16x8xf32>
    %473 = tpu.concatenate %325, %346, %367, %388, %409, %430, %451, %472 in 0 : vector<16x8xf32>, vector<16x8xf32>, vector<16x8xf32>, vector<16x8xf32>, vector<16x8xf32>, vector<16x8xf32>, vector<16x8xf32>, vector<16x8xf32> -> vector<128x8xf32>
    %474 = tpu.transpose %473, [1, 0] : vector<128x8xf32> -> vector<8x128xf32>
    %475 = arith.truncf %474 : vector<8x128xf32> to vector<8x128xbf16>
    %c1_132 = arith.constant 1 : index
    %c0_133 = arith.constant 0 : index
    %c0_134 = arith.constant 0 : index
    %476 = vector.load %arg5[%c1_132, %c0_133, %c0_134] : memref<3x128x128xbf16, #tpu.memory_space<vmem>>, vector<1x128x128xbf16>
    %477 = vector.shape_cast %476 : vector<1x128x128xbf16> to vector<128x128xbf16>
    %cst_135 = arith.constant dense<0.000000e+00> : vector<8x128xf32>
    %478 = tpu.matmul %475, %477, %cst_135 {dimension_numbers = #tpu.dot_dimension_numbers<[1], [0], [0], [1], [0, 0, 1, 1], [], []>} : vector<8x128xbf16>, vector<128x128xbf16>, vector<8x128xf32> -> vector<8x128xf32>
    %c1_136 = arith.constant 1 : index
    %c0_137 = arith.constant 0 : index
    %c0_138 = arith.constant 0 : index
    %479 = vector.load %arg6[%c1_136, %c0_137, %c0_138] : memref<3x1x128xf32, #tpu.memory_space<vmem>>, vector<1x1x128xf32>
    %480 = vector.shape_cast %479 : vector<1x1x128xf32> to vector<1x128xf32>
    %481 = vector.broadcast %480 : vector<1x128xf32> to vector<8x128xf32>
    %482 = arith.addf %478, %481 : vector<8x128xf32>
    %483 = arith.addf %482, %264 : vector<8x128xf32>
    %c1_139 = arith.constant 1 : index
    %c0_140 = arith.constant 0 : index
    %c0_141 = arith.constant 0 : index
    %484 = vector.load %arg7[%c1_139, %c0_140, %c0_141] : memref<3x1x128xf32, #tpu.memory_space<vmem>>, vector<1x1x128xf32>
    %485 = vector.shape_cast %484 : vector<1x1x128xf32> to vector<1x128xf32>
    %c1_142 = arith.constant 1 : index
    %c0_143 = arith.constant 0 : index
    %c0_144 = arith.constant 0 : index
    %486 = vector.load %arg8[%c1_142, %c0_143, %c0_144] : memref<3x1x128xf32, #tpu.memory_space<vmem>>, vector<1x1x128xf32>
    %487 = vector.shape_cast %486 : vector<1x1x128xf32> to vector<1x128xf32>
    %cst_145 = arith.constant dense<0.000000e+00> : vector<8xf32>
    %488 = vector.multi_reduction <add>, %483, %cst_145 [1] : vector<8x128xf32> to vector<8xf32>
    %489 = vector.shape_cast %488 : vector<8xf32> to vector<8x1xf32>
    %cst_146 = arith.constant 1.280000e+02 : f32
    %490 = vector.broadcast %cst_146 : f32 to vector<8x1xf32>
    %491 = arith.divf %489, %490 : vector<8x1xf32>
    %492 = vector.broadcast %491 : vector<8x1xf32> to vector<8x128xf32>
    %493 = arith.subf %483, %492 : vector<8x128xf32>
    %494 = arith.mulf %493, %493 : vector<8x128xf32>
    %cst_147 = arith.constant dense<0.000000e+00> : vector<8xf32>
    %495 = vector.multi_reduction <add>, %494, %cst_147 [1] : vector<8x128xf32> to vector<8xf32>
    %496 = vector.shape_cast %495 : vector<8xf32> to vector<8x1xf32>
    %cst_148 = arith.constant 1.280000e+02 : f32
    %497 = vector.broadcast %cst_148 : f32 to vector<8x1xf32>
    %498 = arith.divf %496, %497 : vector<8x1xf32>
    %499 = vector.broadcast %491 : vector<8x1xf32> to vector<8x128xf32>
    %500 = arith.subf %483, %499 : vector<8x128xf32>
    %cst_149 = arith.constant 9.99999974E-6 : f32
    %501 = vector.broadcast %cst_149 : f32 to vector<8x1xf32>
    %502 = arith.addf %498, %501 : vector<8x1xf32>
    %503 = math.rsqrt %502 : vector<8x1xf32>
    %504 = vector.broadcast %503 : vector<8x1xf32> to vector<8x128xf32>
    %505 = arith.mulf %500, %504 : vector<8x128xf32>
    %506 = vector.broadcast %485 : vector<1x128xf32> to vector<8x128xf32>
    %507 = arith.mulf %505, %506 : vector<8x128xf32>
    %508 = vector.broadcast %487 : vector<1x128xf32> to vector<8x128xf32>
    %509 = arith.addf %507, %508 : vector<8x128xf32>
    %510 = arith.truncf %509 : vector<8x128xf32> to vector<8x128xbf16>
    %c1_150 = arith.constant 1 : index
    %c0_151 = arith.constant 0 : index
    %c0_152 = arith.constant 0 : index
    %511 = vector.load %arg9[%c1_150, %c0_151, %c0_152] : memref<3x128x512xbf16, #tpu.memory_space<vmem>>, vector<1x128x512xbf16>
    %512 = vector.shape_cast %511 : vector<1x128x512xbf16> to vector<128x512xbf16>
    %cst_153 = arith.constant dense<0.000000e+00> : vector<8x512xf32>
    %513 = tpu.matmul %510, %512, %cst_153 {dimension_numbers = #tpu.dot_dimension_numbers<[1], [0], [0], [1], [0, 0, 1, 1], [], []>} : vector<8x128xbf16>, vector<128x512xbf16>, vector<8x512xf32> -> vector<8x512xf32>
    %c1_154 = arith.constant 1 : index
    %c0_155 = arith.constant 0 : index
    %c0_156 = arith.constant 0 : index
    %514 = vector.load %arg10[%c1_154, %c0_155, %c0_156] : memref<3x1x512xf32, #tpu.memory_space<vmem>>, vector<1x1x512xf32>
    %515 = vector.shape_cast %514 : vector<1x1x512xf32> to vector<1x512xf32>
    %516 = vector.broadcast %515 : vector<1x512xf32> to vector<8x512xf32>
    %517 = arith.addf %513, %516 : vector<8x512xf32>
    %cst_157 = arith.constant 0.000000e+00 : f32
    %518 = vector.broadcast %cst_157 : f32 to vector<8x512xf32>
    %519 = arith.maximumf %517, %518 : vector<8x512xf32>
    %520 = arith.truncf %519 : vector<8x512xf32> to vector<8x512xbf16>
    %c1_158 = arith.constant 1 : index
    %c0_159 = arith.constant 0 : index
    %c0_160 = arith.constant 0 : index
    %521 = vector.load %arg11[%c1_158, %c0_159, %c0_160] : memref<3x512x128xbf16, #tpu.memory_space<vmem>>, vector<1x512x128xbf16>
    %522 = vector.shape_cast %521 : vector<1x512x128xbf16> to vector<512x128xbf16>
    %cst_161 = arith.constant dense<0.000000e+00> : vector<8x128xf32>
    %523 = tpu.matmul %520, %522, %cst_161 {dimension_numbers = #tpu.dot_dimension_numbers<[1], [0], [0], [1], [0, 0, 1, 1], [], []>} : vector<8x512xbf16>, vector<512x128xbf16>, vector<8x128xf32> -> vector<8x128xf32>
    %c1_162 = arith.constant 1 : index
    %c0_163 = arith.constant 0 : index
    %c0_164 = arith.constant 0 : index
    %524 = vector.load %arg12[%c1_162, %c0_163, %c0_164] : memref<3x1x128xf32, #tpu.memory_space<vmem>>, vector<1x1x128xf32>
    %525 = vector.shape_cast %524 : vector<1x1x128xf32> to vector<1x128xf32>
    %526 = vector.broadcast %525 : vector<1x128xf32> to vector<8x128xf32>
    %527 = arith.addf %523, %526 : vector<8x128xf32>
    %528 = arith.addf %483, %527 : vector<8x128xf32>
    %c2 = arith.constant 2 : index
    %c0_165 = arith.constant 0 : index
    %c0_166 = arith.constant 0 : index
    %529 = vector.load %arg1[%c2, %c0_165, %c0_166] : memref<3x1x128xf32, #tpu.memory_space<vmem>>, vector<1x1x128xf32>
    %530 = vector.shape_cast %529 : vector<1x1x128xf32> to vector<1x128xf32>
    %c2_167 = arith.constant 2 : index
    %c0_168 = arith.constant 0 : index
    %c0_169 = arith.constant 0 : index
    %531 = vector.load %arg2[%c2_167, %c0_168, %c0_169] : memref<3x1x128xf32, #tpu.memory_space<vmem>>, vector<1x1x128xf32>
    %532 = vector.shape_cast %531 : vector<1x1x128xf32> to vector<1x128xf32>
    %cst_170 = arith.constant dense<0.000000e+00> : vector<8xf32>
    %533 = vector.multi_reduction <add>, %528, %cst_170 [1] : vector<8x128xf32> to vector<8xf32>
    %534 = vector.shape_cast %533 : vector<8xf32> to vector<8x1xf32>
    %cst_171 = arith.constant 1.280000e+02 : f32
    %535 = vector.broadcast %cst_171 : f32 to vector<8x1xf32>
    %536 = arith.divf %534, %535 : vector<8x1xf32>
    %537 = vector.broadcast %536 : vector<8x1xf32> to vector<8x128xf32>
    %538 = arith.subf %528, %537 : vector<8x128xf32>
    %539 = arith.mulf %538, %538 : vector<8x128xf32>
    %cst_172 = arith.constant dense<0.000000e+00> : vector<8xf32>
    %540 = vector.multi_reduction <add>, %539, %cst_172 [1] : vector<8x128xf32> to vector<8xf32>
    %541 = vector.shape_cast %540 : vector<8xf32> to vector<8x1xf32>
    %cst_173 = arith.constant 1.280000e+02 : f32
    %542 = vector.broadcast %cst_173 : f32 to vector<8x1xf32>
    %543 = arith.divf %541, %542 : vector<8x1xf32>
    %544 = vector.broadcast %536 : vector<8x1xf32> to vector<8x128xf32>
    %545 = arith.subf %528, %544 : vector<8x128xf32>
    %cst_174 = arith.constant 9.99999974E-6 : f32
    %546 = vector.broadcast %cst_174 : f32 to vector<8x1xf32>
    %547 = arith.addf %543, %546 : vector<8x1xf32>
    %548 = math.rsqrt %547 : vector<8x1xf32>
    %549 = vector.broadcast %548 : vector<8x1xf32> to vector<8x128xf32>
    %550 = arith.mulf %545, %549 : vector<8x128xf32>
    %551 = vector.broadcast %530 : vector<1x128xf32> to vector<8x128xf32>
    %552 = arith.mulf %550, %551 : vector<8x128xf32>
    %553 = vector.broadcast %532 : vector<1x128xf32> to vector<8x128xf32>
    %554 = arith.addf %552, %553 : vector<8x128xf32>
    %555 = arith.truncf %554 : vector<8x128xf32> to vector<8x128xbf16>
    %c2_175 = arith.constant 2 : index
    %c0_176 = arith.constant 0 : index
    %c0_177 = arith.constant 0 : index
    %556 = vector.load %arg3[%c2_175, %c0_176, %c0_177] : memref<3x128x384xbf16, #tpu.memory_space<vmem>>, vector<1x128x384xbf16>
    %557 = vector.shape_cast %556 : vector<1x128x384xbf16> to vector<128x384xbf16>
    %cst_178 = arith.constant dense<0.000000e+00> : vector<8x384xf32>
    %558 = tpu.matmul %555, %557, %cst_178 {dimension_numbers = #tpu.dot_dimension_numbers<[1], [0], [0], [1], [0, 0, 1, 1], [], []>} : vector<8x128xbf16>, vector<128x384xbf16>, vector<8x384xf32> -> vector<8x384xf32>
    %c2_179 = arith.constant 2 : index
    %c0_180 = arith.constant 0 : index
    %c0_181 = arith.constant 0 : index
    %559 = vector.load %arg4[%c2_179, %c0_180, %c0_181] : memref<3x1x384xf32, #tpu.memory_space<vmem>>, vector<1x1x384xf32>
    %560 = vector.shape_cast %559 : vector<1x1x384xf32> to vector<1x384xf32>
    %561 = vector.broadcast %560 : vector<1x384xf32> to vector<8x384xf32>
    %562 = arith.addf %558, %561 : vector<8x384xf32>
    %563 = vector.extract_strided_slice %562 {offsets = [0, 0], sizes = [8, 128], strides = [1, 1]} : vector<8x384xf32> to vector<8x128xf32>
    %564 = tpu.transpose %563, [1, 0] : vector<8x128xf32> -> vector<128x8xf32>
    %565 = vector.extract_strided_slice %562 {offsets = [0, 128], sizes = [8, 128], strides = [1, 1]} : vector<8x384xf32> to vector<8x128xf32>
    %566 = tpu.transpose %565, [1, 0] : vector<8x128xf32> -> vector<128x8xf32>
    %567 = vector.extract_strided_slice %562 {offsets = [0, 256], sizes = [8, 128], strides = [1, 1]} : vector<8x384xf32> to vector<8x128xf32>
    %568 = tpu.transpose %567, [1, 0] : vector<8x128xf32> -> vector<128x8xf32>
    %569 = vector.extract_strided_slice %564 {offsets = [0, 0], sizes = [16, 8], strides = [1, 1]} : vector<128x8xf32> to vector<16x8xf32>
    %570 = vector.extract_strided_slice %566 {offsets = [0, 0], sizes = [16, 8], strides = [1, 1]} : vector<128x8xf32> to vector<16x8xf32>
    %571 = vector.extract_strided_slice %568 {offsets = [0, 0], sizes = [16, 8], strides = [1, 1]} : vector<128x8xf32> to vector<16x8xf32>
    %572 = tpu.transpose %569, [1, 0] : vector<16x8xf32> -> vector<8x16xf32>
    %573 = arith.truncf %572 : vector<8x16xf32> to vector<8x16xbf16>
    %574 = arith.truncf %570 : vector<16x8xf32> to vector<16x8xbf16>
    %cst_182 = arith.constant dense<0.000000e+00> : vector<8x8xf32>
    %575 = tpu.matmul %573, %574, %cst_182 {dimension_numbers = #tpu.dot_dimension_numbers<[1], [0], [0], [1], [0, 0, 1, 1], [], []>} : vector<8x16xbf16>, vector<16x8xbf16>, vector<8x8xf32> -> vector<8x8xf32>
    %cst_183 = arith.constant dense<0xFF800000> : vector<8xf32>
    %576 = vector.multi_reduction <maximumf>, %575, %cst_183 [1] : vector<8x8xf32> to vector<8xf32>
    %577 = vector.shape_cast %576 : vector<8xf32> to vector<8x1xf32>
    %578 = vector.broadcast %577 : vector<8x1xf32> to vector<8x8xf32>
    %579 = arith.subf %575, %578 : vector<8x8xf32>
    %580 = math.exp %579 : vector<8x8xf32>
    %cst_184 = arith.constant dense<0.000000e+00> : vector<8xf32>
    %581 = vector.multi_reduction <add>, %580, %cst_184 [1] : vector<8x8xf32> to vector<8xf32>
    %582 = vector.shape_cast %581 : vector<8xf32> to vector<8x1xf32>
    %583 = tpu.reciprocal %582 {approx = true} : vector<8x1xf32> -> vector<8x1xf32>
    %584 = vector.broadcast %583 : vector<8x1xf32> to vector<8x8xf32>
    %585 = arith.mulf %580, %584 : vector<8x8xf32>
    %586 = arith.truncf %571 : vector<16x8xf32> to vector<16x8xbf16>
    %587 = tpu.transpose %585, [1, 0] : vector<8x8xf32> -> vector<8x8xf32>
    %588 = arith.truncf %587 : vector<8x8xf32> to vector<8x8xbf16>
    %cst_185 = arith.constant dense<0.000000e+00> : vector<16x8xf32>
    %589 = tpu.matmul %586, %588, %cst_185 {dimension_numbers = #tpu.dot_dimension_numbers<[1], [0], [0], [1], [0, 0, 1, 1], [], []>} : vector<16x8xbf16>, vector<8x8xbf16>, vector<16x8xf32> -> vector<16x8xf32>
    %590 = vector.extract_strided_slice %564 {offsets = [16, 0], sizes = [16, 8], strides = [1, 1]} : vector<128x8xf32> to vector<16x8xf32>
    %591 = vector.extract_strided_slice %566 {offsets = [16, 0], sizes = [16, 8], strides = [1, 1]} : vector<128x8xf32> to vector<16x8xf32>
    %592 = vector.extract_strided_slice %568 {offsets = [16, 0], sizes = [16, 8], strides = [1, 1]} : vector<128x8xf32> to vector<16x8xf32>
    %593 = tpu.transpose %590, [1, 0] : vector<16x8xf32> -> vector<8x16xf32>
    %594 = arith.truncf %593 : vector<8x16xf32> to vector<8x16xbf16>
    %595 = arith.truncf %591 : vector<16x8xf32> to vector<16x8xbf16>
    %cst_186 = arith.constant dense<0.000000e+00> : vector<8x8xf32>
    %596 = tpu.matmul %594, %595, %cst_186 {dimension_numbers = #tpu.dot_dimension_numbers<[1], [0], [0], [1], [0, 0, 1, 1], [], []>} : vector<8x16xbf16>, vector<16x8xbf16>, vector<8x8xf32> -> vector<8x8xf32>
    %cst_187 = arith.constant dense<0xFF800000> : vector<8xf32>
    %597 = vector.multi_reduction <maximumf>, %596, %cst_187 [1] : vector<8x8xf32> to vector<8xf32>
    %598 = vector.shape_cast %597 : vector<8xf32> to vector<8x1xf32>
    %599 = vector.broadcast %598 : vector<8x1xf32> to vector<8x8xf32>
    %600 = arith.subf %596, %599 : vector<8x8xf32>
    %601 = math.exp %600 : vector<8x8xf32>
    %cst_188 = arith.constant dense<0.000000e+00> : vector<8xf32>
    %602 = vector.multi_reduction <add>, %601, %cst_188 [1] : vector<8x8xf32> to vector<8xf32>
    %603 = vector.shape_cast %602 : vector<8xf32> to vector<8x1xf32>
    %604 = tpu.reciprocal %603 {approx = true} : vector<8x1xf32> -> vector<8x1xf32>
    %605 = vector.broadcast %604 : vector<8x1xf32> to vector<8x8xf32>
    %606 = arith.mulf %601, %605 : vector<8x8xf32>
    %607 = arith.truncf %592 : vector<16x8xf32> to vector<16x8xbf16>
    %608 = tpu.transpose %606, [1, 0] : vector<8x8xf32> -> vector<8x8xf32>
    %609 = arith.truncf %608 : vector<8x8xf32> to vector<8x8xbf16>
    %cst_189 = arith.constant dense<0.000000e+00> : vector<16x8xf32>
    %610 = tpu.matmul %607, %609, %cst_189 {dimension_numbers = #tpu.dot_dimension_numbers<[1], [0], [0], [1], [0, 0, 1, 1], [], []>} : vector<16x8xbf16>, vector<8x8xbf16>, vector<16x8xf32> -> vector<16x8xf32>
    %611 = vector.extract_strided_slice %564 {offsets = [32, 0], sizes = [16, 8], strides = [1, 1]} : vector<128x8xf32> to vector<16x8xf32>
    %612 = vector.extract_strided_slice %566 {offsets = [32, 0], sizes = [16, 8], strides = [1, 1]} : vector<128x8xf32> to vector<16x8xf32>
    %613 = vector.extract_strided_slice %568 {offsets = [32, 0], sizes = [16, 8], strides = [1, 1]} : vector<128x8xf32> to vector<16x8xf32>
    %614 = tpu.transpose %611, [1, 0] : vector<16x8xf32> -> vector<8x16xf32>
    %615 = arith.truncf %614 : vector<8x16xf32> to vector<8x16xbf16>
    %616 = arith.truncf %612 : vector<16x8xf32> to vector<16x8xbf16>
    %cst_190 = arith.constant dense<0.000000e+00> : vector<8x8xf32>
    %617 = tpu.matmul %615, %616, %cst_190 {dimension_numbers = #tpu.dot_dimension_numbers<[1], [0], [0], [1], [0, 0, 1, 1], [], []>} : vector<8x16xbf16>, vector<16x8xbf16>, vector<8x8xf32> -> vector<8x8xf32>
    %cst_191 = arith.constant dense<0xFF800000> : vector<8xf32>
    %618 = vector.multi_reduction <maximumf>, %617, %cst_191 [1] : vector<8x8xf32> to vector<8xf32>
    %619 = vector.shape_cast %618 : vector<8xf32> to vector<8x1xf32>
    %620 = vector.broadcast %619 : vector<8x1xf32> to vector<8x8xf32>
    %621 = arith.subf %617, %620 : vector<8x8xf32>
    %622 = math.exp %621 : vector<8x8xf32>
    %cst_192 = arith.constant dense<0.000000e+00> : vector<8xf32>
    %623 = vector.multi_reduction <add>, %622, %cst_192 [1] : vector<8x8xf32> to vector<8xf32>
    %624 = vector.shape_cast %623 : vector<8xf32> to vector<8x1xf32>
    %625 = tpu.reciprocal %624 {approx = true} : vector<8x1xf32> -> vector<8x1xf32>
    %626 = vector.broadcast %625 : vector<8x1xf32> to vector<8x8xf32>
    %627 = arith.mulf %622, %626 : vector<8x8xf32>
    %628 = arith.truncf %613 : vector<16x8xf32> to vector<16x8xbf16>
    %629 = tpu.transpose %627, [1, 0] : vector<8x8xf32> -> vector<8x8xf32>
    %630 = arith.truncf %629 : vector<8x8xf32> to vector<8x8xbf16>
    %cst_193 = arith.constant dense<0.000000e+00> : vector<16x8xf32>
    %631 = tpu.matmul %628, %630, %cst_193 {dimension_numbers = #tpu.dot_dimension_numbers<[1], [0], [0], [1], [0, 0, 1, 1], [], []>} : vector<16x8xbf16>, vector<8x8xbf16>, vector<16x8xf32> -> vector<16x8xf32>
    %632 = vector.extract_strided_slice %564 {offsets = [48, 0], sizes = [16, 8], strides = [1, 1]} : vector<128x8xf32> to vector<16x8xf32>
    %633 = vector.extract_strided_slice %566 {offsets = [48, 0], sizes = [16, 8], strides = [1, 1]} : vector<128x8xf32> to vector<16x8xf32>
    %634 = vector.extract_strided_slice %568 {offsets = [48, 0], sizes = [16, 8], strides = [1, 1]} : vector<128x8xf32> to vector<16x8xf32>
    %635 = tpu.transpose %632, [1, 0] : vector<16x8xf32> -> vector<8x16xf32>
    %636 = arith.truncf %635 : vector<8x16xf32> to vector<8x16xbf16>
    %637 = arith.truncf %633 : vector<16x8xf32> to vector<16x8xbf16>
    %cst_194 = arith.constant dense<0.000000e+00> : vector<8x8xf32>
    %638 = tpu.matmul %636, %637, %cst_194 {dimension_numbers = #tpu.dot_dimension_numbers<[1], [0], [0], [1], [0, 0, 1, 1], [], []>} : vector<8x16xbf16>, vector<16x8xbf16>, vector<8x8xf32> -> vector<8x8xf32>
    %cst_195 = arith.constant dense<0xFF800000> : vector<8xf32>
    %639 = vector.multi_reduction <maximumf>, %638, %cst_195 [1] : vector<8x8xf32> to vector<8xf32>
    %640 = vector.shape_cast %639 : vector<8xf32> to vector<8x1xf32>
    %641 = vector.broadcast %640 : vector<8x1xf32> to vector<8x8xf32>
    %642 = arith.subf %638, %641 : vector<8x8xf32>
    %643 = math.exp %642 : vector<8x8xf32>
    %cst_196 = arith.constant dense<0.000000e+00> : vector<8xf32>
    %644 = vector.multi_reduction <add>, %643, %cst_196 [1] : vector<8x8xf32> to vector<8xf32>
    %645 = vector.shape_cast %644 : vector<8xf32> to vector<8x1xf32>
    %646 = tpu.reciprocal %645 {approx = true} : vector<8x1xf32> -> vector<8x1xf32>
    %647 = vector.broadcast %646 : vector<8x1xf32> to vector<8x8xf32>
    %648 = arith.mulf %643, %647 : vector<8x8xf32>
    %649 = arith.truncf %634 : vector<16x8xf32> to vector<16x8xbf16>
    %650 = tpu.transpose %648, [1, 0] : vector<8x8xf32> -> vector<8x8xf32>
    %651 = arith.truncf %650 : vector<8x8xf32> to vector<8x8xbf16>
    %cst_197 = arith.constant dense<0.000000e+00> : vector<16x8xf32>
    %652 = tpu.matmul %649, %651, %cst_197 {dimension_numbers = #tpu.dot_dimension_numbers<[1], [0], [0], [1], [0, 0, 1, 1], [], []>} : vector<16x8xbf16>, vector<8x8xbf16>, vector<16x8xf32> -> vector<16x8xf32>
    %653 = vector.extract_strided_slice %564 {offsets = [64, 0], sizes = [16, 8], strides = [1, 1]} : vector<128x8xf32> to vector<16x8xf32>
    %654 = vector.extract_strided_slice %566 {offsets = [64, 0], sizes = [16, 8], strides = [1, 1]} : vector<128x8xf32> to vector<16x8xf32>
    %655 = vector.extract_strided_slice %568 {offsets = [64, 0], sizes = [16, 8], strides = [1, 1]} : vector<128x8xf32> to vector<16x8xf32>
    %656 = tpu.transpose %653, [1, 0] : vector<16x8xf32> -> vector<8x16xf32>
    %657 = arith.truncf %656 : vector<8x16xf32> to vector<8x16xbf16>
    %658 = arith.truncf %654 : vector<16x8xf32> to vector<16x8xbf16>
    %cst_198 = arith.constant dense<0.000000e+00> : vector<8x8xf32>
    %659 = tpu.matmul %657, %658, %cst_198 {dimension_numbers = #tpu.dot_dimension_numbers<[1], [0], [0], [1], [0, 0, 1, 1], [], []>} : vector<8x16xbf16>, vector<16x8xbf16>, vector<8x8xf32> -> vector<8x8xf32>
    %cst_199 = arith.constant dense<0xFF800000> : vector<8xf32>
    %660 = vector.multi_reduction <maximumf>, %659, %cst_199 [1] : vector<8x8xf32> to vector<8xf32>
    %661 = vector.shape_cast %660 : vector<8xf32> to vector<8x1xf32>
    %662 = vector.broadcast %661 : vector<8x1xf32> to vector<8x8xf32>
    %663 = arith.subf %659, %662 : vector<8x8xf32>
    %664 = math.exp %663 : vector<8x8xf32>
    %cst_200 = arith.constant dense<0.000000e+00> : vector<8xf32>
    %665 = vector.multi_reduction <add>, %664, %cst_200 [1] : vector<8x8xf32> to vector<8xf32>
    %666 = vector.shape_cast %665 : vector<8xf32> to vector<8x1xf32>
    %667 = tpu.reciprocal %666 {approx = true} : vector<8x1xf32> -> vector<8x1xf32>
    %668 = vector.broadcast %667 : vector<8x1xf32> to vector<8x8xf32>
    %669 = arith.mulf %664, %668 : vector<8x8xf32>
    %670 = arith.truncf %655 : vector<16x8xf32> to vector<16x8xbf16>
    %671 = tpu.transpose %669, [1, 0] : vector<8x8xf32> -> vector<8x8xf32>
    %672 = arith.truncf %671 : vector<8x8xf32> to vector<8x8xbf16>
    %cst_201 = arith.constant dense<0.000000e+00> : vector<16x8xf32>
    %673 = tpu.matmul %670, %672, %cst_201 {dimension_numbers = #tpu.dot_dimension_numbers<[1], [0], [0], [1], [0, 0, 1, 1], [], []>} : vector<16x8xbf16>, vector<8x8xbf16>, vector<16x8xf32> -> vector<16x8xf32>
    %674 = vector.extract_strided_slice %564 {offsets = [80, 0], sizes = [16, 8], strides = [1, 1]} : vector<128x8xf32> to vector<16x8xf32>
    %675 = vector.extract_strided_slice %566 {offsets = [80, 0], sizes = [16, 8], strides = [1, 1]} : vector<128x8xf32> to vector<16x8xf32>
    %676 = vector.extract_strided_slice %568 {offsets = [80, 0], sizes = [16, 8], strides = [1, 1]} : vector<128x8xf32> to vector<16x8xf32>
    %677 = tpu.transpose %674, [1, 0] : vector<16x8xf32> -> vector<8x16xf32>
    %678 = arith.truncf %677 : vector<8x16xf32> to vector<8x16xbf16>
    %679 = arith.truncf %675 : vector<16x8xf32> to vector<16x8xbf16>
    %cst_202 = arith.constant dense<0.000000e+00> : vector<8x8xf32>
    %680 = tpu.matmul %678, %679, %cst_202 {dimension_numbers = #tpu.dot_dimension_numbers<[1], [0], [0], [1], [0, 0, 1, 1], [], []>} : vector<8x16xbf16>, vector<16x8xbf16>, vector<8x8xf32> -> vector<8x8xf32>
    %cst_203 = arith.constant dense<0xFF800000> : vector<8xf32>
    %681 = vector.multi_reduction <maximumf>, %680, %cst_203 [1] : vector<8x8xf32> to vector<8xf32>
    %682 = vector.shape_cast %681 : vector<8xf32> to vector<8x1xf32>
    %683 = vector.broadcast %682 : vector<8x1xf32> to vector<8x8xf32>
    %684 = arith.subf %680, %683 : vector<8x8xf32>
    %685 = math.exp %684 : vector<8x8xf32>
    %cst_204 = arith.constant dense<0.000000e+00> : vector<8xf32>
    %686 = vector.multi_reduction <add>, %685, %cst_204 [1] : vector<8x8xf32> to vector<8xf32>
    %687 = vector.shape_cast %686 : vector<8xf32> to vector<8x1xf32>
    %688 = tpu.reciprocal %687 {approx = true} : vector<8x1xf32> -> vector<8x1xf32>
    %689 = vector.broadcast %688 : vector<8x1xf32> to vector<8x8xf32>
    %690 = arith.mulf %685, %689 : vector<8x8xf32>
    %691 = arith.truncf %676 : vector<16x8xf32> to vector<16x8xbf16>
    %692 = tpu.transpose %690, [1, 0] : vector<8x8xf32> -> vector<8x8xf32>
    %693 = arith.truncf %692 : vector<8x8xf32> to vector<8x8xbf16>
    %cst_205 = arith.constant dense<0.000000e+00> : vector<16x8xf32>
    %694 = tpu.matmul %691, %693, %cst_205 {dimension_numbers = #tpu.dot_dimension_numbers<[1], [0], [0], [1], [0, 0, 1, 1], [], []>} : vector<16x8xbf16>, vector<8x8xbf16>, vector<16x8xf32> -> vector<16x8xf32>
    %695 = vector.extract_strided_slice %564 {offsets = [96, 0], sizes = [16, 8], strides = [1, 1]} : vector<128x8xf32> to vector<16x8xf32>
    %696 = vector.extract_strided_slice %566 {offsets = [96, 0], sizes = [16, 8], strides = [1, 1]} : vector<128x8xf32> to vector<16x8xf32>
    %697 = vector.extract_strided_slice %568 {offsets = [96, 0], sizes = [16, 8], strides = [1, 1]} : vector<128x8xf32> to vector<16x8xf32>
    %698 = tpu.transpose %695, [1, 0] : vector<16x8xf32> -> vector<8x16xf32>
    %699 = arith.truncf %698 : vector<8x16xf32> to vector<8x16xbf16>
    %700 = arith.truncf %696 : vector<16x8xf32> to vector<16x8xbf16>
    %cst_206 = arith.constant dense<0.000000e+00> : vector<8x8xf32>
    %701 = tpu.matmul %699, %700, %cst_206 {dimension_numbers = #tpu.dot_dimension_numbers<[1], [0], [0], [1], [0, 0, 1, 1], [], []>} : vector<8x16xbf16>, vector<16x8xbf16>, vector<8x8xf32> -> vector<8x8xf32>
    %cst_207 = arith.constant dense<0xFF800000> : vector<8xf32>
    %702 = vector.multi_reduction <maximumf>, %701, %cst_207 [1] : vector<8x8xf32> to vector<8xf32>
    %703 = vector.shape_cast %702 : vector<8xf32> to vector<8x1xf32>
    %704 = vector.broadcast %703 : vector<8x1xf32> to vector<8x8xf32>
    %705 = arith.subf %701, %704 : vector<8x8xf32>
    %706 = math.exp %705 : vector<8x8xf32>
    %cst_208 = arith.constant dense<0.000000e+00> : vector<8xf32>
    %707 = vector.multi_reduction <add>, %706, %cst_208 [1] : vector<8x8xf32> to vector<8xf32>
    %708 = vector.shape_cast %707 : vector<8xf32> to vector<8x1xf32>
    %709 = tpu.reciprocal %708 {approx = true} : vector<8x1xf32> -> vector<8x1xf32>
    %710 = vector.broadcast %709 : vector<8x1xf32> to vector<8x8xf32>
    %711 = arith.mulf %706, %710 : vector<8x8xf32>
    %712 = arith.truncf %697 : vector<16x8xf32> to vector<16x8xbf16>
    %713 = tpu.transpose %711, [1, 0] : vector<8x8xf32> -> vector<8x8xf32>
    %714 = arith.truncf %713 : vector<8x8xf32> to vector<8x8xbf16>
    %cst_209 = arith.constant dense<0.000000e+00> : vector<16x8xf32>
    %715 = tpu.matmul %712, %714, %cst_209 {dimension_numbers = #tpu.dot_dimension_numbers<[1], [0], [0], [1], [0, 0, 1, 1], [], []>} : vector<16x8xbf16>, vector<8x8xbf16>, vector<16x8xf32> -> vector<16x8xf32>
    %716 = vector.extract_strided_slice %564 {offsets = [112, 0], sizes = [16, 8], strides = [1, 1]} : vector<128x8xf32> to vector<16x8xf32>
    %717 = vector.extract_strided_slice %566 {offsets = [112, 0], sizes = [16, 8], strides = [1, 1]} : vector<128x8xf32> to vector<16x8xf32>
    %718 = vector.extract_strided_slice %568 {offsets = [112, 0], sizes = [16, 8], strides = [1, 1]} : vector<128x8xf32> to vector<16x8xf32>
    %719 = tpu.transpose %716, [1, 0] : vector<16x8xf32> -> vector<8x16xf32>
    %720 = arith.truncf %719 : vector<8x16xf32> to vector<8x16xbf16>
    %721 = arith.truncf %717 : vector<16x8xf32> to vector<16x8xbf16>
    %cst_210 = arith.constant dense<0.000000e+00> : vector<8x8xf32>
    %722 = tpu.matmul %720, %721, %cst_210 {dimension_numbers = #tpu.dot_dimension_numbers<[1], [0], [0], [1], [0, 0, 1, 1], [], []>} : vector<8x16xbf16>, vector<16x8xbf16>, vector<8x8xf32> -> vector<8x8xf32>
    %cst_211 = arith.constant dense<0xFF800000> : vector<8xf32>
    %723 = vector.multi_reduction <maximumf>, %722, %cst_211 [1] : vector<8x8xf32> to vector<8xf32>
    %724 = vector.shape_cast %723 : vector<8xf32> to vector<8x1xf32>
    %725 = vector.broadcast %724 : vector<8x1xf32> to vector<8x8xf32>
    %726 = arith.subf %722, %725 : vector<8x8xf32>
    %727 = math.exp %726 : vector<8x8xf32>
    %cst_212 = arith.constant dense<0.000000e+00> : vector<8xf32>
    %728 = vector.multi_reduction <add>, %727, %cst_212 [1] : vector<8x8xf32> to vector<8xf32>
    %729 = vector.shape_cast %728 : vector<8xf32> to vector<8x1xf32>
    %730 = tpu.reciprocal %729 {approx = true} : vector<8x1xf32> -> vector<8x1xf32>
    %731 = vector.broadcast %730 : vector<8x1xf32> to vector<8x8xf32>
    %732 = arith.mulf %727, %731 : vector<8x8xf32>
    %733 = arith.truncf %718 : vector<16x8xf32> to vector<16x8xbf16>
    %734 = tpu.transpose %732, [1, 0] : vector<8x8xf32> -> vector<8x8xf32>
    %735 = arith.truncf %734 : vector<8x8xf32> to vector<8x8xbf16>
    %cst_213 = arith.constant dense<0.000000e+00> : vector<16x8xf32>
    %736 = tpu.matmul %733, %735, %cst_213 {dimension_numbers = #tpu.dot_dimension_numbers<[1], [0], [0], [1], [0, 0, 1, 1], [], []>} : vector<16x8xbf16>, vector<8x8xbf16>, vector<16x8xf32> -> vector<16x8xf32>
    %737 = tpu.concatenate %589, %610, %631, %652, %673, %694, %715, %736 in 0 : vector<16x8xf32>, vector<16x8xf32>, vector<16x8xf32>, vector<16x8xf32>, vector<16x8xf32>, vector<16x8xf32>, vector<16x8xf32>, vector<16x8xf32> -> vector<128x8xf32>
    %738 = tpu.transpose %737, [1, 0] : vector<128x8xf32> -> vector<8x128xf32>
    %739 = arith.truncf %738 : vector<8x128xf32> to vector<8x128xbf16>
    %c2_214 = arith.constant 2 : index
    %c0_215 = arith.constant 0 : index
    %c0_216 = arith.constant 0 : index
    %740 = vector.load %arg5[%c2_214, %c0_215, %c0_216] : memref<3x128x128xbf16, #tpu.memory_space<vmem>>, vector<1x128x128xbf16>
    %741 = vector.shape_cast %740 : vector<1x128x128xbf16> to vector<128x128xbf16>
    %cst_217 = arith.constant dense<0.000000e+00> : vector<8x128xf32>
    %742 = tpu.matmul %739, %741, %cst_217 {dimension_numbers = #tpu.dot_dimension_numbers<[1], [0], [0], [1], [0, 0, 1, 1], [], []>} : vector<8x128xbf16>, vector<128x128xbf16>, vector<8x128xf32> -> vector<8x128xf32>
    %c2_218 = arith.constant 2 : index
    %c0_219 = arith.constant 0 : index
    %c0_220 = arith.constant 0 : index
    %743 = vector.load %arg6[%c2_218, %c0_219, %c0_220] : memref<3x1x128xf32, #tpu.memory_space<vmem>>, vector<1x1x128xf32>
    %744 = vector.shape_cast %743 : vector<1x1x128xf32> to vector<1x128xf32>
    %745 = vector.broadcast %744 : vector<1x128xf32> to vector<8x128xf32>
    %746 = arith.addf %742, %745 : vector<8x128xf32>
    %747 = arith.addf %746, %528 : vector<8x128xf32>
    %c2_221 = arith.constant 2 : index
    %c0_222 = arith.constant 0 : index
    %c0_223 = arith.constant 0 : index
    %748 = vector.load %arg7[%c2_221, %c0_222, %c0_223] : memref<3x1x128xf32, #tpu.memory_space<vmem>>, vector<1x1x128xf32>
    %749 = vector.shape_cast %748 : vector<1x1x128xf32> to vector<1x128xf32>
    %c2_224 = arith.constant 2 : index
    %c0_225 = arith.constant 0 : index
    %c0_226 = arith.constant 0 : index
    %750 = vector.load %arg8[%c2_224, %c0_225, %c0_226] : memref<3x1x128xf32, #tpu.memory_space<vmem>>, vector<1x1x128xf32>
    %751 = vector.shape_cast %750 : vector<1x1x128xf32> to vector<1x128xf32>
    %cst_227 = arith.constant dense<0.000000e+00> : vector<8xf32>
    %752 = vector.multi_reduction <add>, %747, %cst_227 [1] : vector<8x128xf32> to vector<8xf32>
    %753 = vector.shape_cast %752 : vector<8xf32> to vector<8x1xf32>
    %cst_228 = arith.constant 1.280000e+02 : f32
    %754 = vector.broadcast %cst_228 : f32 to vector<8x1xf32>
    %755 = arith.divf %753, %754 : vector<8x1xf32>
    %756 = vector.broadcast %755 : vector<8x1xf32> to vector<8x128xf32>
    %757 = arith.subf %747, %756 : vector<8x128xf32>
    %758 = arith.mulf %757, %757 : vector<8x128xf32>
    %cst_229 = arith.constant dense<0.000000e+00> : vector<8xf32>
    %759 = vector.multi_reduction <add>, %758, %cst_229 [1] : vector<8x128xf32> to vector<8xf32>
    %760 = vector.shape_cast %759 : vector<8xf32> to vector<8x1xf32>
    %cst_230 = arith.constant 1.280000e+02 : f32
    %761 = vector.broadcast %cst_230 : f32 to vector<8x1xf32>
    %762 = arith.divf %760, %761 : vector<8x1xf32>
    %763 = vector.broadcast %755 : vector<8x1xf32> to vector<8x128xf32>
    %764 = arith.subf %747, %763 : vector<8x128xf32>
    %cst_231 = arith.constant 9.99999974E-6 : f32
    %765 = vector.broadcast %cst_231 : f32 to vector<8x1xf32>
    %766 = arith.addf %762, %765 : vector<8x1xf32>
    %767 = math.rsqrt %766 : vector<8x1xf32>
    %768 = vector.broadcast %767 : vector<8x1xf32> to vector<8x128xf32>
    %769 = arith.mulf %764, %768 : vector<8x128xf32>
    %770 = vector.broadcast %749 : vector<1x128xf32> to vector<8x128xf32>
    %771 = arith.mulf %769, %770 : vector<8x128xf32>
    %772 = vector.broadcast %751 : vector<1x128xf32> to vector<8x128xf32>
    %773 = arith.addf %771, %772 : vector<8x128xf32>
    %774 = arith.truncf %773 : vector<8x128xf32> to vector<8x128xbf16>
    %c2_232 = arith.constant 2 : index
    %c0_233 = arith.constant 0 : index
    %c0_234 = arith.constant 0 : index
    %775 = vector.load %arg9[%c2_232, %c0_233, %c0_234] : memref<3x128x512xbf16, #tpu.memory_space<vmem>>, vector<1x128x512xbf16>
    %776 = vector.shape_cast %775 : vector<1x128x512xbf16> to vector<128x512xbf16>
    %cst_235 = arith.constant dense<0.000000e+00> : vector<8x512xf32>
    %777 = tpu.matmul %774, %776, %cst_235 {dimension_numbers = #tpu.dot_dimension_numbers<[1], [0], [0], [1], [0, 0, 1, 1], [], []>} : vector<8x128xbf16>, vector<128x512xbf16>, vector<8x512xf32> -> vector<8x512xf32>
    %c2_236 = arith.constant 2 : index
    %c0_237 = arith.constant 0 : index
    %c0_238 = arith.constant 0 : index
    %778 = vector.load %arg10[%c2_236, %c0_237, %c0_238] : memref<3x1x512xf32, #tpu.memory_space<vmem>>, vector<1x1x512xf32>
    %779 = vector.shape_cast %778 : vector<1x1x512xf32> to vector<1x512xf32>
    %780 = vector.broadcast %779 : vector<1x512xf32> to vector<8x512xf32>
    %781 = arith.addf %777, %780 : vector<8x512xf32>
    %cst_239 = arith.constant 0.000000e+00 : f32
    %782 = vector.broadcast %cst_239 : f32 to vector<8x512xf32>
    %783 = arith.maximumf %781, %782 : vector<8x512xf32>
    %784 = arith.truncf %783 : vector<8x512xf32> to vector<8x512xbf16>
    %c2_240 = arith.constant 2 : index
    %c0_241 = arith.constant 0 : index
    %c0_242 = arith.constant 0 : index
    %785 = vector.load %arg11[%c2_240, %c0_241, %c0_242] : memref<3x512x128xbf16, #tpu.memory_space<vmem>>, vector<1x512x128xbf16>
    %786 = vector.shape_cast %785 : vector<1x512x128xbf16> to vector<512x128xbf16>
    %cst_243 = arith.constant dense<0.000000e+00> : vector<8x128xf32>
    %787 = tpu.matmul %784, %786, %cst_243 {dimension_numbers = #tpu.dot_dimension_numbers<[1], [0], [0], [1], [0, 0, 1, 1], [], []>} : vector<8x512xbf16>, vector<512x128xbf16>, vector<8x128xf32> -> vector<8x128xf32>
    %c2_244 = arith.constant 2 : index
    %c0_245 = arith.constant 0 : index
    %c0_246 = arith.constant 0 : index
    %788 = vector.load %arg12[%c2_244, %c0_245, %c0_246] : memref<3x1x128xf32, #tpu.memory_space<vmem>>, vector<1x1x128xf32>
    %789 = vector.shape_cast %788 : vector<1x1x128xf32> to vector<1x128xf32>
    %790 = vector.broadcast %789 : vector<1x128xf32> to vector<8x128xf32>
    %791 = arith.addf %787, %790 : vector<8x128xf32>
    %792 = arith.addf %747, %791 : vector<8x128xf32>
    %c0_247 = arith.constant 0 : index
    %c0_248 = arith.constant 0 : index
    %793 = vector.load %arg13[%c0_247, %c0_248] : memref<8x128xf32, #tpu.memory_space<vmem>>, vector<8x128xf32>
    tpu.vector_store %arg13[%c0_247, %c0_248], %792 {strides = array<i32>} : memref<8x128xf32, #tpu.memory_space<vmem>>, vector<8x128xf32>,
    return
  }
}

</mosaic_0001>

<bundles_post_ra>
// kernel: tpu_custom_call.1
= control target key start
LH: loop header
LB: loop body
LE: loop exit
PB: predicated region body
PF: predicated region fallthrough
CT: control target
= control target key end

     0   :  { %18 = vsyncpa [#allocation3], 0  ;;  %s9029_s0 = inlined_call_operand.hbm [shape: f32[8,128], index: 0, kind: input, shape index: {}]   ;;  %s9030_s1 = inlined_call_operand.hbm [shape: f32[3,1,128], index: 1, kind: input, shape index: {}]   ;;  %s9031_s2 = inlined_call_operand.hbm [shape: f32[3,1,128], index: 2, kind: input, shape index: {}]   ;;  %s9032_s3 = inlined_call_operand.hbm [shape: bf16[3,128,384], index: 3, kind: input, shape index: {}]   ;;  %s9033_s4 = inlined_call_operand.hbm [shape: f32[3,1,384], index: 4, kind: input, shape index: {}]   ;;  %s9034_s5 = inlined_call_operand.hbm [shape: bf16[3,128,128], index: 5, kind: input, shape index: {}]   ;;  %s9035_s6 = inlined_call_operand.vmem [shape: f32[3,1,128], index: 6, kind: input, shape index: {}]   ;;  %s9036_s7 = inlined_call_operand.vmem [shape: f32[3,1,128], index: 7, kind: input, shape index: {}]   ;;  %s9037_s8 = inlined_call_operand.hbm [shape: f32[3,1,128], index: 8, kind: input, shape index: {}]   ;;  %s9038_s9 = inlined_call_operand.hbm [shape: bf16[3,128,512], index: 9, kind: input, shape index: {}]   ;;  %s9039_s10 = inlined_call_operand.hbm [shape: f32[3,1,512], index: 10, kind: input, shape index: {}]   ;;  %s9040_s11 = inlined_call_operand.hbm [shape: bf16[3,512,128], index: 11, kind: input, shape index: {}]   ;;  %s9041_s12 = inlined_call_operand.vmem [shape: f32[3,1,128], index: 12, kind: input, shape index: {}]   ;;  %s9042_s13 = inlined_call_operand.hbm [shape: f32[8,128], index: 13, kind: output, shape index: {}]  }
   0x1   :  { %19 = vsyncpa [#allocation6], 0 }
   0x2   :  { %20 = vsyncpa [#allocation9], 0 }
   0x3   :  { %21 = vsyncpa [#allocation12], 0 }
   0x4   :  { %22 = vsyncpa [#allocation15], 0 }
   0x5   :  { %23 = vsyncpa [#allocation18], 0  ;;  %s40_s27 = sshll.u32 %s9030_s1, 4  ;;  %s41_s27 = int_to_ptr.hbm [resolvable:$true] %s40_s27 }
   0x6   :  { %24 = vsyncpa [#allocation4], 0  ;;  %s8411_s28 = smov [#allocation5]   ;;  %s66_s15 = sshll.u32 %s9032_s3, 4  ;;  %s67_s15 = int_to_ptr.hbm [resolvable:$true] %s66_s15 }
   0x7   :  { %s42_s29 = sshll.u32 %s8411_s28, 4  ;;  %s8412_s16 = smov 16   ;;  %s43_s29 = int_to_ptr.vmem [resolvable:$true] %s42_s29 }
   0x8   :  { %s8413_s17 = smov 1   ;;  %s8414_s18 = smov [#allocation8]  }
   0x9   :  { %48 = dma.hbm_to_vmem [thread:$0]  %s41_s27, 48, %s43_s29, [#allocation6], %s8412_s16, %s8412_s16, %s8413_s17  }
   0xa   :  { %s68_s19 = sshll.u32 %s8414_s18, 4  ;;  %s8415_s1 = smov 192   ;;  %s69_s19 = int_to_ptr.vmem [resolvable:$true] %s68_s19 }
   0xb   :  { %s8416_s20 = smov 12   ;;  %s92_s23 = sshll.u32 %s9034_s5, 4  ;;  %s93_s23 = int_to_ptr.hbm [resolvable:$true] %s92_s23 }
   0xc   :  { %74 = dma.hbm_to_vmem [thread:$0]  %s67_s15, 9216, %s69_s19, [#allocation9], %s8415_s1, %s8415_s1, %s8416_s20  }
   0xd   :  { %s8417_s24 = smov [#allocation11]   ;;  %s122_s28 = sshll.u32 %s9038_s9, 4  ;;  %s123_s28 = int_to_ptr.hbm [resolvable:$true] %s122_s28 }
   0xe   :  { %s94_s3 = sshll.u32 %s8417_s24, 4  ;;  %s8418_s27 = smov 64   ;;  %s95_s3 = int_to_ptr.vmem [resolvable:$true] %s94_s3 }
   0xf   :  { %s8419_s29 = smov 4   ;;  %s8420_s30 = smov [#allocation14]  }
  0x10   :  { %100 = dma.hbm_to_vmem [thread:$0]  %s93_s23, 3072, %s95_s3, [#allocation12], %s8418_s27, %s8418_s27, %s8419_s29  }
  0x11   :  { %s124_s14 = sshll.u32 %s8420_s30, 4  ;;  %s30_s18 = sshll.u32 %s9029_s0, 4  ;;  %s125_s14 = int_to_ptr.vmem [resolvable:$true] %s124_s14  ;;  %s31_s18 = int_to_ptr.hbm [resolvable:$true] %s30_s18 }
  0x12   :  { %s8421_s19 = smov 256   ;;  %s8422_s1 = smov [#allocation2]  }
  0x13   :  { %130 = dma.hbm_to_vmem [thread:$0]  %s123_s28, 12288, %s125_s14, [#allocation15], %s8421_s19, %s8421_s19, %s8412_s16  }
  0x14   :  { %s32_s9 = sshll.u32 %s8422_s1, 4  ;;  %s53_s22 = sshll.u32 %s9031_s2, 4  ;;  %s33_s9 = int_to_ptr.vmem [resolvable:$true] %s32_s9  ;;  %s54_s22 = int_to_ptr.hbm [resolvable:$true] %s53_s22 }
  0x15   :  { %35 = dma.hbm_to_vmem [thread:$0]  %s31_s18, 128, %s33_s9, [#allocation3]  }
  0x16   :  { %s79_s3 = sshll.u32 %s9033_s4, 4  ;;  %s8423_s25 = smov [#allocation7]   ;;  %s80_s3 = int_to_ptr.hbm [resolvable:$true] %s79_s3 }
  0x17   :  { %s55_s26 = sshll.u32 %s8423_s25, 4  ;;  %s8424_s0 = smov [#allocation10]   ;;  %s56_s26 = int_to_ptr.vmem [resolvable:$true] %s55_s26 }
  0x18   :  { %61 = dma.hbm_to_vmem [thread:$0]  %s54_s22, 48, %s56_s26, [#allocation6], %s8412_s16, %s8412_s16, %s8413_s17  }
  0x19   :  { %s81_s28 = sshll.u32 %s8424_s0, 4  ;;  %s8425_s30 = smov 48   ;;  %s82_s28 = int_to_ptr.vmem [resolvable:$true] %s81_s28 }
  0x1a   :  { %s8426_s2 = smov 3   ;;  %s109_s5 = sshll.u32 %s9037_s8, 4  ;;  %s110_s5 = int_to_ptr.hbm [resolvable:$true] %s109_s5 }
  0x1b   :  { %87 = dma.hbm_to_vmem [thread:$0]  %s80_s3, 144, %s82_s28, [#allocation9], %s8425_s30, %s8425_s30, %s8426_s2  }
  0x1c   :  { %s8427_s4 = smov [#allocation13]   ;;  %s135_s9 = sshll.u32 %s9039_s10, 4  ;;  %s136_s9 = int_to_ptr.hbm [resolvable:$true] %s135_s9 }
  0x1d   :  { %s111_s18 = sshll.u32 %s8427_s4, 4  ;;  %s8428_s20 = smov [#allocation16]   ;;  %s112_s18 = int_to_ptr.vmem [resolvable:$true] %s111_s18 }
  0x1e   :  { %117 = dma.hbm_to_vmem [thread:$0]  %s110_s5, 48, %s112_s18, [#allocation12], %s8412_s16, %s8412_s16, %s8413_s17  }
  0x1f   :  { %s137_s21 = sshll.u32 %s8428_s20, 4  ;;  %s148_s24 = sshll.u32 %s9040_s11, 4  ;;  %s138_s21 = int_to_ptr.vmem [resolvable:$true] %s137_s21  ;;  %s149_s24 = int_to_ptr.hbm [resolvable:$true] %s148_s24 }
  0x20   :  { %143 = dma.hbm_to_vmem [thread:$0]  %s136_s9, 192, %s138_s21, [#allocation15], %s8418_s27, %s8418_s27, %s8419_s29  }
  0x21   :  { %s8429_s8 = smov [#allocation17]  }
  0x22   :  { %s150_s3 = sshll.u32 %s8429_s8, 4  ;;  %s151_s3 = int_to_ptr.vmem [resolvable:$true] %s150_s3 }
  0x23   :  { %156 = dma.hbm_to_vmem [thread:$0]  %s149_s24, 12288, %s151_s3, [#allocation18], %s8418_s27, %s8418_s27, %s8419_s29  }
  0x24   :  { %8397 = dma.done.wait [#allocation3], 128  }
  0x25   :  { %8398 = vsyncadd [#allocation3], 4294967168 }
  0x26   :  { %8399 = dma.done.wait [#allocation6], 96  }
  0x27   :  { %8400 = vsyncadd [#allocation6], 4294967200 }
  0x28   :  { %8401 = dma.done.wait [#allocation9], 9360  }
  0x29   :  { %8402 = vsyncadd [#allocation9], 4294957936 }
  0x2a   :  { %8403 = dma.done.wait [#allocation12], 3120  }
  0x2b   :  { %8404 = vsyncadd [#allocation12], 4294964176 }
  0x2c   :  { %8405 = dma.done.wait [#allocation15], 12480  }
  0x2d   :  { %8406 = vsyncadd [#allocation15], 4294954816 }
  0x2e   :  { %8407 = dma.done.wait [#allocation18], 12288  }
  0x2f   :  { %8408 = vsyncadd [#allocation18], 4294955008  ;;  %v200_v0 = vld [vmem:[#allocation2] sm:$0xff]  ;;  %v8430_v1 = vmov 128.0   ;;  %v6269_v2 = vld [vmem:[#allocation8 + $0xa8] sm:$0xf] }
  0x30   :  { %203 = vadd.xlane.f32.xlu0 %v200_v0  ;;  %8022 = vrcp.f32 %v8430_v1  ;;  %v7411_v3 = vld [vmem:[#allocation8 + $0xb0] sm:$0xf0]  ;;  %v7410_v4 = vld [vmem:[#allocation8 + $0xac] sm:$0xf]  ;;  %v6271_v6 = vld [vmem:[#allocation8 + $0xb4] sm:$0xf0] }
  0x31   :  { %v6270_v5 = vor.u32 %v7411_v3, %v6269_v2  ;;  %v6277_v7 = vld [vmem:[#allocation8 + $0xb0] sm:$0xf]  ;;  %v7412_v8 = vld [vmem:[#allocation8 + $0xb8] sm:$0xf0]  ;;  %v6274_v9 = vor.u32 %v7410_v4, %v6271_v6  ;;  %v7407_v23 = vld [vmem:[#allocation8 + $0x94] sm:$0xf] }
  0x32   :  { %v6278_v10 = vor.u32 %v7412_v8, %v6277_v7  ;;  %v6257_v21 = vld [vmem:[#allocation8 + $0x90] sm:$0xf]  ;;  %v7408_v22 = vld [vmem:[#allocation8 + $0x98] sm:$0xf0]  ;;  %v6259_v25 = vld [vmem:[#allocation8 + $0x9c] sm:$0xf0] }
  0x33   :  { %407 = vmatpush.bf16.msra.mxu0 %v6270_v5  ;;  %420 = vmatpush.bf16.msra.mxu1 %v6274_v9  ;;  %v6258_v24 = vor.u32 %v7408_v22, %v6257_v21  ;;  %v6265_v26 = vld [vmem:[#allocation8 + $0x98] sm:$0xf]  ;;  %v7409_v27 = vld [vmem:[#allocation8 + $0xa0] sm:$0xf0]  ;;  %v6262_v28 = vor.u32 %v7407_v23, %v6259_v25  ;;  %v7404_v32 = vld [vmem:[#allocation8 + $0x7c] sm:$0xf] }
  0x34   :  { %433 = vmatpush.bf16.msra.mxu2 %v6278_v10  ;;  %v6266_v29 = vor.u32 %v7409_v27, %v6265_v26  ;;  %v6245_v30 = vld [vmem:[#allocation8 + $0x78] sm:$0xf]  ;;  %v7405_v31 = vld [vmem:[#allocation8 + $0x80] sm:$0xf0]  ;;  %v6247_v34 = vld [vmem:[#allocation8 + $0x84] sm:$0xf0] }
  0x35   :  { %v6246_v33 = vor.u32 %v7405_v31, %v6245_v30  ;;  %v6253_v35 = vld [vmem:[#allocation8 + $0x80] sm:$0xf]  ;;  %v7406_v36 = vld [vmem:[#allocation8 + $0x88] sm:$0xf0]  ;;  %v6250_v37 = vor.u32 %v7404_v32, %v6247_v34  ;;  %v7401_v41 = vld [vmem:[#allocation8 + $0x64] sm:$0xf] }
  0x36   :  { %v8023_v11 = vpop.eup %8022  ;;  %v6254_v38 = vor.u32 %v7406_v36, %v6253_v35  ;;  %v6233_v39 = vld [vmem:[#allocation8 + $0x60] sm:$0xf]  ;;  %v7402_v40 = vld [vmem:[#allocation8 + $0x68] sm:$0xf0]  ;;  %v6235_v43 = vld [vmem:[#allocation8 + $0x6c] sm:$0xf0] }
  0x37   :  { %v206_v12 = vmul.f32 128.0, %v8023_v11  ;;  %vm210_vm0 = vweird.f32 %v8023_v11  ;;  %408 = vmatpush.bf16.msra.mxu0 %v6258_v24  ;;  %421 = vmatpush.bf16.msra.mxu1 %v6262_v28  ;;  %v6234_v42 = vor.u32 %v7402_v40, %v6233_v39  ;;  %v6241_v44 = vld [vmem:[#allocation8 + $0x68] sm:$0xf]  ;;  %v7403_v45 = vld [vmem:[#allocation8 + $0x70] sm:$0xf0]  ;;  %v6238_v46 = vor.u32 %v7401_v41, %v6235_v43  ;;  %s8431_s18 = smov [#allocation19]  }
  0x38   :  { %434 = vmatpush.bf16.msra.mxu2 %v6266_v29  ;;  %v6242_v47 = vor.u32 %v7403_v45, %v6241_v44  ;;  %v6221_v48 = vld [vmem:[#allocation8 + $0x48] sm:$0xf]  ;;  %v7399_v49 = vld [vmem:[#allocation8 + $0x50] sm:$0xf0]  ;;  %v7398_v50 = vld [vmem:[#allocation8 + $0x4c] sm:$0xf] }
  0x39   :  { %v207_v13 = vsub.f32 1.0, %v206_v12  ;;  %v6222_v51 = vor.u32 %v7399_v49, %v6221_v48  ;;  %v6223_v52 = vld [vmem:[#allocation8 + $0x54] sm:$0xf0]  ;;  %v6229_v53 = vld [vmem:[#allocation8 + $0x50] sm:$0xf]  ;;  %vm576_vm4 = vcmask 130048  }
  0x3a   :  { %v7400_v54 = vld [vmem:[#allocation8 + $0x58] sm:$0xf0]  ;;  %v6226_v55 = vor.u32 %v7398_v50, %v6223_v52  ;;  %v6209_v57 = vld [vmem:[#allocation8 + $0x30] sm:$0xf]  ;;  %v7395_v59 = vld [vmem:[#allocation8 + $0x34] sm:$0xf] }
  0x3b   :  { %v208_v14 = vmul.f32 %v8023_v11, %v207_v13  ;;  %409 = vmatpush.bf16.msra.mxu0 %v6246_v33  ;;  %422 = vmatpush.bf16.msra.mxu1 %v6250_v37  ;;  %v6230_v56 = vor.u32 %v7400_v54, %v6229_v53  ;;  %v7396_v58 = vld [vmem:[#allocation8 + $0x38] sm:$0xf0]  ;;  %v6211_v61 = vld [vmem:[#allocation8 + $0x3c] sm:$0xf0]  ;;  %v6217_v62 = vld [vmem:[#allocation8 + $0x38] sm:$0xf] }
  0x3c   :  { %435 = vmatpush.bf16.msra.mxu2 %v6254_v38  ;;  %v6210_v60 = vor.u32 %v7396_v58, %v6209_v57  ;;  %v7397_v63 = vld [vmem:[#allocation8 + $0x40] sm:$0xf0]  ;;  %v6197_v2 = vld [vmem:[#allocation8 + $0x18] sm:$0xf]  ;;  %v7392_v4 = vld [vmem:[#allocation8 + $0x1c] sm:$0xf] }
  0x3d   :  { %v209_v15 = vadd.f32 %v8023_v11, %v208_v14  ;;  %v6218_v1 = vor.u32 %v7397_v63, %v6217_v62  ;;  %v7393_v3 = vld [vmem:[#allocation8 + $0x20] sm:$0xf0]  ;;  %v6199_v6 = vld [vmem:[#allocation8 + $0x24] sm:$0xf0]  ;;  %v6205_v7 = vld [vmem:[#allocation8 + $0x20] sm:$0xf] }
  0x3e   :  { %v6198_v5 = vor.u32 %v7393_v3, %v6197_v2  ;;  %v7394_v8 = vld [vmem:[#allocation8 + $0x28] sm:$0xf0]  ;;  %v6202_v9 = vor.u32 %v7392_v4, %v6199_v6  ;;  %v7389_v13 = vld [vmem:[#allocation8 + $0x4] sm:$0xf]  ;;  %v8004_v31 = vld [vmem:[#allocation5] ss:$0 sm:$0xff] }
  0x3f   :  { %v8551_v16 = vsel %vm210_vm0, %v8023_v11, %v209_v15  ;;  %410 = vmatpush.bf16.msra.mxu0 %v6234_v42  ;;  %423 = vmatpush.bf16.msra.mxu1 %v6238_v46  ;;  %v6206_v10 = vor.u32 %v7394_v8, %v6205_v7  ;;  %v6185_v11 = vld [vmem:[#allocation8] sm:$0xf]  ;;  %v7390_v12 = vld [vmem:[#allocation8 + $0x8] sm:$0xf0]  ;;  %v6187_v15 = vld [vmem:[#allocation8 + $0xc] sm:$0xf0] }
  0x40   :  { %436 = vmatpush.bf16.msra.mxu2 %v6242_v47  ;;  %v6186_v14 = vor.u32 %v7390_v12, %v6185_v11  ;;  %v8005_v34 = vld [vmem:[#allocation7] ss:$0 sm:$0xff]  ;;  %v8560_v38 = vld [vmem:[#allocation10] sm:$0x7]  ;;  %vm593_vm5 = vcmask 64512   ;;  %vm642_vm6 = vcmask 1043456  }
  0x41   :  { %v273_v39 = vperm.slane %v8560_v38, 0  ;;  %v274_v40 = vperm.slane %v8560_v38, 1  ;;  %s6166_s19 = sshll.u32 %s8431_s18, 4  ;;  %s6168_s20 = sshll.u32 %s9042_s13, 4  ;;  %s6167_s19 = int_to_ptr.vmem [resolvable:$true] %s6166_s19  ;;  %s6169_s20 = int_to_ptr.hbm [resolvable:$true] %s6168_s20 }
  0x43   :  { %411 = vmatpush.bf16.msra.mxu0 %v6222_v51  ;;  %424 = vmatpush.bf16.msra.mxu1 %v6226_v55 }
  0x44   :  { %437 = vmatpush.bf16.msra.mxu2 %v6230_v56 }
  0x47   :  { %412 = vmatpush.bf16.msra.mxu0 %v6210_v60 }
  0x48   :  { %438 = vmatpush.bf16.msra.mxu2 %v6218_v1 }
  0x4b   :  { %413 = vmatpush.bf16.msra.mxu0 %v6198_v5 }
  0x4c   :  { %439 = vmatpush.bf16.msra.mxu2 %v6206_v10 }
  0x4f   :  { %414 = vmatpush.bf16.msra.mxu0 %v6186_v14 }
  0xa3   :  { %v204_v17 = vpop.xlane.xlu0 %203 }
  0xa4   :  { %v212_v18 = vmul.f32 %v8551_v16, %v204_v17  ;;  %v6193_v17 = vld [vmem:[#allocation8 + $0x8] sm:$0xf] }
  0xa6   :  { %v8554_v19 = vsub.f32 %v200_v0, %v212_v18  ;;  %v6214_v0 = vor.u32 %v7395_v59, %v6211_v61  ;;  %v7391_v18 = vld [vmem:[#allocation8 + $0x10] sm:$0xf0] }
  0xa7   :  { %v6194_v21 = vor.u32 %v7391_v18, %v6193_v17 }
  0xa8   :  { %v214_v20 = vmul.f32 %v8554_v19, %v8554_v19  ;;  %425 = vmatpush.bf16.msra.mxu1 %v6214_v0 }
  0xa9   :  { %440 = vmatpush.bf16.msra.mxu2 %v6194_v21 }
  0xaa   :  { %215 = vadd.xlane.f32.xlu0 %v214_v20  ;;  %v6190_v20 = vor.u32 %v7389_v13, %v6187_v15 }
  0xac   :  { %426 = vmatpush.bf16.msra.mxu1 %v6202_v9 }
  0xb0   :  { %427 = vmatpush.bf16.msra.mxu1 %v6190_v20 }
 0x11d   :  { %v216_v22 = vpop.xlane.xlu0 %215 }
 0x11e   :  { %v217_v23 = vmul.f32 %v216_v22, %v8551_v16 }
 0x120   :  { %v218_v24 = vadd.f32 1e-05, %v217_v23 }
 0x122   :  { %8024 = vrsqrt.f32 %v218_v24  ;;  %vm225_vm2 = vweird.f32 %v218_v24 }
 0x128   :  { %v8025_v25 = vpop.eup %8024 }
 0x129   :  { %v220_v26 = vmul.f32 %v8025_v25, %v218_v24  ;;  %vm226_vm1 = vweird.f32 %v8025_v25 }
 0x12a   :  { %vm227_vm3 = vmor %vm225_vm2, %vm226_vm1 }
 0x12b   :  { %v221_v27 = vmul.f32 %v8025_v25, %v220_v26 }
 0x12d   :  { %v222_v28 = vmul.f32 0.5, %v221_v27 }
 0x12f   :  { %v223_v29 = vsub.f32 1.5, %v222_v28 }
 0x131   :  { %v224_v30 = vmul.f32 %v8025_v25, %v223_v29 }
 0x133   :  { %v228_v32 = vsel %vm227_vm3, %v8025_v25, %v224_v30 }
 0x134   :  { %v229_v33 = vmul.f32 %v228_v32, %v8554_v19 }
 0x136   :  { %v233_v35 = vmul.f32 %v8004_v31, %v229_v33  ;;  %v275_v33 = vperm.slane %v8560_v38, 2 }
 0x138   :  { %v237_v36 = vadd.f32 %v8005_v34, %v233_v35 }
 0x13a   :  { %v238_v37 = vpack.c.bf16 %v237_v36, %v237_v36 }
 0x13c   :  { %415 = vmatmul.bf16.vlgmr.msra.gmra.mxu0 %v238_v37  ;;  %428 = vmatmul.bf16.vlgmr.msra.gmra.mxu1 %v238_v37 }
 0x13d   :  { %441 = vmatmul.bf16.vlgmr.msra.gmra.mxu2 %v238_v37 }
 0x1b9   :  { %v416_v41 = vpop.f32.mrf.mxu0  ;;  %v429_v42 = vpop.f32.mrf.mxu1 }
 0x1ba   :  { %v417_v43 = vadd.f32 %v416_v41, %v273_v39  ;;  %v430_v44 = vadd.f32 %v429_v42, %v274_v40 }
 0x1bc   :  { %v7699_v45 = vpack.i.bf16 %v430_v44, %v417_v43 }
 0x1be   :  { %7700 = vxpose.xlu1.b32.start.end [1/1] (short) %v7699_v45, 128 }
 0x1c0   :  { %v8564_v19 = vpop.f32.mrf.mxu2 }
 0x1c1   :  { %v418_v46 = vpop.f32.mrf.mxu0  ;;  %v431_v47 = vpop.f32.mrf.mxu1  ;;  %v443_v34 = vadd.f32 %v8564_v19, %v275_v33 }
 0x1c8   :  { %v444_v48 = vpop.f32.mrf.mxu2 }
 0x262   :  { %v7701_v49 = vpop.trf.xlu1 }
 0x263   :  { %v7702_v50 = vunpack.i.l.bf16 %v7701_v49  ;;  %v7705_v52 = vunpack.i.h.bf16 %v7701_v49 }
 0x265   :  { %542 = vxpose.xlu1.b32.start [1/2] (short) (narrow) %v7702_v50, 8 }
 0x26a   :  { %v7706_v51 = vpop.trf.xlu1 }
 0x26b   :  { %v7707_v53 = vunpack.i.l.bf16 %v7706_v51  ;;  %v7710_v54 = vunpack.i.h.bf16 %v7706_v51 }
 0x26d   :  { %543 = vxpose.xlu1.b32.end [2/2] (short) (narrow) %v7707_v53, 8  ;;  %v575_v55 = vpack.c.bf16 %v7710_v54, %v7705_v52 }
 0x26f   :  { %587 = vmatpush.bf16.msra.mxu3 %v575_v55 }
 0x272   :  { %v8566_v56 = vpop.trf.xlu1 }
 0x273   :  { %v7712_v58 = vunpack.i.l.bf16 %v8566_v56 }
 0x27a   :  { %v8568_v57 = vpop.trf.xlu1 }
 0x27b   :  { %v7717_v62 = vunpack.i.l.bf16 %v8568_v57 }
 0x282   :  { %v7721_v59 = vpop.trf.xlu1 }
 0x283   :  { %v7722_v60 = vunpack.i.l.bf16 %v7721_v59  ;;  %v7725_v63 = vunpack.i.h.bf16 %v7721_v59 }
 0x285   :  { %v7781_v61 = vpack.i.bf16 %v7722_v60, %v7712_v58 }
 0x287   :  { %7782 = vxpose.xlu0.b32.start [1/2] (short) (narrow) %v7781_v61, 8 }
 0x28a   :  { %v7726_v0 = vpop.trf.xlu1 }
 0x28b   :  { %v7727_v1 = vunpack.i.l.bf16 %v7726_v0  ;;  %v7730_v2 = vunpack.i.h.bf16 %v7726_v0 }
 0x28d   :  { %v7783_v3 = vpack.i.bf16 %v7727_v1, %v7717_v62  ;;  %v808_v4 = vpack.c.bf16 %v7730_v2, %v7725_v63 }
 0x28f   :  { %7784 = vxpose.xlu0.b32.end [2/2] (short) (narrow) %v7783_v3, 8  ;;  %819 = vmatpush.bf16.msrb.mxu2 %v808_v4  ;;  %v7715_v3 = vunpack.i.h.bf16 %v8566_v56  ;;  %v7720_v4 = vunpack.i.h.bf16 %v8568_v57 }
 0x292   :  { %v8572_v5 = vpop.trf.xlu1 }
 0x293   :  { %v7732_v19 = vunpack.i.l.bf16 %v8572_v5 }
 0x29a   :  { %v8574_v6 = vpop.trf.xlu1 }
 0x29b   :  { %v7737_v47 = vunpack.i.l.bf16 %v8574_v6 }
 0x2a2   :  { %v7741_v7 = vpop.trf.xlu1 }
 0x2a3   :  { %v7745_v8 = vunpack.i.h.bf16 %v7741_v7  ;;  %v7742_v39 = vunpack.i.l.bf16 %v7741_v7 }
 0x2aa   :  { %v7746_v9 = vpop.trf.xlu1 }
 0x2ab   :  { %v7750_v10 = vunpack.i.h.bf16 %v7746_v9  ;;  %v7747_v43 = vunpack.i.l.bf16 %v7746_v9 }
 0x2ad   :  { %v1038_v11 = vpack.c.bf16 %v7750_v10, %v7745_v8  ;;  %v7735_v10 = vunpack.i.h.bf16 %v8572_v5 }
 0x2af   :  { %1049 = vmatpush.bf16.msrb.mxu1 %v1038_v11  ;;  %v7740_v11 = vunpack.i.h.bf16 %v8574_v6 }
 0x2b2   :  { %v8576_v12 = vpop.trf.xlu1 }
 0x2b3   :  { %v7752_v38 = vunpack.i.l.bf16 %v8576_v12 }
 0x2ba   :  { %v8578_v13 = vpop.trf.xlu1 }
 0x2bb   :  { %v7757_v44 = vunpack.i.l.bf16 %v8578_v13 }
 0x2c2   :  { %v7761_v14 = vpop.trf.xlu1 }
 0x2c3   :  { %v7765_v15 = vunpack.i.h.bf16 %v7761_v14  ;;  %v7762_v45 = vunpack.i.l.bf16 %v7761_v14 }
 0x2ca   :  { %v7766_v17 = vpop.trf.xlu1 }
 0x2cb   :  { %v7770_v18 = vunpack.i.h.bf16 %v7766_v17  ;;  %v7767_v46 = vunpack.i.l.bf16 %v7766_v17 }
 0x2cd   :  { %v1268_v20 = vpack.c.bf16 %v7770_v18, %v7765_v15  ;;  %v693_v15 = vpack.c.bf16 %v7720_v4, %v7715_v3  ;;  %v923_v18 = vpack.c.bf16 %v7740_v11, %v7735_v10 }
 0x2cf   :  { %1279 = vmatpush.bf16.msra.mxu1 %v1268_v20 }
 0x2d2   :  { %v8580_v21 = vpop.trf.xlu1 }
 0x2d3   :  { %v7772_v48 = vunpack.i.l.bf16 %v8580_v21 }
 0x2da   :  { %v8582_v22 = vpop.trf.xlu1 }
 0x2db   :  { %v7777_v49 = vunpack.i.l.bf16 %v8582_v22  ;;  %v7780_v33 = vunpack.i.h.bf16 %v8582_v22 }
 0x309   :  { %v558_v23 = vpop.trf.xlu1 }
 0x30a   :  { %v574_v24 = vpack.c.bf16 %v558_v23, %v558_v23 }
 0x30c   :  { %6279 = vmatmul.msk.bf16.vlgmr.msra.gmra.mxu3 %vm576_vm4, %v574_v24  ;;  %v7755_v24 = vunpack.i.h.bf16 %v8576_v12 }
 0x32b   :  { %v8589_v40 = vpop.trf.xlu0 }
 0x32c   :  { %v7789_v41 = vunpack.i.h.bf16 %v8589_v40  ;;  %v7786_v5 = vunpack.i.l.bf16 %v8589_v40 }
 0x32e   :  { %v807_v42 = vpack.c.bf16 %v7789_v41, %v7789_v41 }
 0x330   :  { %6283 = vmatmul.msk.bf16.vlgmr.msrb.gmra.mxu2 %vm576_vm4, %v807_v42 }
 0x38f   :  { %v589_v25 = vpop.f32.mrf.mxu3 }
 0x390   :  { %v594_v26 = vsel %vm593_vm5, %v589_v25, -inf }
 0x391   :  { %595 = vmax.xlane.f32.xlu2 %v594_v26  ;;  %v692_v26 = vpack.c.bf16 %v7786_v5, %v7786_v5 }
 0x397   :  { %v591_v27 = vpop.f32.mrf.mxu3 }
 0x3b3   :  { %v821_v62 = vpop.f32.mrf.mxu2 }
 0x3b4   :  { %v825_v63 = vsel %vm593_vm5, %v821_v62, -inf }
 0x3b5   :  { %826 = vmax.xlane.f32.xlu1 %v825_v63 }
 0x3bb   :  { %v823_v1 = vpop.f32.mrf.mxu2 }
 0x404   :  { %v596_v28 = vpop.xlane.xlu2 %595 }
 0x405   :  { %v597_v29 = vsub.f32 %v589_v25, %v596_v28  ;;  %v7760_v25 = vunpack.i.h.bf16 %v8578_v13 }
 0x407   :  { %v598_v30 = vmul.f32 1.442695, %v597_v29  ;;  %v1153_v27 = vpack.c.bf16 %v7760_v25, %v7755_v24 }
 0x409   :  { %8026 = vpow2.f32 %v598_v30 }
 0x40f   :  { %v8027_v31 = vpop.eup %8026 }
 0x410   :  { %v600_v32 = vsel %vm593_vm5, %v8027_v31, 0.0 }
 0x411   :  { %601 = vadd.xlane.f32.xlu2 %v600_v32  ;;  %v7775_v32 = vunpack.i.h.bf16 %v8580_v21 }
 0x413   :  { %v1383_v12 = vpack.c.bf16 %v7780_v33, %v7775_v32 }
 0x43a   :  { %510 = vxpose.xlu2.b32.start.end [1/1] (short) %v443_v34, 128 }
 0x484   :  { %v602_v35 = vpop.xlane.xlu2 %601 }
 0x485   :  { %8028 = vrcp.f32 %v602_v35 }
 0x48b   :  { %v8029_v36 = vpop.eup %8028 }
 0x48c   :  { %v604_v37 = vmul.f32 %v8029_v36, %v8027_v31 }
 0x48e   :  { %606 = vxpose.xlu0.b32.start.end [1/1] (short) (narrow) %v604_v37, 8 }
 0x496   :  { %1005 = vxpose.xlu0.b32.start [1/2] (short) (narrow) %v7742_v39, 8  ;;  %v827_v39 = vpop.xlane.xlu1 %826 }
 0x497   :  { %v828_v21 = vsub.f32 %v821_v62, %v827_v39 }
 0x499   :  { %v829_v41 = vmul.f32 1.442695, %v828_v21 }
 0x49b   :  { %8030 = vpow2.f32 %v829_v41 }
 0x49e   :  { %1006 = vxpose.xlu0.b32.end [2/2] (short) (narrow) %v7747_v43, 8 }
 0x4a6   :  { %1120 = vxpose.xlu0.b32.start [1/2] (short) (narrow) %v7752_v38, 8  ;;  %v8652_v38 = vpop.eup %8030 }
 0x4ae   :  { %1121 = vxpose.xlu0.b32.end [2/2] (short) (narrow) %v7757_v44, 8 }
 0x4b6   :  { %1235 = vxpose.xlu0.b32.start [1/2] (short) (narrow) %v7762_v45, 8  ;;  %v831_v45 = vsel %vm593_vm5, %v8652_v38, 0.0 }
 0x4ba   :  { %890 = vxpose.xlu2.b32.start [1/2] (short) (narrow) %v7732_v19, 8 }
 0x4be   :  { %1236 = vxpose.xlu0.b32.end [2/2] (short) (narrow) %v7767_v46, 8 }
 0x4c2   :  { %891 = vxpose.xlu2.b32.end [2/2] (short) (narrow) %v7737_v47, 8 }
 0x4c6   :  { %1350 = vxpose.xlu0.b32.start [1/2] (short) (narrow) %v7772_v48, 8 }
 0x4ce   :  { %1351 = vxpose.xlu0.b32.end [2/2] (short) (narrow) %v7777_v49, 8 }
 0x4d3   :  { %v526_v50 = vpop.trf.xlu2 }
 0x4db   :  { %v527_v51 = vpop.trf.xlu2 }
 0x4dc   :  { %v605_v17 = vpack.c.bf16 %v527_v51, %v526_v50 }
 0x4e3   :  { %v8599_v52 = vpop.trf.xlu2 }
 0x4eb   :  { %v8601_v53 = vpop.trf.xlu2 }
 0x4f3   :  { %v8603_v54 = vpop.trf.xlu2 }
 0x4fb   :  { %v8605_v55 = vpop.trf.xlu2 }
 0x503   :  { %v8607_v58 = vpop.trf.xlu2 }
 0x50b   :  { %v8609_v59 = vpop.trf.xlu2 }
 0x513   :  { %v8611_v60 = vpop.trf.xlu2 }
 0x51b   :  { %v8613_v61 = vpop.trf.xlu2 }
 0x523   :  { %v8616_v0 = vpop.trf.xlu2 }
 0x52b   :  { %v8618_v2 = vpop.trf.xlu2 }
 0x532   :  { %v622_v7 = vpop.trf.xlu0 }
 0x533   :  { %v638_v8 = vpack.c.bf16 %v622_v7, %v622_v7  ;;  %v8622_v9 = vpop.trf.xlu2 }
 0x535   :  { %v644_v14 = vsel %vm642_vm6, %v638_v8, 0 }
 0x536   :  { %653 = vmatpush.bf16.msrb.mxu3 %v644_v14 }
 0x539   :  { %6280 = vmatmul.msk.bf16.vlgmr.msrb.gmra.mxu3 %vm593_vm5, %v605_v17 }
 0x53a   :  { %704 = vmatpush.bf16.msra.mxu3 %v693_v15  ;;  %v1021_v56 = vpop.trf.xlu0 }
 0x53b   :  { %v1037_v57 = vpack.c.bf16 %v1021_v56, %v1021_v56  ;;  %v8628_v20 = vpop.trf.xlu2 }
 0x53c   :  { %v1296_v23 = vpack.c.bf16 %v8628_v20, %v8622_v9 }
 0x53d   :  { %6287 = vmatmul.msk.bf16.vlgmr.msrb.gmra.mxu1 %vm576_vm4, %v1037_v57 }
 0x53e   :  { %934 = vmatpush.bf16.msrb.mxu3 %v923_v18 }
 0x543   :  { %v8634_v6 = vpop.trf.xlu2 }
 0x549   :  { %6281 = vmatmul.msk.bf16.vlgmr.msra.gmra.mxu3 %vm576_vm4, %v692_v26 }
 0x54a   :  { %1164 = vmatpush.bf16.msra.mxu3 %v1153_v27  ;;  %v1136_v30 = vpop.trf.xlu0 }
 0x54b   :  { %v8639_v28 = vpop.trf.xlu2  ;;  %v1152_v36 = vpack.c.bf16 %v1136_v30, %v1136_v30 }
 0x54c   :  { %v1411_v29 = vpack.c.bf16 %v8639_v28, %v8634_v6  ;;  %v7419_v6 = vld [vmem:[#allocation11 + $0x30] sm:$0xff] }
 0x553   :  { %v906_v31 = vpop.trf.xlu2 }
 0x554   :  { %v922_v34 = vpack.c.bf16 %v906_v31, %v906_v31 }
 0x559   :  { %6285 = vmatmul.msk.bf16.vlgmr.msrb.gmra.mxu3 %vm576_vm4, %v922_v34 }
 0x55a   :  { %1394 = vmatpush.bf16.msrb.mxu3 %v1383_v12  ;;  %v1251_v13 = vpop.trf.xlu0 }
 0x55b   :  { %v1267_v35 = vpack.c.bf16 %v1251_v13, %v1251_v13 }
 0x55d   :  { %6291 = vmatmul.msk.bf16.vlgmr.msra.gmra.mxu1 %vm576_vm4, %v1267_v35 }
 0x569   :  { %6289 = vmatmul.msk.bf16.vlgmr.msra.gmra.mxu3 %vm576_vm4, %v1152_v36 }
 0x56a   :  { %v1366_v37 = vpop.trf.xlu0 }
 0x56b   :  { %v1382_v40 = vpack.c.bf16 %v1366_v37, %v1366_v37 }
 0x579   :  { %6293 = vmatmul.msk.bf16.vlgmr.msrb.gmra.mxu3 %vm576_vm4, %v1382_v40 }
 0x5ba   :  { %v1051_v22 = vpop.f32.mrf.mxu1 }
 0x5bb   :  { %v1055_v42 = vsel %vm593_vm5, %v1051_v22, -inf }
 0x5bc   :  { %1056 = vmax.xlane.f32.xlu1 %v1055_v42  ;;  %v8650_v43 = vpop.f32.mrf.mxu3 }
 0x5c2   :  { %v1053_v44 = vpop.f32.mrf.mxu1 }
 0x5c4   :  { %v8656_v19 = vpop.f32.mrf.mxu3  ;;  %832 = vadd.xlane.f32.xlu1 %v831_v45 }
 0x5cc   :  { %v706_v46 = vpop.f32.mrf.mxu3 }
 0x5cd   :  { %v710_v47 = vsel %vm593_vm5, %v706_v46, -inf }
 0x5ce   :  { %711 = vmax.xlane.f32.xlu0 %v710_v47 }
 0x5d4   :  { %v708_v48 = vpop.f32.mrf.mxu3 }
 0x5da   :  { %v1281_v49 = vpop.f32.mrf.mxu1 }
 0x5db   :  { %v1285_v50 = vsel %vm593_vm5, %v1281_v49, -inf }
 0x5dc   :  { %1286 = vmax.xlane.f32.xlu0 %v1285_v50  ;;  %v936_v51 = vpop.f32.mrf.mxu3 }
 0x5dd   :  { %v940_v62 = vsel %vm593_vm5, %v936_v51, -inf }
 0x5de   :  { %941 = vmax.xlane.f32.xlu2 %v940_v62 }
 0x5e2   :  { %v1283_v63 = vpop.f32.mrf.mxu1 }
 0x5e4   :  { %v938_v1 = vpop.f32.mrf.mxu3 }
 0x5ec   :  { %v1166_v3 = vpop.f32.mrf.mxu3 }
 0x5ed   :  { %v1170_v57 = vsel %vm593_vm5, %v1166_v3, -inf }
 0x5f4   :  { %v1168_v4 = vpop.f32.mrf.mxu3 }
 0x5fc   :  { %v1396_v11 = vpop.f32.mrf.mxu3 }
 0x5fd   :  { %v1400_v36 = vsel %vm593_vm5, %v1396_v11, -inf }
 0x604   :  { %v1398_v17 = vpop.f32.mrf.mxu3 }
 0x62f   :  { %v1057_v7 = vpop.xlane.xlu1 %1056 }
 0x630   :  { %v1058_v8 = vsub.f32 %v1051_v22, %v1057_v7 }
 0x632   :  { %v1059_v10 = vmul.f32 1.442695, %v1058_v8 }
 0x634   :  { %8032 = vpow2.f32 %v1059_v10 }
 0x637   :  { %v833_v37 = vpop.xlane.xlu1 %832 }
 0x63a   :  { %v8661_v14 = vpop.eup %8032 }
 0x63b   :  { %v1061_v15 = vsel %vm593_vm5, %v8661_v14, 0.0 }
 0x63c   :  { %1062 = vadd.xlane.f32.xlu1 %v1061_v15 }
 0x641   :  { %v712_v18 = vpop.xlane.xlu0 %711 }
 0x642   :  { %v713_v56 = vsub.f32 %v706_v46, %v712_v18 }
 0x644   :  { %v714_v5 = vmul.f32 1.442695, %v713_v56  ;;  %1171 = vmax.xlane.f32.xlu1 %v1170_v57 }
 0x646   :  { %8034 = vpow2.f32 %v714_v5 }
 0x64c   :  { %v8035_v24 = vpop.eup %8034 }
 0x64d   :  { %v716_v25 = vsel %vm593_vm5, %v8035_v24, 0.0 }
 0x64e   :  { %717 = vadd.xlane.f32.xlu0 %v716_v25 }
 0x64f   :  { %v1287_v26 = vpop.xlane.xlu0 %1286 }
 0x650   :  { %v1288_v27 = vsub.f32 %v1281_v49, %v1287_v26 }
 0x651   :  { %v942_v30 = vpop.xlane.xlu2 %941 }
 0x652   :  { %v1289_v31 = vmul.f32 1.442695, %v1288_v27  ;;  %v943_v32 = vsub.f32 %v936_v51, %v942_v30  ;;  %v951_v30 = vpack.c.bf16 %v8609_v59, %v8607_v58  ;;  %v1066_v59 = vpack.c.bf16 %v8613_v61, %v8611_v60 }
 0x654   :  { %8036 = vpow2.f32 %v1289_v31  ;;  %v944_v33 = vmul.f32 1.442695, %v943_v32 }
 0x656   :  { %8038 = vpow2.f32 %v944_v33 }
 0x65a   :  { %v8037_v34 = vpop.eup %8036 }
 0x65b   :  { %v1291_v12 = vsel %vm593_vm5, %v8037_v34, 0.0 }
 0x65c   :  { %v8039_v13 = vpop.eup %8038  ;;  %1292 = vadd.xlane.f32.xlu1 %v1291_v12 }
 0x65d   :  { %v946_v35 = vsel %vm593_vm5, %v8039_v13, 0.0 }
 0x65e   :  { %947 = vadd.xlane.f32.xlu0 %v946_v35 }
 0x664   :  { %1401 = vmax.xlane.f32.xlu1 %v1400_v36 }
 0x6af   :  { %v1063_v39 = vpop.xlane.xlu1 %1062 }
 0x6b7   :  { %v1172_v40 = vpop.xlane.xlu1 %1171 }
 0x6b8   :  { %v1173_v21 = vsub.f32 %v1166_v3, %v1172_v40 }
 0x6ba   :  { %v1174_v41 = vmul.f32 1.442695, %v1173_v21 }
 0x6bc   :  { %8040 = vpow2.f32 %v1174_v41 }
 0x6c1   :  { %v718_v22 = vpop.xlane.xlu0 %717 }
 0x6c2   :  { %v8041_v42 = vpop.eup %8040  ;;  %8042 = vrcp.f32 %v718_v22 }
 0x6c3   :  { %v1176_v44 = vsel %vm593_vm5, %v8041_v42, 0.0 }
 0x6c4   :  { %1177 = vadd.xlane.f32.xlu0 %v1176_v44  ;;  %v7420_v44 = vld [vmem:[#allocation11 + $0x38] sm:$0xff] }
 0x6c5   :  { %1566 = vmatpush.bf16.msrb.mxu1 %v7420_v44 }
 0x6c8   :  { %v8043_v45 = vpop.eup %8042 }
 0x6c9   :  { %v720_v46 = vmul.f32 %v8043_v45, %v8035_v24  ;;  %1567 = vmatpush.bf16.msrb.mxu1 %v7419_v6  ;;  %v7417_v45 = vld [vmem:[#allocation11 + $0x20] sm:$0xff]  ;;  %v6395_v6 = vld [vmem:[#allocation14 + $0x90] sm:$0xf0] }
 0x6cb   :  { %722 = vxpose.xlu1.b32.start.end [1/1] (short) (narrow) %v720_v46, 8  ;;  %v7416_v46 = vld [vmem:[#allocation11 + $0x18] sm:$0xff] }
 0x6cf   :  { %v1293_v47 = vpop.xlane.xlu1 %1292 }
 0x6d0   :  { %8044 = vrcp.f32 %v1293_v47 }
 0x6d1   :  { %v948_v48 = vpop.xlane.xlu0 %947 }
 0x6d2   :  { %8046 = vrcp.f32 %v948_v48  ;;  %v7415_v48 = vld [vmem:[#allocation11 + $0x10] sm:$0xff] }
 0x6d6   :  { %v8045_v49 = vpop.eup %8044 }
 0x6d7   :  { %v1402_v50 = vpop.xlane.xlu1 %1401  ;;  %v1295_v51 = vmul.f32 %v8045_v49, %v8037_v34 }
 0x6d8   :  { %v8047_v62 = vpop.eup %8046  ;;  %v1403_v63 = vsub.f32 %v1396_v11, %v1402_v50  ;;  %v7414_v50 = vld [vmem:[#allocation11 + $0x8] sm:$0xff] }
 0x6d9   :  { %1297 = vxpose.xlu1.b32.start.end [1/1] (short) (narrow) %v1295_v51, 8  ;;  %v950_v1 = vmul.f32 %v8047_v62, %v8039_v13  ;;  %v7413_v51 = vld [vmem:[#allocation11] sm:$0xff] }
 0x6da   :  { %v1404_v3 = vmul.f32 1.442695, %v1403_v63 }
 0x6db   :  { %952 = vxpose.xlu2.b32.start.end [1/1] (short) (narrow) %v950_v1, 8 }
 0x6dc   :  { %8048 = vpow2.f32 %v1404_v3  ;;  %v8006_v3 = vld [vmem:[%s9035_s6] ss:$0 sm:$0xff] }
 0x6dd   :  { %8050 = vrcp.f32 %v833_v37  ;;  %v1181_v37 = vpack.c.bf16 %v8618_v2, %v8616_v0 }
 0x6de   :  { %8052 = vrcp.f32 %v1063_v39 }
 0x6e2   :  { %v8049_v4 = vpop.eup %8048 }
 0x6e3   :  { %1465 = vxpose.xlu2.b32.start [1/16] (narrow) %v8650_v43, 8  ;;  %v1406_v7 = vsel %vm593_vm5, %v8049_v4, 0.0  ;;  %v8051_v8 = vpop.eup %8050 }
 0x6e4   :  { %1407 = vadd.xlane.f32.xlu0 %v1406_v7  ;;  %v835_v10 = vmul.f32 %v8051_v8, %v8652_v38  ;;  %v8053_v11 = vpop.eup %8052  ;;  %v721_v38 = vpack.c.bf16 %v8601_v53, %v8599_v52  ;;  %v836_v52 = vpack.c.bf16 %v8605_v55, %v8603_v54  ;;  %v8132_v8 = vld [vmem:[#allocation2] sm:$0xff] }
 0x6e5   :  { %v1065_v15 = vmul.f32 %v8053_v11, %v8661_v14 }
 0x6eb   :  { %1466 = vxpose.xlu2.b32.cont [2/16] (narrow) %v8656_v19, 8 }
 0x70d   :  { %837 = vxpose.xlu0.b32.start.end [1/1] (short) (narrow) %v835_v10, 8 }
 0x715   :  { %1067 = vxpose.xlu0.b32.start.end [1/1] (short) (narrow) %v1065_v15, 8  ;;  %v6441_v15 = vld [vmem:[#allocation14 + $0xe0] sm:$0xf] }
 0x737   :  { %v1178_v17 = vpop.xlane.xlu0 %1177 }
 0x738   :  { %8054 = vrcp.f32 %v1178_v17  ;;  %v7451_v17 = vld [vmem:[#allocation14 + $0xec] sm:$0xf0] }
 0x73e   :  { %v8055_v18 = vpop.eup %8054 }
 0x73f   :  { %v1180_v56 = vmul.f32 %v8055_v18, %v8041_v42  ;;  %v7449_v18 = vld [vmem:[#allocation14 + $0xe4] sm:$0xf] }
 0x741   :  { %1182 = vxpose.xlu0.b32.start.end [1/1] (short) (narrow) %v1180_v56, 8  ;;  %v6442_v56 = vor.u32 %v7451_v17, %v6441_v15  ;;  %v6387_v15 = vld [vmem:[#allocation14 + $0x78] sm:$0xf0] }
 0x757   :  { %v1408_v43 = vpop.xlane.xlu0 %1407 }
 0x758   :  { %8056 = vrcp.f32 %v1408_v43  ;;  %v6443_v43 = vld [vmem:[#allocation14 + $0xf0] sm:$0xf0] }
 0x75e   :  { %v8057_v57 = vpop.eup %8056 }
 0x75f   :  { %v1410_v5 = vmul.f32 %v8057_v57, %v8049_v4  ;;  %v6449_v57 = vld [vmem:[#allocation14 + $0xe8] sm:$0xf] }
 0x761   :  { %1412 = vxpose.xlu0.b32.start.end [1/1] (short) (narrow) %v1410_v5, 8  ;;  %v7452_v5 = vld [vmem:[#allocation14 + $0xf4] sm:$0xf0] }
 0x76f   :  { %v738_v19 = vpop.trf.xlu1 }
 0x770   :  { %v754_v24 = vpack.c.bf16 %v738_v19, %v738_v19  ;;  %v6446_v19 = vor.u32 %v7449_v18, %v6443_v43  ;;  %v6361_v18 = vld [vmem:[#allocation14 + $0x40] sm:$0xf]  ;;  %v7429_v43 = vld [vmem:[#allocation14 + $0x44] sm:$0xf] }
 0x772   :  { %v759_v25 = vsel %vm642_vm6, %v754_v24, 0  ;;  %v6450_v24 = vor.u32 %v7452_v5, %v6449_v57  ;;  %1826 = vmatpush.bf16.msra.mxu3 %v6446_v19  ;;  %v6363_v5 = vld [vmem:[#allocation14 + $0x50] sm:$0xf0]  ;;  %v6369_v19 = vld [vmem:[#allocation14 + $0x48] sm:$0xf] }
 0x773   :  { %768 = vmatpush.bf16.msrb.mxu0 %v759_v25  ;;  %v7450_v25 = vld [vmem:[#allocation14 + $0xec] sm:$0xf] }
 0x774   :  { %v968_v14 = vpop.trf.xlu2 }
 0x775   :  { %v984_v26 = vpack.c.bf16 %v968_v14, %v968_v14 }
 0x776   :  { %6282 = vmatmul.msk.bf16.vlgmr.msrb.gmra.mxu0 %vm593_vm5, %v721_v38  ;;  %v6451_v38 = vld [vmem:[#allocation14 + $0xf8] sm:$0xf0] }
 0x777   :  { %v989_v27 = vsel %vm642_vm6, %v984_v26, 0  ;;  %v6454_v14 = vor.u32 %v7450_v25, %v6451_v38  ;;  %v6366_v25 = vor.u32 %v7429_v43, %v6363_v5  ;;  %v7479_v5 = vld [vmem:[#allocation17 + $0xd0] sm:$0xff] }
 0x778   :  { %998 = vmatpush.bf16.msra.mxu0 %v989_v27 }
 0x77d   :  { %v1313_v34 = vpop.trf.xlu1 }
 0x77e   :  { %v1329_v53 = vpack.c.bf16 %v1313_v34, %v1313_v34  ;;  %v7445_v34 = vld [vmem:[#allocation14 + $0xc4] sm:$0xf] }
 0x780   :  { %v1334_v35 = vsel %vm642_vm6, %v1329_v53, 0  ;;  %v6427_v53 = vld [vmem:[#allocation14 + $0xd0] sm:$0xf0] }
 0x786   :  { %6286 = vmatmul.msk.bf16.vlgmr.msra.gmra.mxu0 %vm593_vm5, %v951_v30 }
 0x7b1   :  { %v853_v31 = vpop.trf.xlu0 }
 0x7b2   :  { %v869_v32 = vpack.c.bf16 %v853_v31, %v853_v31 }
 0x7b4   :  { %v874_v33 = vsel %vm642_vm6, %v869_v32, 0  ;;  %v6425_v32 = vld [vmem:[#allocation14 + $0xc0] sm:$0xf] }
 0x7b5   :  { %883 = vmatpush.bf16.msra.mxu2 %v874_v33  ;;  %v7447_v33 = vld [vmem:[#allocation14 + $0xcc] sm:$0xf0] }
 0x7b8   :  { %6284 = vmatmul.msk.bf16.vlgmr.msra.gmra.mxu2 %vm593_vm5, %v836_v52  ;;  %v6426_v52 = vor.u32 %v7447_v33, %v6425_v32  ;;  %v7427_v32 = vld [vmem:[#allocation14 + $0x2c] sm:$0xf0]  ;;  %v7425_v33 = vld [vmem:[#allocation14 + $0x24] sm:$0xf] }
 0x7b9   :  { %v1083_v12 = vpop.trf.xlu0 }
 0x7ba   :  { %v1099_v13 = vpack.c.bf16 %v1083_v12, %v1083_v12  ;;  %v6433_v12 = vld [vmem:[#allocation14 + $0xc8] sm:$0xf] }
 0x7bc   :  { %v1104_v58 = vsel %vm642_vm6, %v1099_v13, 0  ;;  %v7448_v13 = vld [vmem:[#allocation14 + $0xd4] sm:$0xf0] }
 0x7bd   :  { %1113 = vmatpush.bf16.msrb.mxu2 %v1104_v58  ;;  %v6434_v58 = vor.u32 %v7448_v13, %v6433_v12  ;;  %v7428_v12 = vld [vmem:[#allocation14 + $0x34] sm:$0xf0] }
 0x7c1   :  { %1343 = vmatpush.bf16.msra.mxu2 %v1334_v35  ;;  %v6430_v35 = vor.u32 %v7445_v34, %v6427_v53  ;;  %v6353_v53 = vld [vmem:[#allocation14 + $0x28] sm:$0xf] }
 0x7c3   :  { %1827 = vmatpush.bf16.msra.mxu3 %v6430_v35  ;;  %v6354_v35 = vor.u32 %v7428_v12, %v6353_v53  ;;  %v7469_v53 = vld [vmem:[#allocation17 + $0x80] sm:$0xff] }
 0x7c4   :  { %v7477_v12 = vld [vmem:[#allocation17 + $0xc0] sm:$0xff] }
 0x7c8   :  { %6288 = vmatmul.msk.bf16.vlgmr.msrb.gmra.mxu2 %vm593_vm5, %v1066_v59  ;;  %v7446_v59 = vld [vmem:[#allocation14 + $0xcc] sm:$0xf] }
 0x7c9   :  { %1813 = vmatpush.bf16.msrb.mxu2 %v6442_v56  ;;  %v7431_v56 = vld [vmem:[#allocation14 + $0x4c] sm:$0xf0] }
 0x7ca   :  { %v6362_v57 = vor.u32 %v7431_v56, %v6361_v18  ;;  %v7464_v18 = vld [vmem:[#allocation17 + $0x58] sm:$0xff] }
 0x7cd   :  { %1814 = vmatpush.bf16.msrb.mxu2 %v6426_v52  ;;  %v6347_v52 = vld [vmem:[#allocation14 + $0x30] sm:$0xf0] }
 0x7ce   :  { %v6350_v13 = vor.u32 %v7425_v33, %v6347_v52  ;;  %v7478_v33 = vld [vmem:[#allocation17 + $0xc8] sm:$0xff]  ;;  %v7463_v52 = vld [vmem:[#allocation17 + $0x50] sm:$0xff] }
 0x7d8   :  { %6292 = vmatmul.msk.bf16.vlgmr.msra.gmra.mxu2 %vm593_vm5, %v1296_v23 }
 0x7e5   :  { %v1198_v54 = vpop.trf.xlu0 }
 0x7e6   :  { %v1214_v55 = vpack.c.bf16 %v1198_v54, %v1198_v54  ;;  %v6435_v54 = vld [vmem:[#allocation14 + $0xd8] sm:$0xf0] }
 0x7e8   :  { %v1219_v36 = vsel %vm642_vm6, %v1214_v55, 0  ;;  %v6438_v55 = vor.u32 %v7446_v59, %v6435_v54  ;;  %v6355_v59 = vld [vmem:[#allocation14 + $0x38] sm:$0xf0]  ;;  %v6329_v54 = vld [vmem:[#allocation14] sm:$0xf] }
 0x7e9   :  { %1228 = vmatpush.bf16.msrb.mxu0 %v1219_v36  ;;  %v6409_v36 = vld [vmem:[#allocation14 + $0xa0] sm:$0xf] }
 0x7ec   :  { %6290 = vmatmul.msk.bf16.vlgmr.msrb.gmra.mxu0 %vm593_vm5, %v1181_v37  ;;  %v7443_v37 = vld [vmem:[#allocation14 + $0xac] sm:$0xf0] }
 0x7f3   :  { %v770_v39 = vpop.f32.mrf.mxu0 }
 0x7f4   :  { %1467 = vxpose.xlu2.b32.cont [3/16] (narrow) %v770_v39, 8  ;;  %v7441_v39 = vld [vmem:[#allocation14 + $0xa4] sm:$0xf] }
 0x7fb   :  { %v772_v60 = vpop.f32.mrf.mxu0 }
 0x7fc   :  { %1468 = vxpose.xlu2.b32.cont [4/16] (narrow) %v772_v60, 8  ;;  %v6410_v60 = vor.u32 %v7443_v37, %v6409_v36  ;;  %v7423_v36 = vld [vmem:[#allocation14 + $0xc] sm:$0xf0]  ;;  %v7421_v37 = vld [vmem:[#allocation14 + $0x4] sm:$0xf] }
 0x7fe   :  { %1815 = vmatpush.bf16.msrb.mxu2 %v6410_v60  ;;  %v6330_v60 = vor.u32 %v7423_v36, %v6329_v54 }
 0x803   :  { %v1000_v0 = vpop.f32.mrf.mxu0 }
 0x805   :  { %v1428_v61 = vpop.trf.xlu0 }
 0x806   :  { %v1444_v40 = vpack.c.bf16 %v1428_v61, %v1428_v61  ;;  %v6411_v61 = vld [vmem:[#allocation14 + $0xb0] sm:$0xf0] }
 0x808   :  { %v1449_v9 = vsel %vm642_vm6, %v1444_v40, 0  ;;  %v6417_v40 = vld [vmem:[#allocation14 + $0xa8] sm:$0xf] }
 0x809   :  { %1458 = vmatpush.bf16.msra.mxu0 %v1449_v9  ;;  %v7444_v9 = vld [vmem:[#allocation14 + $0xb4] sm:$0xf0] }
 0x80b   :  { %v1002_v2 = vpop.f32.mrf.mxu0 }
 0x80c   :  { %6294 = vmatmul.msk.bf16.vlgmr.msra.gmra.mxu0 %vm593_vm5, %v1411_v29  ;;  %v7418_v29 = vld [vmem:[#allocation11 + $0x28] sm:$0xff] }
 0x80d   :  { %1568 = vmatpush.bf16.msrb.mxu1 %v7418_v29  ;;  %1839 = vmatpush.bf16.msrb.mxu0 %v6450_v24  ;;  %v7440_v29 = vld [vmem:[#allocation14 + $0x94] sm:$0xf0] }
 0x80e   :  { %v7432_v24 = vld [vmem:[#allocation14 + $0x54] sm:$0xf0] }
 0x80f   :  { %v6370_v38 = vor.u32 %v7432_v24, %v6369_v19  ;;  %v8007_v24 = vld [vmem:[%s9036_s7] ss:$0 sm:$0xff] }
 0x811   :  { %1569 = vmatpush.bf16.msrb.mxu1 %v7417_v45  ;;  %1840 = vmatpush.bf16.msrb.mxu0 %v6434_v58  ;;  %v7426_v58 = vld [vmem:[#allocation14 + $0x2c] sm:$0xf] }
 0x815   :  { %1570 = vmatpush.bf16.msrb.mxu1 %v7416_v46 }
 0x819   :  { %1571 = vmatpush.bf16.msrb.mxu1 %v7415_v48  ;;  %v6403_v48 = vld [vmem:[#allocation14 + $0x98] sm:$0xf0] }
 0x81d   :  { %1572 = vmatpush.bf16.msrb.mxu1 %v7414_v50  ;;  %v6377_v50 = vld [vmem:[#allocation14 + $0x60] sm:$0xf] }
 0x821   :  { %1573 = vmatpush.bf16.msrb.mxu1 %v7413_v51  ;;  %v7435_v51 = vld [vmem:[#allocation14 + $0x6c] sm:$0xf0] }
 0x825   :  { %1852 = vmatpush.bf16.msra.mxu1 %v6454_v14  ;;  %v7430_v14 = vld [vmem:[#allocation14 + $0x4c] sm:$0xf] }
 0x829   :  { %1853 = vmatpush.bf16.msra.mxu1 %v6438_v55  ;;  %v6358_v55 = vor.u32 %v7426_v58, %v6355_v59  ;;  %v7461_v58 = vld [vmem:[#allocation17 + $0x40] sm:$0xff]  ;;  %v1643_v59 = vld [vmem:[#allocation16] sm:$0xf] }
 0x82a   :  { %v1647_v54 = vperm.slane %v1643_v59, 2 }
 0x83b   :  { %v885_v20 = vpop.f32.mrf.mxu2 }
 0x83c   :  { %1469 = vxpose.xlu2.b32.cont [5/16] (narrow) %v885_v20, 8  ;;  %v6414_v20 = vor.u32 %v7441_v39, %v6411_v61  ;;  %v6331_v39 = vld [vmem:[#allocation14 + $0x10] sm:$0xf0] }
 0x83d   :  { %v6334_v61 = vor.u32 %v7421_v37, %v6331_v39 }
 0x83e   :  { %1828 = vmatpush.bf16.msra.mxu3 %v6414_v20  ;;  %v7422_v20 = vld [vmem:[#allocation14 + $0xc] sm:$0xf] }
 0x843   :  { %v887_v23 = vpop.f32.mrf.mxu2 }
 0x844   :  { %1470 = vxpose.xlu2.b32.cont [6/16] (narrow) %v887_v23, 8  ;;  %v6418_v23 = vor.u32 %v7444_v9, %v6417_v40  ;;  %v6337_v40 = vld [vmem:[#allocation14 + $0x8] sm:$0xf]  ;;  %v7424_v9 = vld [vmem:[#allocation14 + $0x14] sm:$0xf0] }
 0x846   :  { %1841 = vmatpush.bf16.msrb.mxu0 %v6418_v23  ;;  %v6338_v23 = vor.u32 %v7424_v9, %v6337_v40  ;;  %v1646_v40 = vperm.slane %v1643_v59, 1 }
 0x84b   :  { %v1115_v21 = vpop.f32.mrf.mxu2 }
 0x84c   :  { %1471 = vxpose.xlu2.b32.cont [7/16] (narrow) %v1000_v0, 8  ;;  %v7442_v0 = vld [vmem:[#allocation14 + $0xac] sm:$0xf] }
 0x853   :  { %v1117_v41 = vpop.f32.mrf.mxu2 }
 0x854   :  { %1472 = vxpose.xlu2.b32.cont [8/16] (narrow) %v1002_v2, 8  ;;  %v6419_v2 = vld [vmem:[#allocation14 + $0xb8] sm:$0xf0] }
 0x85b   :  { %v1345_v28 = vpop.f32.mrf.mxu2 }
 0x85c   :  { %1473 = vxpose.xlu2.b32.cont [9/16] (narrow) %v1115_v21, 8  ;;  %v6422_v21 = vor.u32 %v7442_v0, %v6419_v2  ;;  %v6339_v0 = vld [vmem:[#allocation14 + $0x18] sm:$0xf0] }
 0x85d   :  { %v6342_v2 = vor.u32 %v7422_v20, %v6339_v0 }
 0x85e   :  { %1854 = vmatpush.bf16.msra.mxu1 %v6422_v21 }
 0x863   :  { %v1347_v47 = vpop.f32.mrf.mxu2 }
 0x864   :  { %1474 = vxpose.xlu2.b32.cont [10/16] (narrow) %v1117_v41, 8  ;;  %v6393_v41 = vld [vmem:[#allocation14 + $0x80] sm:$0xf] }
 0x869   :  { %v1230_v22 = vpop.f32.mrf.mxu0 }
 0x86c   :  { %1475 = vxpose.xlu2.b32.cont [11/16] (narrow) %v1230_v22, 8  ;;  %v7439_v22 = vld [vmem:[#allocation14 + $0x8c] sm:$0xf0] }
 0x86d   :  { %v6394_v44 = vor.u32 %v7439_v22, %v6393_v41  ;;  %v7476_v41 = vld [vmem:[#allocation17 + $0xb8] sm:$0xff] }
 0x86e   :  { %v7484_v22 = vld [vmem:[#allocation17 + $0xf8] sm:$0xff] }
 0x86f   :  { %1816 = vmatpush.bf16.msrb.mxu2 %v6394_v44  ;;  %v7460_v44 = vld [vmem:[#allocation17 + $0x38] sm:$0xff] }
 0x871   :  { %v1232_v42 = vpop.f32.mrf.mxu0 }
 0x874   :  { %1476 = vxpose.xlu2.b32.cont [12/16] (narrow) %v1232_v42, 8  ;;  %v7437_v42 = vld [vmem:[#allocation14 + $0x84] sm:$0xf] }
 0x875   :  { %v6398_v45 = vor.u32 %v7437_v42, %v6395_v6  ;;  %v7468_v6 = vld [vmem:[#allocation17 + $0x78] sm:$0xff] }
 0x877   :  { %1829 = vmatpush.bf16.msra.mxu3 %v6398_v45 }
 0x87c   :  { %1477 = vxpose.xlu2.b32.cont [13/16] (narrow) %v1345_v28, 8  ;;  %v6401_v28 = vld [vmem:[#allocation14 + $0x88] sm:$0xf] }
 0x87d   :  { %v6402_v46 = vor.u32 %v7440_v29, %v6401_v28  ;;  %v7475_v28 = vld [vmem:[#allocation17 + $0xb0] sm:$0xff] }
 0x87e   :  { %v7483_v29 = vld [vmem:[#allocation17 + $0xf0] sm:$0xff] }
 0x87f   :  { %1842 = vmatpush.bf16.msrb.mxu0 %v6402_v46  ;;  %v7459_v46 = vld [vmem:[#allocation17 + $0x30] sm:$0xff] }
 0x884   :  { %1478 = vxpose.xlu2.b32.cont [14/16] (narrow) %v1347_v47, 8  ;;  %v7438_v47 = vld [vmem:[#allocation14 + $0x8c] sm:$0xf] }
 0x889   :  { %v1460_v49 = vpop.f32.mrf.mxu0 }
 0x88c   :  { %1479 = vxpose.xlu2.b32.cont [15/16] (narrow) %v1460_v49, 8  ;;  %v6406_v49 = vor.u32 %v7438_v47, %v6403_v48  ;;  %v7467_v47 = vld [vmem:[#allocation17 + $0x70] sm:$0xff]  ;;  %v7474_v48 = vld [vmem:[#allocation17 + $0xa8] sm:$0xff] }
 0x88e   :  { %1855 = vmatpush.bf16.msra.mxu1 %v6406_v49  ;;  %v7482_v49 = vld [vmem:[#allocation17 + $0xe8] sm:$0xff] }
 0x891   :  { %v1462_v62 = vpop.f32.mrf.mxu0 }
 0x894   :  { %1480 = vxpose.xlu2.b32.end [16/16] (narrow) %v1462_v62, 8  ;;  %v7433_v62 = vld [vmem:[#allocation14 + $0x64] sm:$0xf] }
 0x8b5   :  { %v1481_v63 = vpop.trf.xlu2 }
 0x8b6   :  { %v1497_v1 = vpack.c.bf16 %v1481_v63, %v1481_v63  ;;  %v6378_v63 = vor.u32 %v7435_v51, %v6377_v50  ;;  %v7458_v50 = vld [vmem:[#allocation17 + $0x28] sm:$0xff] }
 0x8b7   :  { %v7466_v51 = vld [vmem:[#allocation17 + $0x68] sm:$0xff] }
 0x8b8   :  { %1574 = vmatmul.bf16.vlgmr.msrb.gmra.mxu1 %v1497_v1  ;;  %v6379_v1 = vld [vmem:[#allocation14 + $0x70] sm:$0xf0]  ;;  %1817 = vmatpush.bf16.msrb.mxu2 %v6378_v63  ;;  %v7481_v63 = vld [vmem:[#allocation17 + $0xe0] sm:$0xff] }
 0x8bc   :  { %1818 = vmatpush.bf16.msrb.mxu2 %v6362_v57  ;;  %v7471_v57 = vld [vmem:[#allocation17 + $0x90] sm:$0xff] }
 0x935   :  { %v1575_v4 = vpop.f32.mrf.mxu1 }
 0x936   :  { %v1576_v7 = vadd.f32 %v8006_v3, %v1575_v4  ;;  %v6385_v3 = vld [vmem:[#allocation14 + $0x68] sm:$0xf]  ;;  %v7436_v4 = vld [vmem:[#allocation14 + $0x74] sm:$0xf0] }
 0x938   :  { %v8709_v10 = vadd.f32 %v8132_v8, %v1576_v7  ;;  %v6382_v7 = vor.u32 %v7433_v62, %v6379_v1  ;;  %v6386_v8 = vor.u32 %v7436_v4, %v6385_v3  ;;  %v7473_v62 = vld [vmem:[#allocation17 + $0xa0] sm:$0xff] }
 0x939   :  { %v7457_v3 = vld [vmem:[#allocation17 + $0x20] sm:$0xff] }
 0x93a   :  { %1582 = vadd.xlane.f32.xlu1 %v8709_v10  ;;  %1830 = vmatpush.bf16.msra.mxu3 %v6382_v7  ;;  %v7465_v4 = vld [vmem:[#allocation17 + $0x60] sm:$0xff] }
 0x93b   :  { %1843 = vmatpush.bf16.msrb.mxu0 %v6386_v8 }
 0x93d   :  { %v1577_v11 = vpop.f32.mrf.mxu1 }
 0x93e   :  { %v7434_v11 = vld [vmem:[#allocation14 + $0x6c] sm:$0xf]  ;;  %1831 = vmatpush.bf16.msra.mxu3 %v6366_v25 }
 0x93f   :  { %v6390_v17 = vor.u32 %v7434_v11, %v6387_v15  ;;  %1844 = vmatpush.bf16.msrb.mxu0 %v6370_v38  ;;  %v7472_v11 = vld [vmem:[#allocation17 + $0x98] sm:$0xff] }
 0x940   :  { %v7480_v15 = vld [vmem:[#allocation17 + $0xd8] sm:$0xff] }
 0x941   :  { %1856 = vmatpush.bf16.msra.mxu1 %v6390_v17  ;;  %v7456_v17 = vld [vmem:[#allocation17 + $0x18] sm:$0xff] }
 0x942   :  { %1832 = vmatpush.bf16.msra.mxu3 %v6350_v13  ;;  %v7462_v13 = vld [vmem:[#allocation17 + $0x48] sm:$0xff] }
 0x943   :  { %1845 = vmatpush.bf16.msrb.mxu0 %v6354_v35  ;;  %v7453_v35 = vld [vmem:[#allocation17] sm:$0xff] }
 0x946   :  { %1833 = vmatpush.bf16.msra.mxu3 %v6334_v61  ;;  %v1645_v61 = vperm.slane %v1643_v59, 0 }
 0x947   :  { %1846 = vmatpush.bf16.msrb.mxu0 %v6338_v23 }
 0x94a   :  { %2146 = vmatpush.bf16.msrb.mxu3 %v7468_v6 }
 0x94b   :  { %2159 = vmatpush.bf16.msra.mxu0 %v7476_v41 }
 0x94e   :  { %2147 = vmatpush.bf16.msrb.mxu3 %v7467_v47 }
 0x94f   :  { %2160 = vmatpush.bf16.msra.mxu0 %v7475_v28 }
 0x952   :  { %2148 = vmatpush.bf16.msrb.mxu3 %v7466_v51 }
 0x953   :  { %2161 = vmatpush.bf16.msra.mxu0 %v7474_v48 }
 0x956   :  { %2149 = vmatpush.bf16.msrb.mxu3 %v7465_v4 }
 0x957   :  { %2162 = vmatpush.bf16.msra.mxu0 %v7473_v62  ;;  %v8009_v62 = vld [vmem:[%s9041_s12] ss:$0 sm:$0xff] }
 0x95a   :  { %2150 = vmatpush.bf16.msrb.mxu3 %v7464_v18  ;;  %v6669_v18 = vld [vmem:[#allocation8 + $0x168] sm:$0xf] }
 0x95b   :  { %2163 = vmatpush.bf16.msra.mxu0 %v7472_v11 }
 0x95e   :  { %2151 = vmatpush.bf16.msrb.mxu3 %v7463_v52  ;;  %v6659_v52 = vld [vmem:[#allocation8 + $0x15c] sm:$0xf0] }
 0x95f   :  { %2164 = vmatpush.bf16.msra.mxu0 %v7471_v57 }
 0x962   :  { %2152 = vmatpush.bf16.msrb.mxu3 %v7462_v13 }
 0x966   :  { %2153 = vmatpush.bf16.msrb.mxu3 %v7461_v58  ;;  %v7501_v58 = vld [vmem:[#allocation8 + $0x140] sm:$0xf0] }
 0x9ad   :  { %v1583_v26 = vpop.xlane.xlu1 %1582 }
 0x9ae   :  { %v1584_v27 = vmul.f32 %v1583_v26, %v8551_v16  ;;  %v6371_v26 = vld [vmem:[#allocation14 + $0x58] sm:$0xf0] }
 0x9b0   :  { %v8714_v30 = vsub.f32 %v8709_v10, %v1584_v27  ;;  %v6374_v27 = vor.u32 %v7430_v14, %v6371_v26  ;;  %v8008_v14 = vld [vmem:[#allocation13] ss:$0 sm:$0xff] }
 0x9b2   :  { %v1586_v31 = vmul.f32 %v8714_v30, %v8714_v30  ;;  %1857 = vmatpush.bf16.msra.mxu1 %v6374_v27 }
 0x9b4   :  { %1587 = vadd.xlane.f32.xlu0 %v1586_v31  ;;  %v6345_v31 = vld [vmem:[#allocation14 + $0x20] sm:$0xf] }
 0x9b5   :  { %v6346_v34 = vor.u32 %v7427_v32, %v6345_v31  ;;  %v7470_v32 = vld [vmem:[#allocation17 + $0x88] sm:$0xff] }
 0x9b6   :  { %1858 = vmatpush.bf16.msra.mxu1 %v6358_v55  ;;  %2165 = vmatpush.bf16.msra.mxu0 %v7470_v32  ;;  %v1648_v55 = vperm.slane %v1643_v59, 3  ;;  %v7504_v32 = vld [vmem:[#allocation8 + $0x158] sm:$0xf0] }
 0x9b7   :  { %1819 = vmatpush.bf16.msrb.mxu2 %v6346_v34  ;;  %v7455_v34 = vld [vmem:[#allocation17 + $0x10] sm:$0xff]  ;;  %v7500_v59 = vld [vmem:[#allocation8 + $0x13c] sm:$0xf] }
 0x9ba   :  { %1859 = vmatpush.bf16.msra.mxu1 %v6342_v2  ;;  %2166 = vmatpush.bf16.msra.mxu0 %v7469_v53  ;;  %v6665_v53 = vld [vmem:[#allocation8 + $0x158] sm:$0xf] }
 0x9bb   :  { %1820 = vmatpush.bf16.msrb.mxu2 %v6330_v60 }
 0x9be   :  { %2172 = vmatpush.bf16.msrb.mxu1 %v7484_v22 }
 0x9bf   :  { %2133 = vmatpush.bf16.msra.mxu2 %v7460_v44 }
 0x9c2   :  { %2173 = vmatpush.bf16.msrb.mxu1 %v7483_v29 }
 0x9c3   :  { %2134 = vmatpush.bf16.msra.mxu2 %v7459_v46 }
 0x9c6   :  { %2174 = vmatpush.bf16.msrb.mxu1 %v7482_v49 }
 0x9c7   :  { %2135 = vmatpush.bf16.msra.mxu2 %v7458_v50 }
 0x9ca   :  { %2175 = vmatpush.bf16.msrb.mxu1 %v7481_v63 }
 0x9cb   :  { %2136 = vmatpush.bf16.msra.mxu2 %v7457_v3 }
 0x9ce   :  { %2176 = vmatpush.bf16.msrb.mxu1 %v7480_v15 }
 0x9cf   :  { %2137 = vmatpush.bf16.msra.mxu2 %v7456_v17 }
 0x9d2   :  { %2177 = vmatpush.bf16.msrb.mxu1 %v7479_v5  ;;  %v6671_v5 = vld [vmem:[#allocation8 + $0x174] sm:$0xf0] }
 0x9d3   :  { %2138 = vmatpush.bf16.msra.mxu2 %v7455_v34 }
 0x9d6   :  { %2178 = vmatpush.bf16.msrb.mxu1 %v7478_v33  ;;  %v7503_v33 = vld [vmem:[#allocation8 + $0x154] sm:$0xf] }
 0x9da   :  { %2179 = vmatpush.bf16.msrb.mxu1 %v7477_v12  ;;  %v7505_v12 = vld [vmem:[#allocation8 + $0x160] sm:$0xf0] }
 0x9db   :  { %v6666_v13 = vor.u32 %v7505_v12, %v6665_v53 }
 0xa27   :  { %v1588_v21 = vpop.xlane.xlu0 %1587 }
 0xa28   :  { %v1589_v42 = vmul.f32 %v1588_v21, %v8551_v16 }
 0xa2a   :  { %v1590_v45 = vadd.f32 1e-05, %v1589_v42 }
 0xa2c   :  { %8058 = vrsqrt.f32 %v1590_v45  ;;  %vm1597_vm8 = vweird.f32 %v1590_v45 }
 0xa32   :  { %v8059_v1 = vpop.eup %8058 }
 0xa33   :  { %v1592_v7 = vmul.f32 %v8059_v1, %v1590_v45  ;;  %vm1598_vm7 = vweird.f32 %v8059_v1 }
 0xa34   :  { %vm1599_vm9 = vmor %vm1597_vm8, %vm1598_vm7 }
 0xa35   :  { %v1593_v8 = vmul.f32 %v8059_v1, %v1592_v7 }
 0xa37   :  { %v1594_v56 = vmul.f32 0.5, %v1593_v8 }
 0xa39   :  { %v1595_v43 = vsub.f32 1.5, %v1594_v56  ;;  %v7507_v56 = vld [vmem:[#allocation8 + $0x170] sm:$0xf0] }
 0xa3a   :  { %v6670_v57 = vor.u32 %v7507_v56, %v6669_v18  ;;  %v6599_v18 = vld [vmem:[#allocation8 + $0xe4] sm:$0xf0]  ;;  %v6605_v56 = vld [vmem:[#allocation8 + $0xe0] sm:$0xf] }
 0xa3b   :  { %v1596_v19 = vmul.f32 %v8059_v1, %v1595_v43  ;;  %v7506_v43 = vld [vmem:[#allocation8 + $0x16c] sm:$0xf] }
 0xa3d   :  { %v1600_v25 = vsel %vm1599_vm9, %v8059_v1, %v1596_v19  ;;  %v6677_v19 = vld [vmem:[#allocation8 + $0x170] sm:$0xf] }
 0xa3e   :  { %v1601_v38 = vmul.f32 %v1600_v25, %v8714_v30  ;;  %v7454_v30 = vld [vmem:[#allocation17 + $0x8] sm:$0xff]  ;;  %v6674_v25 = vor.u32 %v7506_v43, %v6671_v5  ;;  %v7490_v43 = vld [vmem:[#allocation8 + $0xe8] sm:$0xf0] }
 0xa3f   :  { %2139 = vmatpush.bf16.msra.mxu2 %v7454_v30  ;;  %v6662_v30 = vor.u32 %v7503_v33, %v6659_v52  ;;  %v6606_v5 = vor.u32 %v7490_v43, %v6605_v56 }
 0xa40   :  { %v1605_v26 = vmul.f32 %v8007_v24, %v1601_v38  ;;  %v7508_v24 = vld [vmem:[#allocation8 + $0x178] sm:$0xf0] }
 0xa41   :  { %v6678_v38 = vor.u32 %v7508_v24, %v6677_v19  ;;  %v6585_v19 = vld [vmem:[#allocation8 + $0xc0] sm:$0xf]  ;;  %v7486_v24 = vld [vmem:[#allocation8 + $0xc8] sm:$0xf0] }
 0xa42   :  { %v1609_v27 = vadd.f32 %v8008_v14, %v1605_v26 }
 0xa43   :  { %2140 = vmatpush.bf16.msra.mxu2 %v7453_v35  ;;  %v6645_v35 = vld [vmem:[#allocation8 + $0x138] sm:$0xf] }
 0xa44   :  { %v1610_v31 = vpack.c.bf16 %v1609_v27, %v1609_v27 }
 0xa46   :  { %1821 = vmatmul.bf16.vlgmr.msrb.gmra.mxu2 %v1610_v31  ;;  %1834 = vmatmul.bf16.vlgmr.msra.gmra.mxu3 %v1610_v31 }
 0xa47   :  { %1847 = vmatmul.bf16.vlgmr.msrb.gmra.mxu0 %v1610_v31  ;;  %1860 = vmatmul.bf16.vlgmr.msra.gmra.mxu1 %v1610_v31  ;;  %v6657_v31 = vld [vmem:[#allocation8 + $0x150] sm:$0xf] }
 0xa48   :  { %2389 = vmatpush.bf16.msrb.mxu2 %v6670_v57  ;;  %2402 = vmatpush.bf16.msra.mxu3 %v6674_v25  ;;  %v6658_v34 = vor.u32 %v7504_v32, %v6657_v31  ;;  %v7485_v25 = vld [vmem:[#allocation8 + $0xc4] sm:$0xf] }
 0xa49   :  { %2415 = vmatpush.bf16.msrb.mxu0 %v6678_v38  ;;  %v6586_v38 = vor.u32 %v7486_v24, %v6585_v19 }
 0xa4c   :  { %2390 = vmatpush.bf16.msrb.mxu2 %v6658_v34  ;;  %2403 = vmatpush.bf16.msra.mxu3 %v6662_v30 }
 0xa4d   :  { %2416 = vmatpush.bf16.msrb.mxu0 %v6666_v13 }
 0xac4   :  { %v1848_v36 = vpop.f32.mrf.mxu0  ;;  %v1861_v37 = vpop.f32.mrf.mxu1 }
 0xac5   :  { %v1849_v39 = vadd.f32 %v1848_v36, %v1647_v54  ;;  %v1862_v60 = vadd.f32 %v1861_v37, %v1648_v55  ;;  %v6646_v54 = vor.u32 %v7501_v58, %v6645_v35  ;;  %v6647_v55 = vld [vmem:[#allocation8 + $0x144] sm:$0xf0]  ;;  %v6653_v36 = vld [vmem:[#allocation8 + $0x140] sm:$0xf]  ;;  %v7502_v37 = vld [vmem:[#allocation8 + $0x148] sm:$0xf0] }
 0xac7   :  { %v1867_v9 = vmax.f32 %v1849_v39, 0.0  ;;  %v1868_v20 = vmax.f32 %v1862_v60, 0.0  ;;  %v6650_v39 = vor.u32 %v7500_v59, %v6647_v55  ;;  %v6654_v60 = vor.u32 %v7502_v37, %v6653_v36  ;;  %2391 = vmatpush.bf16.msrb.mxu2 %v6646_v54  ;;  %v8010_v59 = vld [vmem:[#allocation5 + $0x1] ss:$0 sm:$0xff]  ;;  %v8011_v36 = vld [vmem:[#allocation7 + $0x1] ss:$0 sm:$0xff] }
 0xac9   :  { %v1871_v23 = vpack.c.bf16 %v1867_v9, %v1867_v9  ;;  %v1872_v0 = vpack.c.bf16 %v1868_v20, %v1868_v20  ;;  %v1822_v2 = vpop.f32.mrf.mxu2  ;;  %v1835_v21 = vpop.f32.mrf.mxu3  ;;  %2404 = vmatpush.bf16.msra.mxu3 %v6650_v39  ;;  %2417 = vmatpush.bf16.msrb.mxu0 %v6654_v60  ;;  %v7497_v9 = vld [vmem:[#allocation8 + $0x124] sm:$0xf] }
 0xaca   :  { %v1823_v41 = vadd.f32 %v1822_v2, %v1645_v61  ;;  %v1836_v22 = vadd.f32 %v1835_v21, %v1646_v40  ;;  %v6633_v61 = vld [vmem:[#allocation8 + $0x120] sm:$0xf]  ;;  %v7498_v40 = vld [vmem:[#allocation8 + $0x128] sm:$0xf0]  ;;  %v7499_v2 = vld [vmem:[#allocation8 + $0x130] sm:$0xf0] }
 0xacb   :  { %2167 = vmatmul.bf16.vlgmr.msra.gmra.mxu0 %v1871_v23  ;;  %2180 = vmatmul.bf16.vlgmr.msrb.gmra.mxu1 %v1872_v0  ;;  %v6634_v20 = vor.u32 %v7498_v40, %v6633_v61  ;;  %v6635_v23 = vld [vmem:[#allocation8 + $0x12c] sm:$0xf0]  ;;  %v6641_v0 = vld [vmem:[#allocation8 + $0x128] sm:$0xf]  ;;  %v8740_v40 = vld [vmem:[#allocation10 + $0x3] sm:$0x7] }
 0xacc   :  { %v1865_v42 = vmax.f32 %v1823_v41, 0.0  ;;  %v1866_v44 = vmax.f32 %v1836_v22, 0.0  ;;  %v1850_v6 = vpop.f32.mrf.mxu0  ;;  %v1863_v28 = vpop.f32.mrf.mxu1  ;;  %v6638_v21 = vor.u32 %v7497_v9, %v6635_v23  ;;  %v6642_v41 = vor.u32 %v7499_v2, %v6641_v0  ;;  %v6621_v22 = vld [vmem:[#allocation8 + $0x108] sm:$0xf] }
 0xacd   :  { %2392 = vmatpush.bf16.msrb.mxu2 %v6634_v20  ;;  %v6623_v28 = vld [vmem:[#allocation8 + $0x114] sm:$0xf0]  ;;  %v2255_v9 = vperm.slane %v8740_v40, 0  ;;  %v2256_v20 = vperm.slane %v8740_v40, 1 }
 0xace   :  { %v1869_v29 = vpack.c.bf16 %v1865_v42, %v1865_v42  ;;  %v1870_v45 = vpack.c.bf16 %v1866_v44, %v1866_v44  ;;  %2405 = vmatpush.bf16.msra.mxu3 %v6638_v21  ;;  %2418 = vmatpush.bf16.msrb.mxu0 %v6642_v41  ;;  %v7495_v42 = vld [vmem:[#allocation8 + $0x110] sm:$0xf0]  ;;  %v7494_v44 = vld [vmem:[#allocation8 + $0x10c] sm:$0xf] }
 0xacf   :  { %v6622_v6 = vor.u32 %v7495_v42, %v6621_v22 }
 0xad0   :  { %2141 = vmatmul.bf16.vlgmr.msra.gmra.mxu2 %v1869_v29  ;;  %2154 = vmatmul.bf16.vlgmr.msrb.gmra.mxu3 %v1870_v45  ;;  %v6629_v29 = vld [vmem:[#allocation8 + $0x110] sm:$0xf]  ;;  %v7496_v45 = vld [vmem:[#allocation8 + $0x118] sm:$0xf0] }
 0xad1   :  { %v1824_v46 = vpop.f32.mrf.mxu2  ;;  %v1837_v47 = vpop.f32.mrf.mxu3  ;;  %2393 = vmatpush.bf16.msrb.mxu2 %v6622_v6 }
 0xad2   :  { %v6626_v46 = vor.u32 %v7494_v44, %v6623_v28  ;;  %v6630_v47 = vor.u32 %v7496_v45, %v6629_v29 }
 0xad4   :  { %2406 = vmatpush.bf16.msra.mxu3 %v6626_v46  ;;  %2419 = vmatpush.bf16.msrb.mxu0 %v6630_v47 }
 0xb48   :  { %v2168_v48 = vpop.f32.mrf.mxu0  ;;  %v2181_v49 = vpop.f32.mrf.mxu1 }
 0xb50   :  { %v2170_v50 = vpop.f32.mrf.mxu0  ;;  %v2183_v51 = vpop.f32.mrf.mxu1 }
 0xb51   :  { %v7491_v50 = vld [vmem:[#allocation8 + $0xf4] sm:$0xf] }
 0xb53   :  { %v2142_v63 = vpop.f32.mrf.mxu2  ;;  %v2155_v1 = vpop.f32.mrf.mxu3 }
 0xb54   :  { %v2143_v3 = vadd.f32 %v8009_v62, %v2142_v63  ;;  %v6611_v62 = vld [vmem:[#allocation8 + $0xfc] sm:$0xf0]  ;;  %v6617_v63 = vld [vmem:[#allocation8 + $0xf8] sm:$0xf] }
 0xb56   :  { %v2156_v4 = vadd.f32 %v2155_v1, %v2143_v3  ;;  %v7493_v1 = vld [vmem:[#allocation8 + $0x100] sm:$0xf0]  ;;  %v6614_v3 = vor.u32 %v7491_v50, %v6611_v62 }
 0xb58   :  { %v2169_v7 = vadd.f32 %v2168_v48, %v2156_v4  ;;  %v6609_v48 = vld [vmem:[#allocation8 + $0xf0] sm:$0xf]  ;;  %v6618_v4 = vor.u32 %v7493_v1, %v6617_v63  ;;  %2407 = vmatpush.bf16.msra.mxu3 %v6614_v3 }
 0xb5a   :  { %v2182_v8 = vadd.f32 %v2181_v49, %v2169_v7  ;;  %v7492_v49 = vld [vmem:[#allocation8 + $0xf8] sm:$0xf0]  ;;  %2420 = vmatpush.bf16.msrb.mxu0 %v6618_v4  ;;  %v6597_v7 = vld [vmem:[#allocation8 + $0xd8] sm:$0xf] }
 0xb5b   :  { %v2144_v11 = vpop.f32.mrf.mxu2  ;;  %v2157_v15 = vpop.f32.mrf.mxu3  ;;  %v6610_v51 = vor.u32 %v7492_v49, %v6609_v48 }
 0xb5c   :  { %v8727_v17 = vadd.f32 %v2182_v8, %v8709_v10  ;;  %v7489_v8 = vld [vmem:[#allocation8 + $0xe0] sm:$0xf0]  ;;  %v7488_v11 = vld [vmem:[#allocation8 + $0xdc] sm:$0xf] }
 0xb5d   :  { %2394 = vmatpush.bf16.msrb.mxu2 %v6610_v51  ;;  %v6598_v15 = vor.u32 %v7489_v8, %v6597_v7  ;;  %v6602_v57 = vor.u32 %v7488_v11, %v6599_v18 }
 0xb5e   :  { %2190 = vadd.xlane.f32.xlu1 %v8727_v17  ;;  %2421 = vmatpush.bf16.msrb.mxu0 %v6606_v5 }
 0xb5f   :  { %2408 = vmatpush.bf16.msra.mxu3 %v6602_v57 }
 0xb61   :  { %2395 = vmatpush.bf16.msrb.mxu2 %v6598_v15 }
 0xb65   :  { %2396 = vmatpush.bf16.msrb.mxu2 %v6586_v38 }
 0xbd1   :  { %v2191_v14 = vpop.xlane.xlu1 %2190 }
 0xbd2   :  { %v2192_v26 = vmul.f32 %v2191_v14, %v8551_v16  ;;  %v6587_v14 = vld [vmem:[#allocation8 + $0xcc] sm:$0xf0] }
 0xbd3   :  { %v6590_v31 = vor.u32 %v7485_v25, %v6587_v14 }
 0xbd4   :  { %v8732_v10 = vsub.f32 %v8727_v17, %v2192_v26  ;;  %v6593_v26 = vld [vmem:[#allocation8 + $0xc8] sm:$0xf] }
 0xbd5   :  { %2409 = vmatpush.bf16.msra.mxu3 %v6590_v31 }
 0xbd6   :  { %v2194_v27 = vmul.f32 %v8732_v10, %v8732_v10 }
 0xbd8   :  { %2195 = vadd.xlane.f32.xlu1 %v2194_v27  ;;  %v7487_v27 = vld [vmem:[#allocation8 + $0xd0] sm:$0xf0] }
 0xbd9   :  { %v6594_v32 = vor.u32 %v7487_v27, %v6593_v26 }
 0xbdb   :  { %2422 = vmatpush.bf16.msrb.mxu0 %v6594_v32 }
 0xc4b   :  { %v2196_v33 = vpop.xlane.xlu1 %2195 }
 0xc4c   :  { %v2197_v34 = vmul.f32 %v2196_v33, %v8551_v16 }
 0xc4e   :  { %v2198_v52 = vadd.f32 1e-05, %v2197_v34 }
 0xc50   :  { %8060 = vrsqrt.f32 %v2198_v52  ;;  %vm2205_vm11 = vweird.f32 %v2198_v52 }
 0xc56   :  { %v8061_v53 = vpop.eup %8060 }
 0xc57   :  { %v2200_v12 = vmul.f32 %v8061_v53, %v2198_v52  ;;  %vm2206_vm10 = vweird.f32 %v8061_v53 }
 0xc58   :  { %vm2207_vm12 = vmor %vm2205_vm11, %vm2206_vm10 }
 0xc59   :  { %v2201_v30 = vmul.f32 %v8061_v53, %v2200_v12 }
 0xc5b   :  { %v2202_v13 = vmul.f32 0.5, %v2201_v30 }
 0xc5d   :  { %v2203_v35 = vsub.f32 1.5, %v2202_v13 }
 0xc5f   :  { %v2204_v58 = vmul.f32 %v8061_v53, %v2203_v35 }
 0xc61   :  { %v2208_v54 = vsel %vm2207_vm12, %v8061_v53, %v2204_v58 }
 0xc62   :  { %v2209_v55 = vmul.f32 %v2208_v54, %v8732_v10 }
 0xc64   :  { %v2213_v37 = vmul.f32 %v8010_v59, %v2209_v55 }
 0xc66   :  { %v2217_v39 = vadd.f32 %v8011_v36, %v2213_v37 }
 0xc68   :  { %v2218_v60 = vpack.c.bf16 %v2217_v39, %v2217_v39 }
 0xc6a   :  { %2397 = vmatmul.bf16.vlgmr.msrb.gmra.mxu2 %v2218_v60  ;;  %2410 = vmatmul.bf16.vlgmr.msra.gmra.mxu3 %v2218_v60 }
 0xc6b   :  { %2423 = vmatmul.bf16.vlgmr.msrb.gmra.mxu0 %v2218_v60 }
 0xce8   :  { %v8738_v61 = vpop.f32.mrf.mxu0 }
 0xced   :  { %v2398_v23 = vpop.f32.mrf.mxu2  ;;  %v2411_v0 = vpop.f32.mrf.mxu3 }
 0xcee   :  { %v2399_v2 = vadd.f32 %v2398_v23, %v2255_v9  ;;  %v2412_v21 = vadd.f32 %v2411_v0, %v2256_v20 }
 0xcf0   :  { %v7790_v10 = vpack.i.bf16 %v2412_v21, %v2399_v2  ;;  %v2426_v41 = vpop.f32.mrf.mxu0 }
 0xcf2   :  { %7791 = vxpose.xlu1.b32.start.end [1/1] (short) %v7790_v10, 128 }
 0xcf5   :  { %v2400_v22 = vpop.f32.mrf.mxu2  ;;  %v2413_v42 = vpop.f32.mrf.mxu3 }
 0xd96   :  { %v7792_v44 = vpop.trf.xlu1 }
 0xd97   :  { %v7793_v6 = vunpack.i.l.bf16 %v7792_v44  ;;  %v7796_v28 = vunpack.i.h.bf16 %v7792_v44 }
 0xd99   :  { %2524 = vxpose.xlu0.b32.start [1/2] (short) (narrow) %v7793_v6, 8 }
 0xd9e   :  { %v7797_v29 = vpop.trf.xlu1 }
 0xd9f   :  { %v7801_v45 = vunpack.i.h.bf16 %v7797_v29  ;;  %v7798_v46 = vunpack.i.l.bf16 %v7797_v29 }
 0xda1   :  { %2525 = vxpose.xlu0.b32.end [2/2] (short) (narrow) %v7798_v46, 8  ;;  %v2557_v47 = vpack.c.bf16 %v7801_v45, %v7796_v28 }
 0xda3   :  { %2568 = vmatpush.bf16.msra.mxu1 %v2557_v47 }
 0xda6   :  { %v7802_v48 = vpop.trf.xlu1 }
 0xda7   :  { %v7803_v49 = vunpack.i.l.bf16 %v7802_v48  ;;  %v7806_v50 = vunpack.i.h.bf16 %v7802_v48 }
 0xda9   :  { %2639 = vxpose.xlu2.b32.start [1/2] (short) (narrow) %v7803_v49, 8 }
 0xdae   :  { %v7807_v51 = vpop.trf.xlu1 }
 0xdaf   :  { %v7811_v62 = vunpack.i.h.bf16 %v7807_v51  ;;  %v7808_v63 = vunpack.i.l.bf16 %v7807_v51 }
 0xdb1   :  { %2640 = vxpose.xlu2.b32.end [2/2] (short) (narrow) %v7808_v63, 8  ;;  %v2672_v1 = vpack.c.bf16 %v7811_v62, %v7806_v50 }
 0xdb3   :  { %2683 = vmatpush.bf16.msrb.mxu3 %v2672_v1 }
 0xdb6   :  { %v7812_v3 = vpop.trf.xlu1 }
 0xdb7   :  { %v7813_v4 = vunpack.i.l.bf16 %v7812_v3  ;;  %v7816_v7 = vunpack.i.h.bf16 %v7812_v3 }
 0xdb9   :  { %2754 = vxpose.xlu2.b32.start [1/2] (short) (narrow) %v7813_v4, 8 }
 0xdbe   :  { %v7817_v8 = vpop.trf.xlu1 }
 0xdbf   :  { %v7821_v11 = vunpack.i.h.bf16 %v7817_v8  ;;  %v7818_v15 = vunpack.i.l.bf16 %v7817_v8 }
 0xdc1   :  { %2755 = vxpose.xlu2.b32.end [2/2] (short) (narrow) %v7818_v15, 8  ;;  %v2787_v18 = vpack.c.bf16 %v7821_v11, %v7816_v7 }
 0xdc3   :  { %2798 = vmatpush.bf16.msrb.mxu1 %v2787_v18 }
 0xdc6   :  { %v7822_v56 = vpop.trf.xlu1 }
 0xdc7   :  { %v7823_v43 = vunpack.i.l.bf16 %v7822_v56  ;;  %v7826_v57 = vunpack.i.h.bf16 %v7822_v56 }
 0xdc9   :  { %2869 = vxpose.xlu2.b32.start [1/2] (short) (narrow) %v7823_v43, 8 }
 0xdce   :  { %v7827_v5 = vpop.trf.xlu1 }
 0xdcf   :  { %v7831_v19 = vunpack.i.h.bf16 %v7827_v5  ;;  %v7828_v24 = vunpack.i.l.bf16 %v7827_v5 }
 0xdd1   :  { %2870 = vxpose.xlu2.b32.end [2/2] (short) (narrow) %v7828_v24, 8  ;;  %v2902_v25 = vpack.c.bf16 %v7831_v19, %v7826_v57 }
 0xdd3   :  { %2913 = vmatpush.bf16.msra.mxu3 %v2902_v25 }
 0xdd6   :  { %v7832_v38 = vpop.trf.xlu1 }
 0xdd7   :  { %v7833_v14 = vunpack.i.l.bf16 %v7832_v38  ;;  %v7836_v26 = vunpack.i.h.bf16 %v7832_v38  ;;  %v2257_v38 = vperm.slane %v8740_v40, 2 }
 0xdd9   :  { %2984 = vxpose.xlu0.b32.start [1/2] (short) (narrow) %v7833_v14, 8  ;;  %v2425_v14 = vadd.f32 %v8738_v61, %v2257_v38 }
 0xdde   :  { %v7837_v27 = vpop.trf.xlu1 }
 0xddf   :  { %v7841_v31 = vunpack.i.h.bf16 %v7837_v27  ;;  %v7838_v32 = vunpack.i.l.bf16 %v7837_v27 }
 0xde1   :  { %2985 = vxpose.xlu0.b32.end [2/2] (short) (narrow) %v7838_v32, 8  ;;  %v3017_v33 = vpack.c.bf16 %v7841_v31, %v7836_v26 }
 0xde6   :  { %v7842_v34 = vpop.trf.xlu1 }
 0xde7   :  { %v7843_v52 = vunpack.i.l.bf16 %v7842_v34  ;;  %v7846_v37 = vunpack.i.h.bf16 %v7842_v34 }
 0xde9   :  { %3099 = vxpose.xlu2.b32.start [1/2] (short) (narrow) %v7843_v52, 8 }
 0xdee   :  { %v7847_v53 = vpop.trf.xlu1 }
 0xdef   :  { %v7848_v12 = vunpack.i.l.bf16 %v7847_v53  ;;  %v7851_v39 = vunpack.i.h.bf16 %v7847_v53 }
 0xdf1   :  { %3100 = vxpose.xlu2.b32.end [2/2] (short) (narrow) %v7848_v12, 8  ;;  %v3132_v20 = vpack.c.bf16 %v7851_v39, %v7846_v37 }
 0xdf6   :  { %v7852_v30 = vpop.trf.xlu1 }
 0xdf7   :  { %v7853_v2 = vunpack.i.l.bf16 %v7852_v30  ;;  %v7856_v21 = vunpack.i.h.bf16 %v7852_v30 }
 0xdf9   :  { %3214 = vxpose.xlu1.b32.start [1/2] (short) (narrow) %v7853_v2, 8 }
 0xdfe   :  { %v7857_v13 = vpop.trf.xlu1 }
 0xdff   :  { %v7861_v10 = vunpack.i.h.bf16 %v7857_v13  ;;  %v7858_v44 = vunpack.i.l.bf16 %v7857_v13 }
 0xe01   :  { %v3247_v42 = vpack.c.bf16 %v7861_v10, %v7856_v21  ;;  %3215 = vxpose.xlu1.b32.end [2/2] (short) (narrow) %v7858_v44, 8 }
 0xe06   :  { %v7862_v35 = vpop.trf.xlu1 }
 0xe07   :  { %v7863_v58 = vunpack.i.l.bf16 %v7862_v35  ;;  %v7866_v46 = vunpack.i.h.bf16 %v7862_v35 }
 0xe09   :  { %3329 = vxpose.xlu0.b32.start [1/2] (short) (narrow) %v7863_v58, 8 }
 0xe0e   :  { %v7867_v59 = vpop.trf.xlu1 }
 0xe0f   :  { %v7868_v54 = vunpack.i.l.bf16 %v7867_v59  ;;  %v7871_v47 = vunpack.i.h.bf16 %v7867_v59 }
 0xe11   :  { %3330 = vxpose.xlu0.b32.end [2/2] (short) (narrow) %v7868_v54, 8  ;;  %v3362_v48 = vpack.c.bf16 %v7871_v47, %v7866_v46 }
 0xe3d   :  { %v2540_v55 = vpop.trf.xlu0 }
 0xe3e   :  { %v2556_v36 = vpack.c.bf16 %v2540_v55, %v2540_v55 }
 0xe40   :  { %6679 = vmatmul.msk.bf16.vlgmr.msra.gmra.mxu1 %vm576_vm4, %v2556_v36 }
 0xe41   :  { %3028 = vmatpush.bf16.msra.mxu1 %v3017_v33 }
 0xe42   :  { %v2655_v60 = vpop.trf.xlu2 }
 0xe43   :  { %v2671_v9 = vpack.c.bf16 %v2655_v60, %v2655_v60 }
 0xe45   :  { %6681 = vmatmul.msk.bf16.vlgmr.msrb.gmra.mxu3 %vm576_vm4, %v2671_v9 }
 0xe46   :  { %3143 = vmatpush.bf16.msrb.mxu3 %v3132_v20 }
 0xe52   :  { %v2770_v23 = vpop.trf.xlu2 }
 0xe53   :  { %v2786_v0 = vpack.c.bf16 %v2770_v23, %v2770_v23 }
 0xe55   :  { %6683 = vmatmul.msk.bf16.vlgmr.msrb.gmra.mxu1 %vm576_vm4, %v2786_v0 }
 0xe56   :  { %3258 = vmatpush.bf16.msrb.mxu1 %v3247_v42 }
 0xe62   :  { %v2885_v41 = vpop.trf.xlu2 }
 0xe63   :  { %v2901_v22 = vpack.c.bf16 %v2885_v41, %v2885_v41 }
 0xe65   :  { %6685 = vmatmul.msk.bf16.vlgmr.msra.gmra.mxu3 %vm576_vm4, %v2901_v22 }
 0xe66   :  { %3373 = vmatpush.bf16.msra.mxu3 %v3362_v48 }
 0xe7d   :  { %v3000_v6 = vpop.trf.xlu0 }
 0xe7e   :  { %v3016_v28 = vpack.c.bf16 %v3000_v6, %v3000_v6 }
 0xe80   :  { %6687 = vmatmul.msk.bf16.vlgmr.msra.gmra.mxu1 %vm576_vm4, %v3016_v28 }
 0xe82   :  { %v3115_v29 = vpop.trf.xlu2 }
 0xe83   :  { %v3131_v45 = vpack.c.bf16 %v3115_v29, %v3115_v29 }
 0xe85   :  { %6689 = vmatmul.msk.bf16.vlgmr.msrb.gmra.mxu3 %vm576_vm4, %v3131_v45 }
 0xe9d   :  { %v3230_v26 = vpop.trf.xlu1 }
 0xe9e   :  { %v3246_v27 = vpack.c.bf16 %v3230_v26, %v3230_v26 }
 0xea0   :  { %6691 = vmatmul.msk.bf16.vlgmr.msrb.gmra.mxu1 %vm576_vm4, %v3246_v27 }
 0xead   :  { %v3345_v24 = vpop.trf.xlu0 }
 0xeae   :  { %v3361_v25 = vpack.c.bf16 %v3345_v24, %v3345_v24 }
 0xeb0   :  { %6693 = vmatmul.msk.bf16.vlgmr.msra.gmra.mxu3 %vm576_vm4, %v3361_v25 }
 0xebd   :  { %v2570_v49 = vpop.f32.mrf.mxu1 }
 0xebe   :  { %v2574_v50 = vsel %vm593_vm5, %v2570_v49, -inf }
 0xebf   :  { %2575 = vmax.xlane.f32.xlu2 %v2574_v50 }
 0xec5   :  { %v2572_v51 = vpop.f32.mrf.mxu1 }
 0xec8   :  { %v2685_v62 = vpop.f32.mrf.mxu3 }
 0xec9   :  { %v2689_v63 = vsel %vm593_vm5, %v2685_v62, -inf }
 0xeca   :  { %2690 = vmax.xlane.f32.xlu0 %v2689_v63 }
 0xed0   :  { %v2687_v1 = vpop.f32.mrf.mxu3 }
 0xed2   :  { %v8752_v3 = vpop.f32.mrf.mxu1 }
 0xed3   :  { %v2804_v4 = vsel %vm593_vm5, %v8752_v3, -inf }
 0xed4   :  { %2805 = vmax.xlane.f32.xlu2 %v2804_v4 }
 0xeda   :  { %v2802_v7 = vpop.f32.mrf.mxu1 }
 0xee8   :  { %v2915_v8 = vpop.f32.mrf.mxu3 }
 0xee9   :  { %v2919_v11 = vsel %vm593_vm5, %v2915_v8, -inf }
 0xeea   :  { %2920 = vmax.xlane.f32.xlu1 %v2919_v11 }
 0xef0   :  { %v2917_v15 = vpop.f32.mrf.mxu3 }
 0xefd   :  { %v8757_v18 = vpop.f32.mrf.mxu1 }
 0xefe   :  { %v3034_v56 = vsel %vm593_vm5, %v8757_v18, -inf }
 0xeff   :  { %3035 = vmax.xlane.f32.xlu2 %v3034_v56 }
 0xf05   :  { %v3032_v43 = vpop.f32.mrf.mxu1 }
 0xf08   :  { %v3145_v57 = vpop.f32.mrf.mxu3 }
 0xf09   :  { %v3149_v5 = vsel %vm593_vm5, %v3145_v57, -inf }
 0xf0a   :  { %3150 = vmax.xlane.f32.xlu0 %v3149_v5 }
 0xf10   :  { %v3147_v19 = vpop.f32.mrf.mxu3 }
 0xf1d   :  { %v3260_v28 = vpop.f32.mrf.mxu1 }
 0xf25   :  { %v3262_v47 = vpop.f32.mrf.mxu1 }
 0xf28   :  { %2492 = vxpose.xlu2.b32.start.end [1/1] (short) %v2425_v14, 128 }
 0xf32   :  { %v2576_v31 = vpop.xlane.xlu2 %2575 }
 0xf33   :  { %v2577_v32 = vsub.f32 %v2570_v49, %v2576_v31  ;;  %v3375_v50 = vpop.f32.mrf.mxu3 }
 0xf35   :  { %v2578_v33 = vmul.f32 1.442695, %v2577_v32 }
 0xf37   :  { %8062 = vpow2.f32 %v2578_v33 }
 0xf3b   :  { %v3377_v63 = vpop.f32.mrf.mxu3 }
 0xf3d   :  { %v8063_v34 = vpop.eup %8062  ;;  %v2691_v52 = vpop.xlane.xlu0 %2690 }
 0xf3e   :  { %v2692_v53 = vsub.f32 %v2685_v62, %v2691_v52  ;;  %v2580_v12 = vsel %vm593_vm5, %v8063_v34, 0.0 }
 0xf3f   :  { %2581 = vadd.xlane.f32.xlu0 %v2580_v12 }
 0xf40   :  { %v2693_v30 = vmul.f32 1.442695, %v2692_v53 }
 0xf42   :  { %8064 = vpow2.f32 %v2693_v30 }
 0xf47   :  { %v2806_v2 = vpop.xlane.xlu2 %2805 }
 0xf48   :  { %v8065_v40 = vpop.eup %8064  ;;  %v2807_v11 = vsub.f32 %v8752_v3, %v2806_v2 }
 0xf49   :  { %v2695_v61 = vsel %vm593_vm5, %v8065_v40, 0.0 }
 0xf4a   :  { %2696 = vadd.xlane.f32.xlu0 %v2695_v61  ;;  %v2808_v43 = vmul.f32 1.442695, %v2807_v11 }
 0xf5d   :  { %v2921_v13 = vpop.xlane.xlu1 %2920 }
 0xf5e   :  { %v2922_v35 = vsub.f32 %v2915_v8, %v2921_v13  ;;  %v3264_v8 = vsel %vm593_vm5, %v3260_v28, -inf }
 0xf60   :  { %v2923_v58 = vmul.f32 1.442695, %v2922_v35 }
 0xf62   :  { %8066 = vpow2.f32 %v2923_v58 }
 0xf68   :  { %v8067_v59 = vpop.eup %8066 }
 0xf69   :  { %v2925_v54 = vsel %vm593_vm5, %v8067_v59, 0.0 }
 0xf6a   :  { %2926 = vadd.xlane.f32.xlu0 %v2925_v54 }
 0xf72   :  { %v3036_v22 = vpop.xlane.xlu2 %3035 }
 0xf73   :  { %v3037_v5 = vsub.f32 %v8757_v18, %v3036_v22 }
 0xf75   :  { %v3038_v24 = vmul.f32 1.442695, %v3037_v5 }
 0xf7d   :  { %v3151_v55 = vpop.xlane.xlu0 %3150 }
 0xf7e   :  { %v3152_v36 = vsub.f32 %v3145_v57, %v3151_v55  ;;  %v3379_v57 = vsel %vm593_vm5, %v3375_v50, -inf }
 0xf80   :  { %v3153_v37 = vmul.f32 1.442695, %v3152_v36 }
 0xf82   :  { %8068 = vpow2.f32 %v3153_v37 }
 0xf88   :  { %v8769_v39 = vpop.eup %8068 }
 0xf89   :  { %v3155_v60 = vsel %vm593_vm5, %v8769_v39, 0.0 }
 0xf8a   :  { %3156 = vadd.xlane.f32.xlu0 %v3155_v60 }
 0xfb2   :  { %v2582_v9 = vpop.xlane.xlu0 %2581 }
 0xfb3   :  { %8070 = vrcp.f32 %v2582_v9 }
 0xfb9   :  { %v8071_v23 = vpop.eup %8070 }
 0xfba   :  { %v2584_v21 = vmul.f32 %v8071_v23, %v8063_v34 }
 0xfbd   :  { %v2697_v20 = vpop.xlane.xlu0 %2696 }
 0xfbe   :  { %8072 = vrcp.f32 %v2697_v20 }
 0xfc1   :  { %v2508_v42 = vpop.trf.xlu2 }
 0xfc4   :  { %v8073_v0 = vpop.eup %8072 }
 0xfc5   :  { %v2699_v10 = vmul.f32 %v8073_v0, %v8065_v40 }
 0xfc7   :  { %v7872_v41 = vpack.i.bf16 %v2699_v10, %v2584_v21 }
 0xfc9   :  { %7873 = vxpose.xlu0.b32.start.end [1/1] (short) (narrow) %v7872_v41, 8  ;;  %v2509_v6 = vpop.trf.xlu2 }
 0xfca   :  { %v2585_v29 = vpack.c.bf16 %v2509_v6, %v2508_v42 }
 0xfd1   :  { %v2510_v48 = vpop.trf.xlu2 }
 0xfd9   :  { %v2511_v49 = vpop.trf.xlu2 }
 0xfda   :  { %v2700_v51 = vpack.c.bf16 %v2511_v49, %v2510_v48 }
 0xfdd   :  { %v2927_v44 = vpop.xlane.xlu0 %2926 }
 0xfde   :  { %8074 = vrcp.f32 %v2927_v44 }
 0xfdf   :  { %8076 = vpow2.f32 %v2808_v43 }
 0xfe0   :  { %8078 = vpow2.f32 %v3038_v24 }
 0xfe1   :  { %v8773_v62 = vpop.trf.xlu2 }
 0xfe4   :  { %v8075_v45 = vpop.eup %8074 }
 0xfe5   :  { %v2929_v46 = vmul.f32 %v8075_v45, %v8067_v59  ;;  %v8077_v25 = vpop.eup %8076 }
 0xfe6   :  { %v2810_v38 = vsel %vm593_vm5, %v8077_v25, 0.0  ;;  %v8079_v26 = vpop.eup %8078 }
 0xfe7   :  { %2931 = vxpose.xlu1.b32.start.end [1/1] (short) (narrow) %v2929_v46, 8  ;;  %v3040_v27 = vsel %vm593_vm5, %v8079_v26, 0.0 }
 0xfe9   :  { %v8775_v1 = vpop.trf.xlu2 }
 0xfea   :  { %v2815_v4 = vpack.c.bf16 %v8775_v1, %v8773_v62 }
 0xff1   :  { %v2514_v7 = vpop.trf.xlu2 }
 0xff9   :  { %v2515_v15 = vpop.trf.xlu2 }
 0xffa   :  { %v2930_v56 = vpack.c.bf16 %v2515_v15, %v2514_v7 }
 0xffd   :  { %v3157_v40 = vpop.xlane.xlu0 %3156 }
0x1001   :  { %v8783_v19 = vpop.trf.xlu2 }
0x1009   :  { %v8786_v14 = vpop.trf.xlu2 }
0x100a   :  { %v3045_v3 = vpack.c.bf16 %v8786_v14, %v8783_v19 }
0x1011   :  { %3265 = vmax.xlane.f32.xlu2 %v3264_v8  ;;  %v8791_v31 = vpop.trf.xlu2 }
0x1019   :  { %3380 = vmax.xlane.f32.xlu2 %v3379_v57  ;;  %v8793_v18 = vpop.trf.xlu2 }
0x101a   :  { %v3160_v32 = vpack.c.bf16 %v8793_v18, %v8791_v31 }
0x1021   :  { %2811 = vadd.xlane.f32.xlu2 %v2810_v38  ;;  %v8797_v33 = vpop.trf.xlu2 }
0x1029   :  { %3041 = vadd.xlane.f32.xlu2 %v3040_v27  ;;  %v8799_v34 = vpop.trf.xlu2 }
0x102a   :  { %v3275_v52 = vpack.c.bf16 %v8799_v34, %v8797_v33 }
0x1031   :  { %v8803_v53 = vpop.trf.xlu2 }
0x1039   :  { %v8805_v12 = vpop.trf.xlu2 }
0x103a   :  { %v3390_v30 = vpack.c.bf16 %v8805_v12, %v8803_v53  ;;  %v7515_v53 = vld [vmem:[#allocation11 + $0x70] sm:$0xff]  ;;  %v7514_v12 = vld [vmem:[#allocation11 + $0x68] sm:$0xff] }
0x106d   :  { %v7874_v61 = vpop.trf.xlu0 }
0x106e   :  { %v7878_v13 = vunpack.i.h.bf16 %v7874_v61  ;;  %v7875_v35 = vunpack.i.l.bf16 %v7874_v61 }
0x1070   :  { %v2618_v58 = vpack.c.bf16 %v7875_v35, %v7875_v35  ;;  %v2733_v59 = vpack.c.bf16 %v7878_v13, %v7878_v13 }
0x1072   :  { %v2623_v54 = vsel %vm642_vm6, %v2618_v58, 0  ;;  %v2738_v55 = vsel %vm642_vm6, %v2733_v59, 0  ;;  %v7513_v58 = vld [vmem:[#allocation11 + $0x60] sm:$0xff]  ;;  %v7512_v59 = vld [vmem:[#allocation11 + $0x58] sm:$0xff] }
0x1073   :  { %2632 = vmatpush.bf16.msra.mxu2 %v2623_v54  ;;  %2747 = vmatpush.bf16.msra.mxu0 %v2738_v55  ;;  %v7511_v55 = vld [vmem:[#allocation11 + $0x50] sm:$0xff] }
0x1076   :  { %6680 = vmatmul.msk.bf16.vlgmr.msra.gmra.mxu2 %vm593_vm5, %v2585_v29  ;;  %6682 = vmatmul.msk.bf16.vlgmr.msra.gmra.mxu0 %vm593_vm5, %v2700_v51 }
0x1084   :  { %v3266_v36 = vpop.xlane.xlu2 %3265 }
0x1085   :  { %v3267_v37 = vsub.f32 %v3260_v28, %v3266_v36 }
0x1087   :  { %v3268_v60 = vmul.f32 1.442695, %v3267_v37  ;;  %v7510_v37 = vld [vmem:[#allocation11 + $0x48] sm:$0xff] }
0x1089   :  { %8080 = vpow2.f32 %v3268_v60  ;;  %v7509_v60 = vld [vmem:[#allocation11 + $0x40] sm:$0xff] }
0x108b   :  { %v2947_v9 = vpop.trf.xlu1 }
0x108c   :  { %v2963_v20 = vpack.c.bf16 %v2947_v9, %v2947_v9  ;;  %v3381_v23 = vpop.xlane.xlu2 %3380 }
0x108d   :  { %v3382_v0 = vsub.f32 %v3375_v50, %v3381_v23 }
0x108e   :  { %v2968_v2 = vsel %vm642_vm6, %v2963_v20, 0 }
0x108f   :  { %v8081_v21 = vpop.eup %8080  ;;  %v3383_v10 = vmul.f32 1.442695, %v3382_v0  ;;  %2977 = vmatpush.bf16.msrb.mxu0 %v2968_v2  ;;  %v8012_v0 = vld [vmem:[%s9035_s6 + $0x1] ss:$0 sm:$0xff] }
0x1090   :  { %v3270_v41 = vsel %vm593_vm5, %v8081_v21, 0.0 }
0x1091   :  { %8082 = vpow2.f32 %v3383_v10  ;;  %3271 = vadd.xlane.f32.xlu2 %v3270_v41 }
0x1092   :  { %6686 = vmatmul.msk.bf16.vlgmr.msrb.gmra.mxu0 %vm593_vm5, %v2930_v56 }
0x1094   :  { %v2812_v22 = vpop.xlane.xlu2 %2811 }
0x1097   :  { %v8083_v42 = vpop.eup %8082 }
0x1098   :  { %v3385_v44 = vsel %vm593_vm5, %v8083_v42, 0.0 }
0x1099   :  { %3386 = vadd.xlane.f32.xlu0 %v3385_v44  ;;  %v7545_v44 = vld [vmem:[#allocation14 + $0x1e4] sm:$0xf] }
0x109c   :  { %v3042_v6 = vpop.xlane.xlu2 %3041 }
0x109d   :  { %8084 = vrcp.f32 %v3042_v6 }
0x109e   :  { %8086 = vrcp.f32 %v3157_v40 }
0x109f   :  { %8088 = vrcp.f32 %v2812_v22  ;;  %v6843_v22 = vld [vmem:[#allocation14 + $0x1e0] sm:$0xf] }
0x10a3   :  { %v8085_v28 = vpop.eup %8084 }
0x10a4   :  { %v3044_v29 = vmul.f32 %v8085_v28, %v8079_v26  ;;  %v8087_v45 = vpop.eup %8086  ;;  %v6845_v28 = vld [vmem:[#allocation14 + $0x1f0] sm:$0xf0] }
0x10a5   :  { %v3159_v46 = vmul.f32 %v8087_v45, %v8769_v39  ;;  %v8089_v47 = vpop.eup %8088  ;;  %v7548_v45 = vld [vmem:[#allocation14 + $0x1f4] sm:$0xf0] }
0x10a6   :  { %3046 = vxpose.xlu1.b32.start.end [1/1] (short) (narrow) %v3044_v29, 8  ;;  %v2814_v48 = vmul.f32 %v8089_v47, %v8077_v25  ;;  %v6851_v29 = vld [vmem:[#allocation14 + $0x1e8] sm:$0xf] }
0x10a7   :  { %v6852_v47 = vor.u32 %v7548_v45, %v6851_v29  ;;  %v6765_v45 = vld [vmem:[#allocation14 + $0x150] sm:$0xf0] }
0x10ae   :  { %3161 = vxpose.xlu1.b32.start.end [1/1] (short) (narrow) %v3159_v46, 8  ;;  %v6848_v46 = vor.u32 %v7545_v44, %v6845_v28  ;;  %v6763_v44 = vld [vmem:[#allocation14 + $0x140] sm:$0xf]  ;;  %v7525_v28 = vld [vmem:[#allocation14 + $0x144] sm:$0xf] }
0x10b0   :  { %3811 = vmatpush.bf16.msrb.mxu3 %v6848_v46  ;;  %v6771_v46 = vld [vmem:[#allocation14 + $0x148] sm:$0xf] }
0x10ba   :  { %2816 = vxpose.xlu2.b32.start.end [1/1] (short) (narrow) %v2814_v48, 8  ;;  %v7546_v48 = vld [vmem:[#allocation14 + $0x1ec] sm:$0xf] }
0x10f3   :  { %v2749_v39 = vpop.f32.mrf.mxu0 }
0x10f9   :  { %v2634_v11 = vpop.f32.mrf.mxu2 }
0x10fb   :  { %v2751_v56 = vpop.f32.mrf.mxu0 }
0x1101   :  { %v2636_v15 = vpop.f32.mrf.mxu2 }
0x1104   :  { %v3272_v49 = vpop.xlane.xlu2 %3271 }
0x1105   :  { %8090 = vrcp.f32 %v3272_v49  ;;  %v6853_v49 = vld [vmem:[#allocation14 + $0x1f8] sm:$0xf0] }
0x110b   :  { %v8091_v50 = vpop.eup %8090 }
0x110c   :  { %v3387_v51 = vpop.xlane.xlu0 %3386  ;;  %v3274_v63 = vmul.f32 %v8091_v50, %v8081_v21  ;;  %v6856_v50 = vor.u32 %v7546_v48, %v6853_v49  ;;  %v6768_v48 = vor.u32 %v7525_v28, %v6765_v45  ;;  %v7575_v45 = vld [vmem:[#allocation17 + $0x1d0] sm:$0xff] }
0x110d   :  { %8092 = vrcp.f32 %v3387_v51 }
0x110e   :  { %3276 = vxpose.xlu1.b32.start.end [1/1] (short) (narrow) %v3274_v63, 8 }
0x110f   :  { %v2979_v19 = vpop.f32.mrf.mxu0 }
0x1113   :  { %v8093_v7 = vpop.eup %8092 }
0x1114   :  { %v3389_v8 = vmul.f32 %v8093_v7, %v8083_v42  ;;  %v7547_v42 = vld [vmem:[#allocation14 + $0x1ec] sm:$0xf0] }
0x1115   :  { %v6844_v6 = vor.u32 %v7547_v42, %v6843_v22  ;;  %v6789_v22 = vld [vmem:[#allocation14 + $0x178] sm:$0xf0] }
0x1116   :  { %3391 = vxpose.xlu1.b32.start.end [1/1] (short) (narrow) %v3389_v8, 8  ;;  %v6827_v8 = vld [vmem:[#allocation14 + $0x1c0] sm:$0xf] }
0x1117   :  { %v2981_v14 = vpop.f32.mrf.mxu0 }
0x111e   :  { %3444 = vxpose.xlu1.b32.start [1/16] (narrow) %v2634_v11, 8  ;;  %v7543_v11 = vld [vmem:[#allocation14 + $0x1cc] sm:$0xf0] }
0x1126   :  { %3445 = vxpose.xlu1.b32.cont [2/16] (narrow) %v2636_v15, 8  ;;  %v7541_v15 = vld [vmem:[#allocation14 + $0x1c4] sm:$0xf] }
0x112e   :  { %3446 = vxpose.xlu1.b32.cont [3/16] (narrow) %v2749_v39, 8  ;;  %v6828_v39 = vor.u32 %v7543_v11, %v6827_v8  ;;  %v7523_v8 = vld [vmem:[#allocation14 + $0x12c] sm:$0xf0]  ;;  %v7521_v11 = vld [vmem:[#allocation14 + $0x124] sm:$0xf] }
0x1136   :  { %3447 = vxpose.xlu1.b32.cont [4/16] (narrow) %v2751_v56, 8  ;;  %v6829_v56 = vld [vmem:[#allocation14 + $0x1d0] sm:$0xf0] }
0x114a   :  { %v3062_v43 = vpop.trf.xlu1 }
0x114b   :  { %v3078_v57 = vpack.c.bf16 %v3062_v43, %v3062_v43  ;;  %v6835_v43 = vld [vmem:[#allocation14 + $0x1c8] sm:$0xf] }
0x114d   :  { %v3083_v26 = vsel %vm642_vm6, %v3078_v57, 0  ;;  %v7544_v57 = vld [vmem:[#allocation14 + $0x1d4] sm:$0xf0] }
0x1152   :  { %v3177_v5 = vpop.trf.xlu1 }
0x1153   :  { %v3193_v24 = vpack.c.bf16 %v3177_v5, %v3177_v5  ;;  %v2832_v25 = vpop.trf.xlu2  ;;  %v6832_v5 = vor.u32 %v7541_v15, %v6829_v56  ;;  %v6755_v56 = vld [vmem:[#allocation14 + $0x128] sm:$0xf] }
0x1154   :  { %v2848_v38 = vpack.c.bf16 %v2832_v25, %v2832_v25  ;;  %v7542_v25 = vld [vmem:[#allocation14 + $0x1cc] sm:$0xf] }
0x1155   :  { %v3198_v27 = vsel %vm642_vm6, %v3193_v24, 0  ;;  %v6836_v24 = vor.u32 %v7544_v57, %v6835_v43  ;;  %3812 = vmatpush.bf16.msrb.mxu3 %v6832_v5  ;;  %v7524_v43 = vld [vmem:[#allocation14 + $0x134] sm:$0xf0] }
0x1156   :  { %v2853_v40 = vsel %vm642_vm6, %v2848_v38, 0  ;;  %3207 = vmatpush.bf16.msra.mxu0 %v3198_v27  ;;  %v6837_v38 = vld [vmem:[#allocation14 + $0x1d8] sm:$0xf0]  ;;  %v6811_v27 = vld [vmem:[#allocation14 + $0x1a0] sm:$0xf]  ;;  %v6756_v5 = vor.u32 %v7524_v43, %v6755_v56  ;;  %v7565_v56 = vld [vmem:[#allocation17 + $0x180] sm:$0xff] }
0x1157   :  { %2862 = vmatpush.bf16.msrb.mxu2 %v2853_v40  ;;  %v7539_v40 = vld [vmem:[#allocation14 + $0x1ac] sm:$0xf0] }
0x1158   :  { %v7573_v43 = vld [vmem:[#allocation17 + $0x1c0] sm:$0xff] }
0x1159   :  { %6690 = vmatmul.msk.bf16.vlgmr.msra.gmra.mxu0 %vm593_vm5, %v3160_v32 }
0x115a   :  { %6684 = vmatmul.msk.bf16.vlgmr.msrb.gmra.mxu2 %vm593_vm5, %v2815_v4 }
0x115b   :  { %3092 = vmatpush.bf16.msra.mxu2 %v3083_v26  ;;  %v6840_v26 = vor.u32 %v7542_v25, %v6837_v38  ;;  %v6757_v25 = vld [vmem:[#allocation14 + $0x138] sm:$0xf0] }
0x116a   :  { %6688 = vmatmul.msk.bf16.vlgmr.msra.gmra.mxu2 %vm593_vm5, %v3045_v3 }
0x11b2   :  { %v3292_v61 = vpop.trf.xlu1 }
0x11b3   :  { %v3308_v13 = vpack.c.bf16 %v3292_v61, %v3292_v61  ;;  %v7537_v61 = vld [vmem:[#allocation14 + $0x1a4] sm:$0xf] }
0x11b5   :  { %v3313_v35 = vsel %vm642_vm6, %v3308_v13, 0  ;;  %v6812_v13 = vor.u32 %v7539_v40, %v6811_v27  ;;  %v7519_v27 = vld [vmem:[#allocation14 + $0x10c] sm:$0xf0]  ;;  %v7517_v40 = vld [vmem:[#allocation14 + $0x104] sm:$0xf] }
0x11b6   :  { %3322 = vmatpush.bf16.msrb.mxu2 %v3313_v35  ;;  %v6813_v35 = vld [vmem:[#allocation14 + $0x1b0] sm:$0xf0] }
0x11b9   :  { %6692 = vmatmul.msk.bf16.vlgmr.msrb.gmra.mxu2 %vm593_vm5, %v3275_v52  ;;  %v7516_v52 = vld [vmem:[#allocation11 + $0x78] sm:$0xff] }
0x11ba   :  { %v3407_v31 = vpop.trf.xlu1  ;;  %3547 = vmatpush.bf16.msra.mxu1 %v7516_v52  ;;  %3798 = vmatpush.bf16.msra.mxu2 %v6844_v6  ;;  %v6797_v52 = vld [vmem:[#allocation14 + $0x190] sm:$0xf0]  ;;  %v7527_v6 = vld [vmem:[#allocation14 + $0x14c] sm:$0xf0] }
0x11bb   :  { %v3423_v18 = vpack.c.bf16 %v3407_v31, %v3407_v31  ;;  %v6819_v31 = vld [vmem:[#allocation14 + $0x1a8] sm:$0xf]  ;;  %v6764_v29 = vor.u32 %v7527_v6, %v6763_v44 }
0x11bc   :  { %v7560_v44 = vld [vmem:[#allocation17 + $0x158] sm:$0xff] }
0x11bd   :  { %v3428_v62 = vsel %vm642_vm6, %v3423_v18, 0  ;;  %v7540_v18 = vld [vmem:[#allocation14 + $0x1b4] sm:$0xf0] }
0x11be   :  { %3437 = vmatpush.bf16.msrb.mxu0 %v3428_v62  ;;  %3548 = vmatpush.bf16.msra.mxu1 %v7515_v53  ;;  %v6816_v62 = vor.u32 %v7537_v61, %v6813_v35  ;;  %v6803_v53 = vld [vmem:[#allocation14 + $0x188] sm:$0xf] }
0x11bf   :  { %3799 = vmatpush.bf16.msra.mxu2 %v6828_v39  ;;  %v6749_v39 = vld [vmem:[#allocation14 + $0x130] sm:$0xf0]  ;;  %v6739_v35 = vld [vmem:[#allocation14 + $0x108] sm:$0xf] }
0x11c0   :  { %3813 = vmatpush.bf16.msrb.mxu3 %v6816_v62  ;;  %v6752_v57 = vor.u32 %v7521_v11, %v6749_v39  ;;  %v7574_v11 = vld [vmem:[#allocation17 + $0x1c8] sm:$0xff]  ;;  %v7559_v39 = vld [vmem:[#allocation17 + $0x150] sm:$0xff] }
0x11c1   :  { %6694 = vmatmul.msk.bf16.vlgmr.msrb.gmra.mxu0 %vm593_vm5, %v3390_v30 }
0x11c2   :  { %3549 = vmatpush.bf16.msra.mxu1 %v7514_v12  ;;  %3824 = vmatpush.bf16.msra.mxu0 %v6852_v47  ;;  %v7536_v12 = vld [vmem:[#allocation14 + $0x194] sm:$0xf0] }
0x11c3   :  { %3800 = vmatpush.bf16.msra.mxu2 %v6812_v13  ;;  %v7528_v47 = vld [vmem:[#allocation14 + $0x154] sm:$0xf0]  ;;  %v6733_v13 = vld [vmem:[#allocation14 + $0x110] sm:$0xf0] }
0x11c4   :  { %v6772_v49 = vor.u32 %v7528_v47, %v6771_v46  ;;  %v8013_v47 = vld [vmem:[%s9036_s7 + $0x1] ss:$0 sm:$0xff] }
0x11c6   :  { %3550 = vmatpush.bf16.msra.mxu1 %v7513_v58  ;;  %3825 = vmatpush.bf16.msra.mxu0 %v6836_v24  ;;  %v6804_v58 = vor.u32 %v7536_v12, %v6803_v53  ;;  %v7522_v24 = vld [vmem:[#allocation14 + $0x12c] sm:$0xf]  ;;  %v7571_v53 = vld [vmem:[#allocation17 + $0x1b0] sm:$0xff] }
0x11c7   :  { %v6760_v38 = vor.u32 %v7522_v24, %v6757_v25  ;;  %v7579_v12 = vld [vmem:[#allocation17 + $0x1f0] sm:$0xff]  ;;  %v7557_v24 = vld [vmem:[#allocation17 + $0x140] sm:$0xff]  ;;  %v3628_v25 = vld [vmem:[#allocation16 + $0x4] sm:$0xf] }
0x11ca   :  { %3551 = vmatpush.bf16.msra.mxu1 %v7512_v59  ;;  %v7534_v59 = vld [vmem:[#allocation14 + $0x18c] sm:$0xf] }
0x11ce   :  { %3552 = vmatpush.bf16.msra.mxu1 %v7511_v55 }
0x11d2   :  { %3553 = vmatpush.bf16.msra.mxu1 %v7510_v37  ;;  %v7531_v37 = vld [vmem:[#allocation14 + $0x16c] sm:$0xf0] }
0x11d6   :  { %v3209_v33 = vpop.f32.mrf.mxu0  ;;  %3554 = vmatpush.bf16.msra.mxu1 %v7509_v60  ;;  %v7529_v60 = vld [vmem:[#allocation14 + $0x164] sm:$0xf] }
0x11da   :  { %3837 = vmatpush.bf16.msrb.mxu1 %v6856_v50  ;;  %v7526_v50 = vld [vmem:[#allocation14 + $0x14c] sm:$0xf] }
0x11dd   :  { %v2864_v1 = vpop.f32.mrf.mxu2 }
0x11de   :  { %3448 = vxpose.xlu1.b32.cont [5/16] (narrow) %v2864_v1, 8  ;;  %v3211_v34 = vpop.f32.mrf.mxu0  ;;  %3838 = vmatpush.bf16.msrb.mxu1 %v6840_v26  ;;  %v6820_v1 = vor.u32 %v7540_v18, %v6819_v31  ;;  %v6731_v26 = vld [vmem:[#allocation14 + $0x100] sm:$0xf]  ;;  %v7520_v31 = vld [vmem:[#allocation14 + $0x114] sm:$0xf0]  ;;  %v6736_v18 = vor.u32 %v7517_v40, %v6733_v13 }
0x11df   :  { %v6732_v61 = vor.u32 %v7519_v27, %v6731_v26  ;;  %v6740_v62 = vor.u32 %v7520_v31, %v6739_v35  ;;  %v3633_v26 = vperm.slane %v3628_v25, 3  ;;  %v3630_v35 = vperm.slane %v3628_v25, 0 }
0x11e0   :  { %3826 = vmatpush.bf16.msra.mxu0 %v6820_v1  ;;  %v7518_v1 = vld [vmem:[#allocation14 + $0x10c] sm:$0xf]  ;;  %v3631_v31 = vperm.slane %v3628_v25, 1 }
0x11e4   :  { %3827 = vmatpush.bf16.msra.mxu0 %v6804_v58  ;;  %v7555_v58 = vld [vmem:[#allocation17 + $0x130] sm:$0xff] }
0x11e5   :  { %v2866_v4 = vpop.f32.mrf.mxu2 }
0x11e6   :  { %3449 = vxpose.xlu1.b32.cont [6/16] (narrow) %v2866_v4, 8  ;;  %v7538_v4 = vld [vmem:[#allocation14 + $0x1ac] sm:$0xf] }
0x11ed   :  { %v3094_v3 = vpop.f32.mrf.mxu2 }
0x11ee   :  { %3450 = vxpose.xlu1.b32.cont [7/16] (narrow) %v2979_v19, 8  ;;  %v6821_v19 = vld [vmem:[#allocation14 + $0x1b8] sm:$0xf0] }
0x11f5   :  { %v3096_v32 = vpop.f32.mrf.mxu2 }
0x11f6   :  { %3451 = vxpose.xlu1.b32.cont [8/16] (narrow) %v2981_v14, 8  ;;  %v6824_v14 = vor.u32 %v7538_v4, %v6821_v19  ;;  %v6741_v4 = vld [vmem:[#allocation14 + $0x118] sm:$0xf0] }
0x11f7   :  { %v6744_v19 = vor.u32 %v7518_v1, %v6741_v4 }
0x11f8   :  { %3839 = vmatpush.bf16.msrb.mxu1 %v6824_v14 }
0x11fe   :  { %3452 = vxpose.xlu1.b32.cont [9/16] (narrow) %v3094_v3, 8  ;;  %v6795_v3 = vld [vmem:[#allocation14 + $0x180] sm:$0xf] }
0x1206   :  { %3453 = vxpose.xlu1.b32.cont [10/16] (narrow) %v3096_v32, 8  ;;  %v7535_v32 = vld [vmem:[#allocation14 + $0x18c] sm:$0xf0] }
0x120e   :  { %3454 = vxpose.xlu1.b32.cont [11/16] (narrow) %v3209_v33, 8  ;;  %v7533_v33 = vld [vmem:[#allocation14 + $0x184] sm:$0xf] }
0x1216   :  { %3455 = vxpose.xlu1.b32.cont [12/16] (narrow) %v3211_v34, 8  ;;  %v6796_v34 = vor.u32 %v7535_v32, %v6795_v3  ;;  %v7572_v3 = vld [vmem:[#allocation17 + $0x1b8] sm:$0xff] }
0x1217   :  { %v7580_v32 = vld [vmem:[#allocation17 + $0x1f8] sm:$0xff] }
0x1218   :  { %3801 = vmatpush.bf16.msra.mxu2 %v6796_v34  ;;  %v7556_v34 = vld [vmem:[#allocation17 + $0x138] sm:$0xff] }
0x123c   :  { %v3324_v30 = vpop.f32.mrf.mxu2 }
0x123d   :  { %3456 = vxpose.xlu1.b32.cont [13/16] (narrow) %v3324_v30, 8  ;;  %v6800_v30 = vor.u32 %v7533_v33, %v6797_v52  ;;  %v7564_v52 = vld [vmem:[#allocation17 + $0x178] sm:$0xff] }
0x123e   :  { %v3439_v36 = vpop.f32.mrf.mxu0 }
0x123f   :  { %3814 = vmatpush.bf16.msrb.mxu3 %v6800_v30 }
0x1244   :  { %v3326_v54 = vpop.f32.mrf.mxu2 }
0x1245   :  { %3457 = vxpose.xlu1.b32.cont [14/16] (narrow) %v3326_v54, 8  ;;  %v6805_v54 = vld [vmem:[#allocation14 + $0x198] sm:$0xf0] }
0x1246   :  { %v3441_v9 = vpop.f32.mrf.mxu0  ;;  %v6808_v55 = vor.u32 %v7534_v59, %v6805_v54  ;;  %v7563_v59 = vld [vmem:[#allocation17 + $0x170] sm:$0xff]  ;;  %v7570_v54 = vld [vmem:[#allocation17 + $0x1a8] sm:$0xff] }
0x1248   :  { %3840 = vmatpush.bf16.msrb.mxu1 %v6808_v55  ;;  %v7578_v55 = vld [vmem:[#allocation17 + $0x1e8] sm:$0xff] }
0x124d   :  { %3458 = vxpose.xlu1.b32.cont [15/16] (narrow) %v3439_v36, 8  ;;  %v6779_v36 = vld [vmem:[#allocation14 + $0x160] sm:$0xf] }
0x1255   :  { %3459 = vxpose.xlu1.b32.end [16/16] (narrow) %v3441_v9, 8  ;;  %v6780_v9 = vor.u32 %v7531_v37, %v6779_v36  ;;  %v7554_v36 = vld [vmem:[#allocation17 + $0x128] sm:$0xff] }
0x1256   :  { %v7562_v37 = vld [vmem:[#allocation17 + $0x168] sm:$0xff] }
0x1257   :  { %3802 = vmatpush.bf16.msra.mxu2 %v6780_v9  ;;  %v7577_v9 = vld [vmem:[#allocation17 + $0x1e0] sm:$0xff] }
0x125b   :  { %3803 = vmatpush.bf16.msra.mxu2 %v6764_v29  ;;  %v7567_v29 = vld [vmem:[#allocation17 + $0x190] sm:$0xff] }
0x1281   :  { %v3460_v20 = vpop.trf.xlu1 }
0x1282   :  { %v3476_v23 = vpack.c.bf16 %v3460_v20, %v3460_v20  ;;  %v6781_v20 = vld [vmem:[#allocation14 + $0x170] sm:$0xf0] }
0x1284   :  { %3555 = vmatmul.bf16.vlgmr.msra.gmra.mxu1 %v3476_v23  ;;  %v6787_v23 = vld [vmem:[#allocation14 + $0x168] sm:$0xf] }
0x1301   :  { %v3556_v2 = vpop.f32.mrf.mxu1 }
0x1302   :  { %v3557_v21 = vadd.f32 %v8012_v0, %v3556_v2  ;;  %v7532_v0 = vld [vmem:[#allocation14 + $0x174] sm:$0xf0]  ;;  %v6784_v2 = vor.u32 %v7529_v60, %v6781_v20  ;;  %v7569_v60 = vld [vmem:[#allocation17 + $0x1a0] sm:$0xff] }
0x1304   :  { %v8847_v10 = vadd.f32 %v3557_v21, %v8727_v17  ;;  %v6788_v21 = vor.u32 %v7532_v0, %v6787_v23  ;;  %3815 = vmatpush.bf16.msrb.mxu3 %v6784_v2  ;;  %v7553_v23 = vld [vmem:[#allocation17 + $0x120] sm:$0xff] }
0x1305   :  { %v7561_v0 = vld [vmem:[#allocation17 + $0x160] sm:$0xff] }
0x1306   :  { %3565 = vadd.xlane.f32.xlu0 %v8847_v10  ;;  %3828 = vmatpush.bf16.msra.mxu0 %v6788_v21 }
0x1308   :  { %3816 = vmatpush.bf16.msrb.mxu3 %v6768_v48 }
0x1309   :  { %v3558_v41 = vpop.f32.mrf.mxu1 }
0x130a   :  { %v7530_v41 = vld [vmem:[#allocation14 + $0x16c] sm:$0xf]  ;;  %3829 = vmatpush.bf16.msra.mxu0 %v6772_v49 }
0x130b   :  { %v6792_v42 = vor.u32 %v7530_v41, %v6789_v22  ;;  %v7568_v41 = vld [vmem:[#allocation17 + $0x198] sm:$0xff] }
0x130c   :  { %3817 = vmatpush.bf16.msrb.mxu3 %v6752_v57  ;;  %v7576_v22 = vld [vmem:[#allocation17 + $0x1d8] sm:$0xff]  ;;  %v7558_v57 = vld [vmem:[#allocation17 + $0x148] sm:$0xff] }
0x130d   :  { %3841 = vmatpush.bf16.msrb.mxu1 %v6792_v42  ;;  %v7552_v42 = vld [vmem:[#allocation17 + $0x118] sm:$0xff] }
0x130e   :  { %3830 = vmatpush.bf16.msra.mxu0 %v6756_v5  ;;  %v7549_v5 = vld [vmem:[#allocation17 + $0x100] sm:$0xff] }
0x1310   :  { %3818 = vmatpush.bf16.msrb.mxu3 %v6736_v18 }
0x1312   :  { %3831 = vmatpush.bf16.msra.mxu0 %v6740_v62 }
0x1314   :  { %4133 = vmatpush.bf16.msra.mxu3 %v7564_v52 }
0x1316   :  { %4146 = vmatpush.bf16.msrb.mxu0 %v7572_v3 }
0x1318   :  { %4134 = vmatpush.bf16.msra.mxu3 %v7563_v59 }
0x131a   :  { %4147 = vmatpush.bf16.msrb.mxu0 %v7571_v53 }
0x131c   :  { %4135 = vmatpush.bf16.msra.mxu3 %v7562_v37 }
0x131e   :  { %4148 = vmatpush.bf16.msrb.mxu0 %v7570_v54 }
0x1320   :  { %4136 = vmatpush.bf16.msra.mxu3 %v7561_v0 }
0x1322   :  { %4149 = vmatpush.bf16.msrb.mxu0 %v7569_v60  ;;  %v8015_v60 = vld [vmem:[%s9041_s12 + $0x1] ss:$0 sm:$0xff] }
0x1324   :  { %4137 = vmatpush.bf16.msra.mxu3 %v7560_v44  ;;  %v7072_v44 = vld [vmem:[#allocation8 + $0x228] sm:$0xf] }
0x1326   :  { %4150 = vmatpush.bf16.msrb.mxu0 %v7568_v41 }
0x1328   :  { %4138 = vmatpush.bf16.msra.mxu3 %v7559_v39  ;;  %v7062_v39 = vld [vmem:[#allocation8 + $0x21c] sm:$0xf0] }
0x132a   :  { %4151 = vmatpush.bf16.msrb.mxu0 %v7567_v29 }
0x132c   :  { %4139 = vmatpush.bf16.msra.mxu3 %v7558_v57 }
0x1330   :  { %4140 = vmatpush.bf16.msra.mxu3 %v7557_v24  ;;  %v7597_v24 = vld [vmem:[#allocation8 + $0x200] sm:$0xf0] }
0x1379   :  { %v3566_v17 = vpop.xlane.xlu0 %3565 }
0x137a   :  { %v3567_v51 = vmul.f32 %v3566_v17, %v8551_v16  ;;  %v6773_v17 = vld [vmem:[#allocation14 + $0x158] sm:$0xf0] }
0x137c   :  { %v8852_v63 = vsub.f32 %v8847_v10, %v3567_v51  ;;  %v6776_v51 = vor.u32 %v7526_v50, %v6773_v17  ;;  %v8014_v50 = vld [vmem:[#allocation13 + $0x1] ss:$0 sm:$0xff] }
0x137e   :  { %v3569_v7 = vmul.f32 %v8852_v63, %v8852_v63  ;;  %3842 = vmatpush.bf16.msrb.mxu1 %v6776_v51 }
0x1380   :  { %3570 = vadd.xlane.f32.xlu0 %v3569_v7  ;;  %v6747_v7 = vld [vmem:[#allocation14 + $0x120] sm:$0xf] }
0x1381   :  { %v6748_v15 = vor.u32 %v7523_v8, %v6747_v7  ;;  %v7566_v8 = vld [vmem:[#allocation17 + $0x188] sm:$0xff] }
0x1382   :  { %3843 = vmatpush.bf16.msrb.mxu1 %v6760_v38  ;;  %4152 = vmatpush.bf16.msrb.mxu0 %v7566_v8  ;;  %v3632_v38 = vperm.slane %v3628_v25, 2  ;;  %v7600_v8 = vld [vmem:[#allocation8 + $0x218] sm:$0xf0] }
0x1383   :  { %3804 = vmatpush.bf16.msra.mxu2 %v6748_v15  ;;  %v7551_v15 = vld [vmem:[#allocation17 + $0x110] sm:$0xff]  ;;  %v7596_v25 = vld [vmem:[#allocation8 + $0x1fc] sm:$0xf] }
0x1386   :  { %3844 = vmatpush.bf16.msrb.mxu1 %v6744_v19  ;;  %4153 = vmatpush.bf16.msrb.mxu0 %v7565_v56  ;;  %v7068_v56 = vld [vmem:[#allocation8 + $0x218] sm:$0xf] }
0x1387   :  { %3805 = vmatpush.bf16.msra.mxu2 %v6732_v61 }
0x138a   :  { %4159 = vmatpush.bf16.msra.mxu1 %v7580_v32 }
0x138b   :  { %4120 = vmatpush.bf16.msrb.mxu2 %v7556_v34 }
0x138e   :  { %4160 = vmatpush.bf16.msra.mxu1 %v7579_v12 }
0x138f   :  { %4121 = vmatpush.bf16.msrb.mxu2 %v7555_v58 }
0x1392   :  { %4161 = vmatpush.bf16.msra.mxu1 %v7578_v55 }
0x1393   :  { %4122 = vmatpush.bf16.msrb.mxu2 %v7554_v36 }
0x1396   :  { %4162 = vmatpush.bf16.msra.mxu1 %v7577_v9 }
0x1397   :  { %4123 = vmatpush.bf16.msrb.mxu2 %v7553_v23 }
0x139a   :  { %4163 = vmatpush.bf16.msra.mxu1 %v7576_v22 }
0x139b   :  { %4124 = vmatpush.bf16.msrb.mxu2 %v7552_v42 }
0x139e   :  { %4164 = vmatpush.bf16.msra.mxu1 %v7575_v45  ;;  %v7074_v45 = vld [vmem:[#allocation8 + $0x234] sm:$0xf0] }
0x139f   :  { %4125 = vmatpush.bf16.msrb.mxu2 %v7551_v15 }
0x13a2   :  { %4165 = vmatpush.bf16.msra.mxu1 %v7574_v11  ;;  %v7599_v11 = vld [vmem:[#allocation8 + $0x214] sm:$0xf] }
0x13a6   :  { %4166 = vmatpush.bf16.msra.mxu1 %v7573_v43  ;;  %v7601_v43 = vld [vmem:[#allocation8 + $0x220] sm:$0xf0] }
0x13a7   :  { %v7069_v57 = vor.u32 %v7601_v43, %v7068_v56 }
0x13f3   :  { %v3571_v14 = vpop.xlane.xlu0 %3570 }
0x13f4   :  { %v3572_v33 = vmul.f32 %v3571_v14, %v8551_v16 }
0x13f6   :  { %v3573_v30 = vadd.f32 1e-05, %v3572_v33 }
0x13f8   :  { %8094 = vrsqrt.f32 %v3573_v30  ;;  %vm3580_vm14 = vweird.f32 %v3573_v30 }
0x13fe   :  { %v8095_v20 = vpop.eup %8094 }
0x13ff   :  { %v3575_v2 = vmul.f32 %v8095_v20, %v3573_v30  ;;  %vm3581_vm13 = vweird.f32 %v8095_v20 }
0x1400   :  { %vm3582_vm15 = vmor %vm3580_vm14, %vm3581_vm13 }
0x1401   :  { %v3576_v21 = vmul.f32 %v8095_v20, %v3575_v2 }
0x1403   :  { %v3577_v6 = vmul.f32 0.5, %v3576_v21 }
0x1405   :  { %v3578_v28 = vsub.f32 1.5, %v3577_v6  ;;  %v7603_v6 = vld [vmem:[#allocation8 + $0x230] sm:$0xf0] }
0x1406   :  { %v7073_v29 = vor.u32 %v7603_v6, %v7072_v44  ;;  %v7002_v44 = vld [vmem:[#allocation8 + $0x1a4] sm:$0xf0]  ;;  %v7008_v6 = vld [vmem:[#allocation8 + $0x1a0] sm:$0xf] }
0x1407   :  { %v3579_v46 = vmul.f32 %v8095_v20, %v3578_v28  ;;  %v7602_v28 = vld [vmem:[#allocation8 + $0x22c] sm:$0xf] }
0x1409   :  { %v3583_v48 = vsel %vm3582_vm15, %v8095_v20, %v3579_v46  ;;  %v7080_v46 = vld [vmem:[#allocation8 + $0x230] sm:$0xf] }
0x140a   :  { %v3584_v49 = vmul.f32 %v3583_v48, %v8852_v63  ;;  %v7550_v63 = vld [vmem:[#allocation17 + $0x108] sm:$0xff]  ;;  %v7077_v48 = vor.u32 %v7602_v28, %v7074_v45  ;;  %v7586_v28 = vld [vmem:[#allocation8 + $0x1a8] sm:$0xf0] }
0x140b   :  { %4126 = vmatpush.bf16.msrb.mxu2 %v7550_v63  ;;  %v7065_v63 = vor.u32 %v7599_v11, %v7062_v39  ;;  %v7009_v45 = vor.u32 %v7586_v28, %v7008_v6 }
0x140c   :  { %v3588_v17 = vmul.f32 %v8013_v47, %v3584_v49  ;;  %v7604_v47 = vld [vmem:[#allocation8 + $0x238] sm:$0xf0] }
0x140d   :  { %v7081_v49 = vor.u32 %v7604_v47, %v7080_v46  ;;  %v6988_v46 = vld [vmem:[#allocation8 + $0x180] sm:$0xf]  ;;  %v7582_v47 = vld [vmem:[#allocation8 + $0x188] sm:$0xf0] }
0x140e   :  { %v3592_v51 = vadd.f32 %v8014_v50, %v3588_v17 }
0x140f   :  { %4127 = vmatpush.bf16.msrb.mxu2 %v7549_v5  ;;  %v7048_v5 = vld [vmem:[#allocation8 + $0x1f8] sm:$0xf] }
0x1410   :  { %v3593_v7 = vpack.c.bf16 %v3592_v51, %v3592_v51 }
0x1412   :  { %3806 = vmatmul.bf16.vlgmr.msra.gmra.mxu2 %v3593_v7  ;;  %3819 = vmatmul.bf16.vlgmr.msrb.gmra.mxu3 %v3593_v7 }
0x1413   :  { %3832 = vmatmul.bf16.vlgmr.msra.gmra.mxu0 %v3593_v7  ;;  %3845 = vmatmul.bf16.vlgmr.msrb.gmra.mxu1 %v3593_v7  ;;  %v7060_v7 = vld [vmem:[#allocation8 + $0x210] sm:$0xf] }
0x1414   :  { %4376 = vmatpush.bf16.msra.mxu2 %v7073_v29  ;;  %4389 = vmatpush.bf16.msrb.mxu3 %v7077_v48  ;;  %v7061_v15 = vor.u32 %v7600_v8, %v7060_v7  ;;  %v7581_v48 = vld [vmem:[#allocation8 + $0x184] sm:$0xf] }
0x1415   :  { %4402 = vmatpush.bf16.msra.mxu0 %v7081_v49  ;;  %v6989_v49 = vor.u32 %v7582_v47, %v6988_v46 }
0x1418   :  { %4377 = vmatpush.bf16.msra.mxu2 %v7061_v15  ;;  %4390 = vmatpush.bf16.msrb.mxu3 %v7065_v63 }
0x1419   :  { %4403 = vmatpush.bf16.msra.mxu0 %v7069_v57 }
0x1490   :  { %v3833_v27 = vpop.f32.mrf.mxu0  ;;  %v3846_v40 = vpop.f32.mrf.mxu1 }
0x1491   :  { %v3834_v61 = vadd.f32 %v3833_v27, %v3632_v38  ;;  %v3847_v13 = vadd.f32 %v3846_v40, %v3633_v26  ;;  %v7049_v38 = vor.u32 %v7597_v24, %v7048_v5  ;;  %v7050_v26 = vld [vmem:[#allocation8 + $0x204] sm:$0xf0]  ;;  %v7056_v27 = vld [vmem:[#allocation8 + $0x200] sm:$0xf]  ;;  %v7598_v40 = vld [vmem:[#allocation8 + $0x208] sm:$0xf0] }
0x1493   :  { %v3852_v18 = vmax.f32 %v3834_v61, 0.0  ;;  %v3853_v62 = vmax.f32 %v3847_v13, 0.0  ;;  %v7053_v61 = vor.u32 %v7596_v25, %v7050_v26  ;;  %v7057_v13 = vor.u32 %v7598_v40, %v7056_v27  ;;  %4378 = vmatpush.bf16.msra.mxu2 %v7049_v38  ;;  %v8016_v25 = vld [vmem:[#allocation5 + $0x2] ss:$0 sm:$0xff]  ;;  %v8017_v27 = vld [vmem:[#allocation7 + $0x2] ss:$0 sm:$0xff] }
0x1495   :  { %v3856_v1 = vpack.c.bf16 %v3852_v18, %v3852_v18  ;;  %v3857_v4 = vpack.c.bf16 %v3853_v62, %v3853_v62  ;;  %v3807_v19 = vpop.f32.mrf.mxu2  ;;  %v3820_v14 = vpop.f32.mrf.mxu3  ;;  %4391 = vmatpush.bf16.msrb.mxu3 %v7053_v61  ;;  %4404 = vmatpush.bf16.msra.mxu0 %v7057_v13  ;;  %v7593_v18 = vld [vmem:[#allocation8 + $0x1e4] sm:$0xf] }
0x1496   :  { %v3808_v3 = vadd.f32 %v3807_v19, %v3630_v35  ;;  %v3821_v32 = vadd.f32 %v3820_v14, %v3631_v31  ;;  %v7036_v35 = vld [vmem:[#allocation8 + $0x1e0] sm:$0xf]  ;;  %v7594_v31 = vld [vmem:[#allocation8 + $0x1e8] sm:$0xf0]  ;;  %v7595_v19 = vld [vmem:[#allocation8 + $0x1f0] sm:$0xf0] }
0x1497   :  { %4154 = vmatmul.bf16.vlgmr.msrb.gmra.mxu0 %v3856_v1  ;;  %4167 = vmatmul.bf16.vlgmr.msra.gmra.mxu1 %v3857_v4  ;;  %v7037_v62 = vor.u32 %v7594_v31, %v7036_v35  ;;  %v7038_v1 = vld [vmem:[#allocation8 + $0x1ec] sm:$0xf0]  ;;  %v7044_v4 = vld [vmem:[#allocation8 + $0x1e8] sm:$0xf] }
0x1498   :  { %v3850_v33 = vmax.f32 %v3808_v3, 0.0  ;;  %v3851_v34 = vmax.f32 %v3821_v32, 0.0  ;;  %v3835_v52 = vpop.f32.mrf.mxu0  ;;  %v3848_v53 = vpop.f32.mrf.mxu1  ;;  %v7041_v14 = vor.u32 %v7593_v18, %v7038_v1  ;;  %v7045_v3 = vor.u32 %v7595_v19, %v7044_v4  ;;  %v7024_v32 = vld [vmem:[#allocation8 + $0x1c8] sm:$0xf] }
0x1499   :  { %4379 = vmatpush.bf16.msra.mxu2 %v7037_v62  ;;  %v7026_v53 = vld [vmem:[#allocation8 + $0x1d4] sm:$0xf0]  ;;  %v4240_v35 = vld [vmem:[#allocation10 + $0x6] sm:$0x7] }
0x149a   :  { %v3854_v12 = vpack.c.bf16 %v3850_v33, %v3850_v33  ;;  %v3855_v30 = vpack.c.bf16 %v3851_v34, %v3851_v34  ;;  %4392 = vmatpush.bf16.msrb.mxu3 %v7041_v14  ;;  %4405 = vmatpush.bf16.msra.mxu0 %v7045_v3  ;;  %v7591_v33 = vld [vmem:[#allocation8 + $0x1d0] sm:$0xf0]  ;;  %v7590_v34 = vld [vmem:[#allocation8 + $0x1cc] sm:$0xf]  ;;  %v4244_v31 = vperm.slane %v4240_v35, 2  ;;  %v4242_v1 = vperm.slane %v4240_v35, 0 }
0x149b   :  { %v7025_v52 = vor.u32 %v7591_v33, %v7024_v32  ;;  %v4243_v4 = vperm.slane %v4240_v35, 1 }
0x149c   :  { %4128 = vmatmul.bf16.vlgmr.msrb.gmra.mxu2 %v3854_v12  ;;  %4141 = vmatmul.bf16.vlgmr.msra.gmra.mxu3 %v3855_v30  ;;  %v7032_v12 = vld [vmem:[#allocation8 + $0x1d0] sm:$0xf]  ;;  %v7592_v30 = vld [vmem:[#allocation8 + $0x1d8] sm:$0xf0] }
0x149d   :  { %v3809_v58 = vpop.f32.mrf.mxu2  ;;  %v3822_v59 = vpop.f32.mrf.mxu3  ;;  %4380 = vmatpush.bf16.msra.mxu2 %v7025_v52 }
0x149e   :  { %v7029_v58 = vor.u32 %v7590_v34, %v7026_v53  ;;  %v7033_v59 = vor.u32 %v7592_v30, %v7032_v12 }
0x14a0   :  { %4393 = vmatpush.bf16.msrb.mxu3 %v7029_v58  ;;  %4406 = vmatpush.bf16.msra.mxu0 %v7033_v59 }
0x1514   :  { %v4155_v54 = vpop.f32.mrf.mxu0  ;;  %v4168_v55 = vpop.f32.mrf.mxu1 }
0x151c   :  { %v4157_v36 = vpop.f32.mrf.mxu0  ;;  %v4170_v37 = vpop.f32.mrf.mxu1 }
0x151d   :  { %v7587_v36 = vld [vmem:[#allocation8 + $0x1b4] sm:$0xf] }
0x151f   :  { %v4129_v9 = vpop.f32.mrf.mxu2  ;;  %v4142_v20 = vpop.f32.mrf.mxu3 }
0x1520   :  { %v4130_v23 = vadd.f32 %v8015_v60, %v4129_v9  ;;  %v7014_v60 = vld [vmem:[#allocation8 + $0x1bc] sm:$0xf0]  ;;  %v7020_v9 = vld [vmem:[#allocation8 + $0x1b8] sm:$0xf] }
0x1522   :  { %v4143_v0 = vadd.f32 %v4142_v20, %v4130_v23  ;;  %v7589_v20 = vld [vmem:[#allocation8 + $0x1c0] sm:$0xf0]  ;;  %v7017_v23 = vor.u32 %v7587_v36, %v7014_v60 }
0x1524   :  { %v4156_v2 = vadd.f32 %v4155_v54, %v4143_v0  ;;  %v7012_v54 = vld [vmem:[#allocation8 + $0x1b0] sm:$0xf]  ;;  %v7021_v0 = vor.u32 %v7589_v20, %v7020_v9  ;;  %4394 = vmatpush.bf16.msrb.mxu3 %v7017_v23 }
0x1526   :  { %v4169_v21 = vadd.f32 %v4168_v55, %v4156_v2  ;;  %v7588_v55 = vld [vmem:[#allocation8 + $0x1b8] sm:$0xf0]  ;;  %4407 = vmatpush.bf16.msra.mxu0 %v7021_v0  ;;  %v7000_v2 = vld [vmem:[#allocation8 + $0x198] sm:$0xf] }
0x1527   :  { %v4131_v41 = vpop.f32.mrf.mxu2  ;;  %v4144_v22 = vpop.f32.mrf.mxu3  ;;  %v7013_v37 = vor.u32 %v7588_v55, %v7012_v54 }
0x1528   :  { %v8865_v42 = vadd.f32 %v4169_v21, %v8847_v10  ;;  %v7585_v21 = vld [vmem:[#allocation8 + $0x1a0] sm:$0xf0]  ;;  %v7584_v41 = vld [vmem:[#allocation8 + $0x19c] sm:$0xf] }
0x1529   :  { %4381 = vmatpush.bf16.msra.mxu2 %v7013_v37  ;;  %v7001_v22 = vor.u32 %v7585_v21, %v7000_v2  ;;  %v7005_v29 = vor.u32 %v7584_v41, %v7002_v44 }
0x152a   :  { %4177 = vadd.xlane.f32.xlu0 %v8865_v42  ;;  %4408 = vmatpush.bf16.msra.mxu0 %v7009_v45 }
0x152b   :  { %4395 = vmatpush.bf16.msrb.mxu3 %v7005_v29 }
0x152d   :  { %4382 = vmatpush.bf16.msra.mxu2 %v7001_v22 }
0x1531   :  { %4383 = vmatpush.bf16.msra.mxu2 %v6989_v49 }
0x159d   :  { %v4178_v50 = vpop.xlane.xlu0 %4177 }
0x159e   :  { %v4179_v17 = vmul.f32 %v4178_v50, %v8551_v16  ;;  %v6990_v50 = vld [vmem:[#allocation8 + $0x18c] sm:$0xf0] }
0x159f   :  { %v6993_v7 = vor.u32 %v7581_v48, %v6990_v50 }
0x15a0   :  { %v8870_v10 = vsub.f32 %v8865_v42, %v4179_v17  ;;  %v6996_v17 = vld [vmem:[#allocation8 + $0x188] sm:$0xf] }
0x15a1   :  { %4396 = vmatpush.bf16.msrb.mxu3 %v6993_v7 }
0x15a2   :  { %v4181_v51 = vmul.f32 %v8870_v10, %v8870_v10 }
0x15a4   :  { %4182 = vadd.xlane.f32.xlu2 %v4181_v51  ;;  %v7583_v51 = vld [vmem:[#allocation8 + $0x190] sm:$0xf0] }
0x15a5   :  { %v6997_v8 = vor.u32 %v7583_v51, %v6996_v17 }
0x15a7   :  { %4409 = vmatpush.bf16.msra.mxu0 %v6997_v8 }
0x1617   :  { %v4183_v11 = vpop.xlane.xlu2 %4182 }
0x1618   :  { %v4184_v15 = vmul.f32 %v4183_v11, %v8551_v16 }
0x161a   :  { %v4185_v39 = vadd.f32 1e-05, %v4184_v15 }
0x161c   :  { %8096 = vrsqrt.f32 %v4185_v39  ;;  %vm4192_vm1 = vweird.f32 %v4185_v39 }
0x1622   :  { %v8097_v56 = vpop.eup %8096 }
0x1623   :  { %v4187_v43 = vmul.f32 %v8097_v56, %v4185_v39  ;;  %vm4193_vm0 = vweird.f32 %v8097_v56 }
0x1624   :  { %vm4194_vm2 = vmor %vm4192_vm1, %vm4193_vm0 }
0x1625   :  { %v4188_v63 = vmul.f32 %v8097_v56, %v4187_v43 }
0x1627   :  { %v4189_v57 = vmul.f32 0.5, %v4188_v63 }
0x1629   :  { %v4190_v5 = vsub.f32 1.5, %v4189_v57 }
0x162b   :  { %v4191_v24 = vmul.f32 %v8097_v56, %v4190_v5 }
0x162d   :  { %v4195_v38 = vsel %vm4194_vm2, %v8097_v56, %v4191_v24 }
0x162e   :  { %v4196_v26 = vmul.f32 %v4195_v38, %v8870_v10 }
0x1630   :  { %v4200_v40 = vmul.f32 %v8016_v25, %v4196_v26 }
0x1632   :  { %v4204_v61 = vadd.f32 %v8017_v27, %v4200_v40 }
0x1634   :  { %v4205_v13 = vpack.c.bf16 %v4204_v61, %v4204_v61 }
0x1636   :  { %4384 = vmatmul.bf16.vlgmr.msra.gmra.mxu2 %v4205_v13  ;;  %4397 = vmatmul.bf16.vlgmr.msrb.gmra.mxu3 %v4205_v13 }
0x1637   :  { %4410 = vmatmul.bf16.vlgmr.msra.gmra.mxu0 %v4205_v13 }
0x16b4   :  { %v4411_v18 = vpop.f32.mrf.mxu0 }
0x16b5   :  { %v4412_v62 = vadd.f32 %v4411_v18, %v4244_v31 }
0x16b7   :  { %4479 = vxpose.xlu0.b32.start.end [1/1] (short) %v4412_v62, 128 }
0x16b9   :  { %v4385_v19 = vpop.f32.mrf.mxu2  ;;  %v4398_v14 = vpop.f32.mrf.mxu3 }
0x16ba   :  { %v4386_v3 = vadd.f32 %v4385_v19, %v4242_v1  ;;  %v4399_v32 = vadd.f32 %v4398_v14, %v4243_v4 }
0x16bc   :  { %v7879_v33 = vpack.i.bf16 %v4399_v32, %v4386_v3  ;;  %v4413_v10 = vpop.f32.mrf.mxu0 }
0x16c1   :  { %v4387_v34 = vpop.f32.mrf.mxu2  ;;  %v4400_v52 = vpop.f32.mrf.mxu3 }
0x1737   :  { %7880 = vxpose.xlu0.b32.start.end [1/1] (short) %v7879_v33, 128 }
0x175b   :  { %v8876_v53 = vpop.trf.xlu0 }
0x1763   :  { %v8878_v12 = vpop.trf.xlu0 }
0x1764   :  { %v4572_v30 = vpack.c.bf16 %v8878_v12, %v8876_v53 }
0x176b   :  { %v8882_v58 = vpop.trf.xlu0 }
0x1773   :  { %v8884_v59 = vpop.trf.xlu0 }
0x1774   :  { %v4687_v54 = vpack.c.bf16 %v8884_v59, %v8882_v58 }
0x177b   :  { %v8888_v55 = vpop.trf.xlu0 }
0x1783   :  { %v8890_v36 = vpop.trf.xlu0 }
0x1784   :  { %v4802_v37 = vpack.c.bf16 %v8890_v36, %v8888_v55 }
0x178b   :  { %v8894_v60 = vpop.trf.xlu0 }
0x1793   :  { %v8896_v9 = vpop.trf.xlu0 }
0x1794   :  { %v4917_v20 = vpack.c.bf16 %v8896_v9, %v8894_v60 }
0x179b   :  { %v8900_v23 = vpop.trf.xlu0 }
0x17a3   :  { %v8902_v0 = vpop.trf.xlu0 }
0x17a4   :  { %v5032_v2 = vpack.c.bf16 %v8902_v0, %v8900_v23 }
0x17ab   :  { %v8906_v21 = vpop.trf.xlu0 }
0x17b3   :  { %v8908_v41 = vpop.trf.xlu0 }
0x17b4   :  { %v5147_v22 = vpack.c.bf16 %v8908_v41, %v8906_v21 }
0x17bb   :  { %v8912_v44 = vpop.trf.xlu0 }
0x17c3   :  { %v8914_v6 = vpop.trf.xlu0 }
0x17c4   :  { %v5262_v28 = vpack.c.bf16 %v8914_v6, %v8912_v44  ;;  %v7611_v44 = vld [vmem:[#allocation11 + $0xb0] sm:$0xff]  ;;  %v7610_v6 = vld [vmem:[#allocation11 + $0xa8] sm:$0xff] }
0x17cb   :  { %v8918_v29 = vpop.trf.xlu0 }
0x17d3   :  { %v8920_v45 = vpop.trf.xlu0 }
0x17d4   :  { %v5377_v46 = vpack.c.bf16 %v8920_v45, %v8918_v29  ;;  %v7608_v29 = vld [vmem:[#allocation11 + $0x98] sm:$0xff] }
0x17db   :  { %v7881_v47 = vpop.trf.xlu0 }
0x17dc   :  { %v7885_v49 = vunpack.i.h.bf16 %v7881_v47  ;;  %v7882_v7 = vunpack.i.l.bf16 %v7881_v47 }
0x17e3   :  { %v7886_v48 = vpop.trf.xlu0 }
0x17e4   :  { %v7890_v50 = vunpack.i.h.bf16 %v7886_v48  ;;  %v7887_v15 = vunpack.i.l.bf16 %v7886_v48 }
0x17e6   :  { %v4544_v17 = vpack.c.bf16 %v7890_v50, %v7885_v49 }
0x17e8   :  { %4555 = vmatpush.bf16.msrb.mxu1 %v4544_v17 }
0x17eb   :  { %v7891_v51 = vpop.trf.xlu0 }
0x17ec   :  { %v7892_v8 = vunpack.i.l.bf16 %v7891_v51  ;;  %v7895_v39 = vunpack.i.h.bf16 %v7891_v51 }
0x17ee   :  { %v7961_v11 = vpack.i.bf16 %v7892_v8, %v7882_v7 }
0x17f0   :  { %7962 = vxpose.xlu1.b32.start [1/2] (short) (narrow) %v7961_v11, 8 }
0x17f3   :  { %v7896_v56 = vpop.trf.xlu0 }
0x17f4   :  { %v7900_v43 = vunpack.i.h.bf16 %v7896_v56  ;;  %v7897_v63 = vunpack.i.l.bf16 %v7896_v56 }
0x17f6   :  { %v4659_v57 = vpack.c.bf16 %v7900_v43, %v7895_v39  ;;  %v7963_v5 = vpack.i.bf16 %v7897_v63, %v7887_v15 }
0x17f8   :  { %4670 = vmatpush.bf16.msra.mxu3 %v4659_v57  ;;  %7964 = vxpose.xlu1.b32.end [2/2] (short) (narrow) %v7963_v5, 8 }
0x17fb   :  { %v7901_v24 = vpop.trf.xlu0 }
0x17fc   :  { %v7905_v38 = vunpack.i.h.bf16 %v7901_v24  ;;  %v7902_v61 = vunpack.i.l.bf16 %v7901_v24 }
0x1803   :  { %v7906_v25 = vpop.trf.xlu0 }
0x1804   :  { %v7910_v26 = vunpack.i.h.bf16 %v7906_v25  ;;  %v7907_v31 = vunpack.i.l.bf16 %v7906_v25 }
0x1806   :  { %v4774_v27 = vpack.c.bf16 %v7910_v26, %v7905_v38 }
0x1808   :  { %4785 = vmatpush.bf16.msra.mxu1 %v4774_v27 }
0x180b   :  { %v7911_v40 = vpop.trf.xlu0 }
0x180c   :  { %v7912_v13 = vunpack.i.l.bf16 %v7911_v40  ;;  %v7915_v18 = vunpack.i.h.bf16 %v7911_v40 }
0x180e   :  { %v7970_v35 = vpack.i.bf16 %v7912_v13, %v7902_v61 }
0x1810   :  { %7971 = vxpose.xlu1.b32.start [1/2] (short) (narrow) %v7970_v35, 8 }
0x1813   :  { %v7916_v62 = vpop.trf.xlu0 }
0x1814   :  { %v7920_v1 = vunpack.i.h.bf16 %v7916_v62  ;;  %v7917_v4 = vunpack.i.l.bf16 %v7916_v62 }
0x1816   :  { %v4889_v19 = vpack.c.bf16 %v7920_v1, %v7915_v18  ;;  %v7972_v14 = vpack.i.bf16 %v7917_v4, %v7907_v31 }
0x1818   :  { %4900 = vmatpush.bf16.msrb.mxu3 %v4889_v19  ;;  %7973 = vxpose.xlu1.b32.end [2/2] (short) (narrow) %v7972_v14, 8 }
0x181b   :  { %v7921_v3 = vpop.trf.xlu0 }
0x181c   :  { %v7925_v32 = vunpack.i.h.bf16 %v7921_v3  ;;  %v7922_v47 = vunpack.i.l.bf16 %v7921_v3 }
0x1823   :  { %v7926_v33 = vpop.trf.xlu0 }
0x1824   :  { %v7930_v10 = vunpack.i.h.bf16 %v7926_v33  ;;  %v7927_v17 = vunpack.i.l.bf16 %v7926_v33 }
0x1826   :  { %v5004_v34 = vpack.c.bf16 %v7930_v10, %v7925_v32 }
0x182b   :  { %v7931_v52 = vpop.trf.xlu0 }
0x182c   :  { %v7932_v48 = vunpack.i.l.bf16 %v7931_v52  ;;  %v7935_v50 = vunpack.i.h.bf16 %v7931_v52 }
0x182e   :  { %v7979_v49 = vpack.i.bf16 %v7932_v48, %v7922_v47 }
0x1830   :  { %7980 = vxpose.xlu1.b32.start [1/2] (short) (narrow) %v7979_v49, 8 }
0x1833   :  { %v7936_v51 = vpop.trf.xlu0 }
0x1834   :  { %v7940_v7 = vunpack.i.h.bf16 %v7936_v51  ;;  %v7937_v8 = vunpack.i.l.bf16 %v7936_v51 }
0x1836   :  { %v7981_v11 = vpack.i.bf16 %v7937_v8, %v7927_v17  ;;  %v5119_v15 = vpack.c.bf16 %v7940_v7, %v7935_v50 }
0x1838   :  { %7982 = vxpose.xlu1.b32.end [2/2] (short) (narrow) %v7981_v11, 8 }
0x183b   :  { %v7941_v39 = vpop.trf.xlu0 }
0x183c   :  { %v7942_v43 = vunpack.i.l.bf16 %v7941_v39  ;;  %v7945_v26 = vunpack.i.h.bf16 %v7941_v39 }
0x1843   :  { %v7946_v56 = vpop.trf.xlu0 }
0x1844   :  { %v7947_v24 = vunpack.i.l.bf16 %v7946_v56  ;;  %v7950_v27 = vunpack.i.h.bf16 %v7946_v56 }
0x1846   :  { %v5234_v61 = vpack.c.bf16 %v7950_v27, %v7945_v26 }
0x184b   :  { %v7951_v63 = vpop.trf.xlu0 }
0x184c   :  { %v7952_v57 = vunpack.i.l.bf16 %v7951_v63  ;;  %v7955_v1 = vunpack.i.h.bf16 %v7951_v63 }
0x184e   :  { %v7988_v5 = vpack.i.bf16 %v7952_v57, %v7942_v43 }
0x1850   :  { %7989 = vxpose.xlu2.b32.start [1/2] (short) (narrow) %v7988_v5, 8 }
0x1853   :  { %v7956_v25 = vpop.trf.xlu0 }
0x1854   :  { %v7957_v38 = vunpack.i.l.bf16 %v7956_v25  ;;  %v7960_v4 = vunpack.i.h.bf16 %v7956_v25 }
0x1856   :  { %v7990_v40 = vpack.i.bf16 %v7957_v38, %v7947_v24  ;;  %v5349_v10 = vpack.c.bf16 %v7960_v4, %v7955_v1 }
0x1858   :  { %7991 = vxpose.xlu2.b32.end [2/2] (short) (narrow) %v7990_v40, 8 }
0x1894   :  { %v7965_v13 = vpop.trf.xlu1 }
0x1895   :  { %v7969_v35 = vunpack.i.h.bf16 %v7965_v13  ;;  %v7966_v31 = vunpack.i.l.bf16 %v7965_v13 }
0x1897   :  { %v4658_v18 = vpack.c.bf16 %v7969_v35, %v7969_v35  ;;  %v4543_v62 = vpack.c.bf16 %v7966_v31, %v7966_v31 }
0x1899   :  { %7082 = vmatmul.msk.bf16.vlgmr.msrb.gmra.mxu1 %vm576_vm4, %v4543_v62  ;;  %7084 = vmatmul.msk.bf16.vlgmr.msra.gmra.mxu3 %vm576_vm4, %v4658_v18 }
0x189a   :  { %5015 = vmatpush.bf16.msrb.mxu1 %v5004_v34  ;;  %5130 = vmatpush.bf16.msra.mxu3 %v5119_v15 }
0x18b4   :  { %v7974_v19 = vpop.trf.xlu1 }
0x18b5   :  { %v7978_v14 = vunpack.i.h.bf16 %v7974_v19  ;;  %v7975_v3 = vunpack.i.l.bf16 %v7974_v19 }
0x18b7   :  { %v4888_v32 = vpack.c.bf16 %v7978_v14, %v7978_v14  ;;  %v4773_v33 = vpack.c.bf16 %v7975_v3, %v7975_v3 }
0x18b9   :  { %7086 = vmatmul.msk.bf16.vlgmr.msra.gmra.mxu1 %vm576_vm4, %v4773_v33  ;;  %7088 = vmatmul.msk.bf16.vlgmr.msrb.gmra.mxu3 %vm576_vm4, %v4888_v32 }
0x18ba   :  { %5245 = vmatpush.bf16.msra.mxu1 %v5234_v61  ;;  %5360 = vmatpush.bf16.msrb.mxu3 %v5349_v10 }
0x18d4   :  { %v7983_v52 = vpop.trf.xlu1 }
0x18d5   :  { %v7987_v47 = vunpack.i.h.bf16 %v7983_v52  ;;  %v7984_v48 = vunpack.i.l.bf16 %v7983_v52 }
0x18d7   :  { %v5118_v49 = vpack.c.bf16 %v7987_v47, %v7987_v47  ;;  %v5003_v34 = vpack.c.bf16 %v7984_v48, %v7984_v48 }
0x18d9   :  { %7090 = vmatmul.msk.bf16.vlgmr.msrb.gmra.mxu1 %vm576_vm4, %v5003_v34  ;;  %7092 = vmatmul.msk.bf16.vlgmr.msra.gmra.mxu3 %vm576_vm4, %v5118_v49 }
0x18e9   :  { %v7992_v50 = vpop.trf.xlu2 }
0x18ea   :  { %v7996_v17 = vunpack.i.h.bf16 %v7992_v50  ;;  %v7993_v51 = vunpack.i.l.bf16 %v7992_v50 }
0x18ec   :  { %v5348_v7 = vpack.c.bf16 %v7996_v17, %v7996_v17  ;;  %v5233_v8 = vpack.c.bf16 %v7993_v51, %v7993_v51 }
0x18ee   :  { %7094 = vmatmul.msk.bf16.vlgmr.msra.gmra.mxu1 %vm576_vm4, %v5233_v8  ;;  %7096 = vmatmul.msk.bf16.vlgmr.msrb.gmra.mxu3 %vm576_vm4, %v5348_v7 }
0x1916   :  { %v4557_v11 = vpop.f32.mrf.mxu1 }
0x1917   :  { %v4561_v15 = vsel %vm593_vm5, %v4557_v11, -inf }
0x1918   :  { %4562 = vmax.xlane.f32.xlu1 %v4561_v15 }
0x191c   :  { %v4672_v39 = vpop.f32.mrf.mxu3 }
0x191d   :  { %v4676_v56 = vsel %vm593_vm5, %v4672_v39, -inf }
0x191e   :  { %4677 = vmax.xlane.f32.xlu2 %v4676_v56  ;;  %v4559_v43 = vpop.f32.mrf.mxu1 }
0x1924   :  { %v4674_v63 = vpop.f32.mrf.mxu3 }
0x1936   :  { %v4787_v57 = vpop.f32.mrf.mxu1 }
0x1937   :  { %v4791_v5 = vsel %vm593_vm5, %v4787_v57, -inf }
0x1938   :  { %4792 = vmax.xlane.f32.xlu2 %v4791_v5 }
0x193c   :  { %v4902_v24 = vpop.f32.mrf.mxu3 }
0x193d   :  { %v4906_v38 = vsel %vm593_vm5, %v4902_v24, -inf }
0x193e   :  { %v4789_v25 = vpop.f32.mrf.mxu1 }
0x1940   :  { %4907 = vmax.xlane.f32.xlu2 %v4906_v38 }
0x1944   :  { %v4904_v26 = vpop.f32.mrf.mxu3 }
0x1956   :  { %v5017_v27 = vpop.f32.mrf.mxu1 }
0x1957   :  { %v5021_v40 = vsel %vm593_vm5, %v5017_v27, -inf }
0x1958   :  { %5022 = vmax.xlane.f32.xlu1 %v5021_v40 }
0x195c   :  { %v8937_v61 = vpop.f32.mrf.mxu3 }
0x195d   :  { %v5136_v13 = vsel %vm593_vm5, %v8937_v61, -inf }
0x195e   :  { %v5019_v35 = vpop.f32.mrf.mxu1 }
0x1960   :  { %5137 = vmax.xlane.f32.xlu1 %v5136_v13 }
0x1964   :  { %v5134_v31 = vpop.f32.mrf.mxu3 }
0x196b   :  { %v8941_v18 = vpop.f32.mrf.mxu1 }
0x196c   :  { %v5251_v62 = vsel %vm593_vm5, %v8941_v18, -inf }
0x196d   :  { %5252 = vmax.xlane.f32.xlu1 %v5251_v62 }
0x1971   :  { %v8945_v1 = vpop.f32.mrf.mxu3 }
0x1972   :  { %v5366_v4 = vsel %vm593_vm5, %v8945_v1, -inf }
0x1973   :  { %v5249_v19 = vpop.f32.mrf.mxu1 }
0x1975   :  { %5367 = vmax.xlane.f32.xlu1 %v5366_v4 }
0x1979   :  { %v5364_v14 = vpop.f32.mrf.mxu3 }
0x198b   :  { %v4563_v3 = vpop.xlane.xlu1 %4562 }
0x198c   :  { %v4564_v32 = vsub.f32 %v4557_v11, %v4563_v3 }
0x198e   :  { %v4565_v33 = vmul.f32 1.442695, %v4564_v32 }
0x1990   :  { %8098 = vpow2.f32 %v4565_v33 }
0x1991   :  { %v4678_v10 = vpop.xlane.xlu2 %4677 }
0x1992   :  { %v4679_v52 = vsub.f32 %v4672_v39, %v4678_v10 }
0x1994   :  { %v4680_v47 = vmul.f32 1.442695, %v4679_v52 }
0x1996   :  { %v8099_v48 = vpop.eup %8098  ;;  %8100 = vpow2.f32 %v4680_v47 }
0x1997   :  { %v4567_v49 = vsel %vm593_vm5, %v8099_v48, 0.0 }
0x1998   :  { %4568 = vadd.xlane.f32.xlu2 %v4567_v49 }
0x199c   :  { %v8101_v34 = vpop.eup %8100 }
0x199d   :  { %v4682_v50 = vsel %vm593_vm5, %v8101_v34, 0.0 }
0x199e   :  { %4683 = vadd.xlane.f32.xlu0 %v4682_v50 }
0x19ab   :  { %v4793_v17 = vpop.xlane.xlu2 %4792 }
0x19ac   :  { %v4794_v51 = vsub.f32 %v4787_v57, %v4793_v17 }
0x19ae   :  { %v4795_v7 = vmul.f32 1.442695, %v4794_v51 }
0x19b0   :  { %8102 = vpow2.f32 %v4795_v7 }
0x19b3   :  { %v4908_v8 = vpop.xlane.xlu2 %4907 }
0x19b4   :  { %v4909_v11 = vsub.f32 %v4902_v24, %v4908_v8 }
0x19b6   :  { %v8103_v15 = vpop.eup %8102  ;;  %v4910_v56 = vmul.f32 1.442695, %v4909_v11 }
0x19b7   :  { %v4797_v39 = vsel %vm593_vm5, %v8103_v15, 0.0 }
0x19b8   :  { %8104 = vpow2.f32 %v4910_v56  ;;  %4798 = vadd.xlane.f32.xlu1 %v4797_v39 }
0x19be   :  { %v8105_v43 = vpop.eup %8104 }
0x19bf   :  { %v4912_v63 = vsel %vm593_vm5, %v8105_v43, 0.0 }
0x19c0   :  { %4913 = vadd.xlane.f32.xlu1 %v4912_v63 }
0x19cb   :  { %v5023_v5 = vpop.xlane.xlu1 %5022 }
0x19cc   :  { %v5024_v25 = vsub.f32 %v5017_v27, %v5023_v5 }
0x19ce   :  { %v5025_v38 = vmul.f32 1.442695, %v5024_v25 }
0x19d0   :  { %8106 = vpow2.f32 %v5025_v38 }
0x19d3   :  { %v5138_v40 = vpop.xlane.xlu1 %5137 }
0x19d4   :  { %v5139_v47 = vsub.f32 %v8937_v61, %v5138_v40 }
0x19d6   :  { %v8953_v26 = vpop.eup %8106  ;;  %v5140_v49 = vmul.f32 1.442695, %v5139_v47 }
0x19d7   :  { %v5027_v57 = vsel %vm593_vm5, %v8953_v26, 0.0 }
0x19d8   :  { %5028 = vadd.xlane.f32.xlu1 %v5027_v57 }
0x19e0   :  { %v5253_v4 = vpop.xlane.xlu1 %5252 }
0x19e1   :  { %v5254_v51 = vsub.f32 %v8941_v18, %v5253_v4 }
0x19e3   :  { %v5255_v7 = vmul.f32 1.442695, %v5254_v51 }
0x19e8   :  { %v5368_v27 = vpop.xlane.xlu1 %5367 }
0x1a0b   :  { %v4569_v24 = vpop.xlane.xlu2 %4568 }
0x1a0c   :  { %8108 = vrcp.f32 %v4569_v24 }
0x1a11   :  { %v4684_v13 = vpop.xlane.xlu0 %4683 }
0x1a12   :  { %v8109_v35 = vpop.eup %8108  ;;  %8110 = vrcp.f32 %v4684_v13 }
0x1a13   :  { %v4571_v31 = vmul.f32 %v8109_v35, %v8099_v48 }
0x1a15   :  { %4573 = vxpose.xlu2.b32.start.end [1/1] (short) (narrow) %v4571_v31, 8 }
0x1a18   :  { %v8111_v62 = vpop.eup %8110 }
0x1a19   :  { %v4686_v19 = vmul.f32 %v8111_v62, %v8101_v34  ;;  %v5369_v34 = vsub.f32 %v8945_v1, %v5368_v27 }
0x1a1b   :  { %4688 = vxpose.xlu1.b32.start.end [1/1] (short) (narrow) %v4686_v19, 8  ;;  %v5370_v17 = vmul.f32 1.442695, %v5369_v34 }
0x1a2b   :  { %v4799_v14 = vpop.xlane.xlu1 %4798 }
0x1a2c   :  { %8112 = vrcp.f32 %v4799_v14 }
0x1a32   :  { %v8113_v3 = vpop.eup %8112 }
0x1a33   :  { %v4914_v32 = vpop.xlane.xlu1 %4913  ;;  %v4801_v33 = vmul.f32 %v8113_v3, %v8103_v15 }
0x1a34   :  { %8114 = vrcp.f32 %v4914_v32 }
0x1a35   :  { %4803 = vxpose.xlu2.b32.start.end [1/1] (short) (narrow) %v4801_v33, 8  ;;  %8116 = vpow2.f32 %v5140_v49 }
0x1a36   :  { %8118 = vpow2.f32 %v5370_v17 }
0x1a37   :  { %8120 = vpow2.f32 %v5255_v7  ;;  %v7609_v7 = vld [vmem:[#allocation11 + $0xa0] sm:$0xff] }
0x1a3a   :  { %v8115_v10 = vpop.eup %8114 }
0x1a3b   :  { %v4916_v52 = vmul.f32 %v8115_v10, %v8105_v43  ;;  %v8117_v48 = vpop.eup %8116 }
0x1a3c   :  { %v5142_v50 = vsel %vm593_vm5, %v8117_v48, 0.0  ;;  %v8119_v8 = vpop.eup %8118 }
0x1a3d   :  { %4918 = vxpose.xlu0.b32.start.end [1/1] (short) (narrow) %v4916_v52, 8  ;;  %v5372_v11 = vsel %vm593_vm5, %v8119_v8, 0.0  ;;  %v8121_v15 = vpop.eup %8120 }
0x1a3e   :  { %v5257_v61 = vsel %vm593_vm5, %v8121_v15, 0.0 }
0x1a4b   :  { %v5029_v18 = vpop.xlane.xlu1 %5028 }
0x1a4c   :  { %8122 = vrcp.f32 %v5029_v18 }
0x1a52   :  { %v8123_v59 = vpop.eup %8122 }
0x1a53   :  { %v5031_v24 = vmul.f32 %v8123_v59, %v8953_v26 }
0x1a7b   :  { %5143 = vadd.xlane.f32.xlu1 %v5142_v50 }
0x1aa6   :  { %5373 = vadd.xlane.f32.xlu2 %v5372_v11  ;;  %v7606_v11 = vld [vmem:[#allocation11 + $0x88] sm:$0xff] }
0x1aae   :  { %v4589_v56 = vpop.trf.xlu2  ;;  %5258 = vadd.xlane.f32.xlu0 %v5257_v61 }
0x1aaf   :  { %v4605_v39 = vpack.c.bf16 %v4589_v56, %v4589_v56 }
0x1ab1   :  { %v4610_v43 = vsel %vm642_vm6, %v4605_v39, 0 }
0x1ab2   :  { %4619 = vmatpush.bf16.msrb.mxu2 %v4610_v43  ;;  %v8018_v43 = vld [vmem:[%s9035_s6 + $0x2] ss:$0 sm:$0xff] }
0x1ab5   :  { %7083 = vmatmul.msk.bf16.vlgmr.msrb.gmra.mxu2 %vm593_vm5, %v4572_v30 }
0x1abf   :  { %v4704_v1 = vpop.trf.xlu1 }
0x1ac0   :  { %v4720_v63 = vpack.c.bf16 %v4704_v1, %v4704_v1 }
0x1ac2   :  { %v4725_v5 = vsel %vm642_vm6, %v4720_v63, 0 }
0x1ac3   :  { %4734 = vmatpush.bf16.msrb.mxu0 %v4725_v5 }
0x1ac6   :  { %7085 = vmatmul.msk.bf16.vlgmr.msrb.gmra.mxu0 %vm593_vm5, %v4687_v54 }
0x1ace   :  { %v4819_v25 = vpop.trf.xlu2 }
0x1acf   :  { %v4835_v38 = vpack.c.bf16 %v4819_v25, %v4819_v25  ;;  %v7246_v25 = vld [vmem:[#allocation14 + $0x2e0] sm:$0xf] }
0x1ad1   :  { %v4840_v57 = vsel %vm642_vm6, %v4835_v38, 0  ;;  %v7643_v38 = vld [vmem:[#allocation14 + $0x2ec] sm:$0xf0] }
0x1ad2   :  { %4849 = vmatpush.bf16.msra.mxu2 %v4840_v57  ;;  %v7641_v57 = vld [vmem:[#allocation14 + $0x2e4] sm:$0xf] }
0x1ad5   :  { %7087 = vmatmul.msk.bf16.vlgmr.msra.gmra.mxu2 %vm593_vm5, %v4802_v37 }
0x1ae1   :  { %v4934_v53 = vpop.trf.xlu0 }
0x1ae2   :  { %v4950_v12 = vpack.c.bf16 %v4934_v53, %v4934_v53  ;;  %v7247_v53 = vor.u32 %v7643_v38, %v7246_v25  ;;  %v7192_v25 = vld [vmem:[#allocation14 + $0x278] sm:$0xf0] }
0x1ae4   :  { %v4955_v30 = vsel %vm642_vm6, %v4950_v12, 0  ;;  %v7248_v12 = vld [vmem:[#allocation14 + $0x2f0] sm:$0xf0] }
0x1ae5   :  { %4964 = vmatpush.bf16.msra.mxu0 %v4955_v30  ;;  %v7254_v30 = vld [vmem:[#allocation14 + $0x2e8] sm:$0xf]  ;;  %v7251_v59 = vor.u32 %v7641_v57, %v7248_v12  ;;  %v7166_v57 = vld [vmem:[#allocation14 + $0x240] sm:$0xf]  ;;  %v7621_v12 = vld [vmem:[#allocation14 + $0x244] sm:$0xf] }
0x1ae7   :  { %5798 = vmatpush.bf16.msra.mxu3 %v7251_v59  ;;  %v7174_v59 = vld [vmem:[#allocation14 + $0x248] sm:$0xf] }
0x1ae8   :  { %7089 = vmatmul.msk.bf16.vlgmr.msra.gmra.mxu0 %vm593_vm5, %v4917_v20 }
0x1aee   :  { %v5144_v58 = vpop.xlane.xlu1 %5143 }
0x1aef   :  { %8124 = vrcp.f32 %v5144_v58  ;;  %v7644_v58 = vld [vmem:[#allocation14 + $0x2f4] sm:$0xf0] }
0x1af5   :  { %v8125_v54 = vpop.eup %8124 }
0x1af6   :  { %v5146_v55 = vmul.f32 %v8125_v54, %v8117_v48  ;;  %v7255_v54 = vor.u32 %v7644_v58, %v7254_v30  ;;  %v7168_v58 = vld [vmem:[#allocation14 + $0x250] sm:$0xf0] }
0x1af8   :  { %v7997_v36 = vpack.i.bf16 %v5146_v55, %v5031_v24  ;;  %v7642_v24 = vld [vmem:[#allocation14 + $0x2ec] sm:$0xf]  ;;  %v7256_v55 = vld [vmem:[#allocation14 + $0x2f8] sm:$0xf0] }
0x1afa   :  { %7998 = vxpose.xlu1.b32.start.end [1/1] (short) (narrow) %v7997_v36, 8  ;;  %v7259_v36 = vor.u32 %v7642_v24, %v7256_v55  ;;  %v7171_v24 = vor.u32 %v7621_v12, %v7168_v58  ;;  %v7663_v12 = vld [vmem:[#allocation17 + $0x290] sm:$0xff] }
0x1b19   :  { %v5374_v40 = vpop.xlane.xlu2 %5373 }
0x1b21   :  { %v5259_v37 = vpop.xlane.xlu0 %5258 }
0x1b22   :  { %8126 = vrcp.f32 %v5259_v37 }
0x1b23   :  { %8128 = vrcp.f32 %v5374_v40 }
0x1b28   :  { %v8127_v13 = vpop.eup %8126 }
0x1b29   :  { %v5261_v35 = vmul.f32 %v8127_v13, %v8121_v15  ;;  %v8129_v60 = vpop.eup %8128  ;;  %v7605_v15 = vld [vmem:[#allocation11 + $0x80] sm:$0xff] }
0x1b2a   :  { %v5376_v9 = vmul.f32 %v8129_v60, %v8119_v8  ;;  %v7639_v60 = vld [vmem:[#allocation14 + $0x2cc] sm:$0xf0] }
0x1b2b   :  { %5263 = vxpose.xlu2.b32.start.end [1/1] (short) (narrow) %v5261_v35, 8  ;;  %v7230_v35 = vld [vmem:[#allocation14 + $0x2c0] sm:$0xf] }
0x1b33   :  { %5378 = vxpose.xlu2.b32.start.end [1/1] (short) (narrow) %v5376_v9, 8  ;;  %v7637_v9 = vld [vmem:[#allocation14 + $0x2c4] sm:$0xf] }
0x1b38   :  { %v4621_v20 = vpop.f32.mrf.mxu2 }
0x1b39   :  { %5431 = vxpose.xlu1.b32.start [1/16] (narrow) %v4621_v20, 8  ;;  %v7231_v20 = vor.u32 %v7639_v60, %v7230_v35  ;;  %v7619_v35 = vld [vmem:[#allocation14 + $0x22c] sm:$0xf0]  ;;  %v7617_v60 = vld [vmem:[#allocation14 + $0x224] sm:$0xf] }
0x1b40   :  { %v4623_v31 = vpop.f32.mrf.mxu2 }
0x1b41   :  { %5432 = vxpose.xlu1.b32.cont [2/16] (narrow) %v4623_v31, 8  ;;  %v7232_v31 = vld [vmem:[#allocation14 + $0x2d0] sm:$0xf0] }
0x1b43   :  { %v4736_v62 = vpop.f32.mrf.mxu0 }
0x1b49   :  { %5433 = vxpose.xlu1.b32.cont [3/16] (narrow) %v4736_v62, 8  ;;  %v7238_v62 = vld [vmem:[#allocation14 + $0x2c8] sm:$0xf] }
0x1b4b   :  { %v4738_v26 = vpop.f32.mrf.mxu0 }
0x1b51   :  { %5434 = vxpose.xlu1.b32.cont [4/16] (narrow) %v4738_v26, 8  ;;  %v7640_v26 = vld [vmem:[#allocation14 + $0x2d4] sm:$0xf0] }
0x1b58   :  { %v4851_v4 = vpop.f32.mrf.mxu2 }
0x1b59   :  { %5435 = vxpose.xlu1.b32.cont [5/16] (narrow) %v4851_v4, 8  ;;  %v7235_v4 = vor.u32 %v7637_v9, %v7232_v31  ;;  %v7158_v31 = vld [vmem:[#allocation14 + $0x228] sm:$0xf] }
0x1b5b   :  { %5799 = vmatpush.bf16.msra.mxu3 %v7235_v4 }
0x1b60   :  { %v4853_v19 = vpop.f32.mrf.mxu2 }
0x1b61   :  { %5436 = vxpose.xlu1.b32.cont [6/16] (narrow) %v4853_v19, 8  ;;  %v7239_v19 = vor.u32 %v7640_v26, %v7238_v62  ;;  %v7620_v62 = vld [vmem:[#allocation14 + $0x234] sm:$0xf0] }
0x1b62   :  { %v7159_v4 = vor.u32 %v7620_v62, %v7158_v31  ;;  %v7669_v31 = vld [vmem:[#allocation17 + $0x2c0] sm:$0xff]  ;;  %v7654_v62 = vld [vmem:[#allocation17 + $0x248] sm:$0xff] }
0x1b65   :  { %v4966_v27 = vpop.f32.mrf.mxu0 }
0x1b69   :  { %5437 = vxpose.xlu1.b32.cont [7/16] (narrow) %v4966_v27, 8  ;;  %v7638_v27 = vld [vmem:[#allocation14 + $0x2cc] sm:$0xf] }
0x1b6d   :  { %v4968_v14 = vpop.f32.mrf.mxu0 }
0x1b71   :  { %5438 = vxpose.xlu1.b32.cont [8/16] (narrow) %v4968_v14, 8  ;;  %v7240_v14 = vld [vmem:[#allocation14 + $0x2d8] sm:$0xf0] }
0x1b9e   :  { %v7999_v3 = vpop.trf.xlu1 }
0x1b9f   :  { %v8003_v32 = vunpack.i.h.bf16 %v7999_v3  ;;  %v8000_v33 = vunpack.i.l.bf16 %v7999_v3  ;;  %v7243_v3 = vor.u32 %v7638_v27, %v7240_v14  ;;  %v7160_v27 = vld [vmem:[#allocation14 + $0x238] sm:$0xf0] }
0x1ba1   :  { %v5065_v10 = vpack.c.bf16 %v8000_v33, %v8000_v33  ;;  %v5180_v52 = vpack.c.bf16 %v8003_v32, %v8003_v32  ;;  %v7214_v32 = vld [vmem:[#allocation14 + $0x2a0] sm:$0xf]  ;;  %v7635_v33 = vld [vmem:[#allocation14 + $0x2ac] sm:$0xf0] }
0x1ba3   :  { %v5070_v47 = vsel %vm642_vm6, %v5065_v10, 0  ;;  %v5185_v49 = vsel %vm642_vm6, %v5180_v52, 0  ;;  %v7633_v10 = vld [vmem:[#allocation14 + $0x2a4] sm:$0xf]  ;;  %v7215_v52 = vor.u32 %v7635_v33, %v7214_v32  ;;  %v7615_v32 = vld [vmem:[#allocation14 + $0x20c] sm:$0xf0] }
0x1ba4   :  { %5079 = vmatpush.bf16.msrb.mxu2 %v5070_v47  ;;  %5194 = vmatpush.bf16.msrb.mxu0 %v5185_v49  ;;  %v7216_v47 = vld [vmem:[#allocation14 + $0x2b0] sm:$0xf0]  ;;  %v7222_v49 = vld [vmem:[#allocation14 + $0x2a8] sm:$0xf]  ;;  %v7613_v33 = vld [vmem:[#allocation14 + $0x204] sm:$0xf] }
0x1ba7   :  { %7091 = vmatmul.msk.bf16.vlgmr.msrb.gmra.mxu2 %vm593_vm5, %v5032_v2  ;;  %7093 = vmatmul.msk.bf16.vlgmr.msrb.gmra.mxu0 %vm593_vm5, %v5147_v22  ;;  %v7612_v22 = vld [vmem:[#allocation11 + $0xb8] sm:$0xff] }
0x1ba8   :  { %5534 = vmatpush.bf16.msrb.mxu1 %v7612_v22  ;;  %v7200_v22 = vld [vmem:[#allocation14 + $0x290] sm:$0xf0] }
0x1bac   :  { %5535 = vmatpush.bf16.msrb.mxu1 %v7611_v44  ;;  %v7206_v44 = vld [vmem:[#allocation14 + $0x288] sm:$0xf] }
0x1bb0   :  { %5536 = vmatpush.bf16.msrb.mxu1 %v7610_v6  ;;  %v7632_v6 = vld [vmem:[#allocation14 + $0x294] sm:$0xf0] }
0x1bb4   :  { %5537 = vmatpush.bf16.msrb.mxu1 %v7609_v7  ;;  %v7207_v7 = vor.u32 %v7632_v6, %v7206_v44  ;;  %v7667_v44 = vld [vmem:[#allocation17 + $0x2b0] sm:$0xff] }
0x1bb5   :  { %v7675_v6 = vld [vmem:[#allocation17 + $0x2f0] sm:$0xff] }
0x1bb8   :  { %5538 = vmatpush.bf16.msrb.mxu1 %v7608_v29  ;;  %v7630_v29 = vld [vmem:[#allocation14 + $0x28c] sm:$0xf] }
0x1bc4   :  { %v5279_v48 = vpop.trf.xlu2 }
0x1bc5   :  { %v5295_v50 = vpack.c.bf16 %v5279_v48, %v5279_v48  ;;  %v7636_v48 = vld [vmem:[#allocation14 + $0x2b4] sm:$0xf0] }
0x1bc7   :  { %v5300_v34 = vsel %vm642_vm6, %v5295_v50, 0  ;;  %v7219_v50 = vor.u32 %v7633_v10, %v7216_v47  ;;  %v7142_v47 = vld [vmem:[#allocation14 + $0x208] sm:$0xf] }
0x1bc8   :  { %5309 = vmatpush.bf16.msra.mxu2 %v5300_v34  ;;  %v7223_v34 = vor.u32 %v7636_v48, %v7222_v49  ;;  %v7616_v49 = vld [vmem:[#allocation14 + $0x214] sm:$0xf0] }
0x1bc9   :  { %5800 = vmatpush.bf16.msra.mxu3 %v7219_v50  ;;  %v7143_v50 = vor.u32 %v7616_v49, %v7142_v47 }
0x1bcb   :  { %7095 = vmatmul.msk.bf16.vlgmr.msra.gmra.mxu2 %vm593_vm5, %v5262_v28 }
0x1bcc   :  { %v5394_v17 = vpop.trf.xlu2  ;;  %5785 = vmatpush.bf16.msrb.mxu2 %v7247_v53  ;;  %v7623_v53 = vld [vmem:[#allocation14 + $0x24c] sm:$0xf0] }
0x1bcd   :  { %v5410_v51 = vpack.c.bf16 %v5394_v17, %v5394_v17  ;;  %v7634_v17 = vld [vmem:[#allocation14 + $0x2ac] sm:$0xf]  ;;  %v7167_v30 = vor.u32 %v7623_v53, %v7166_v57 }
0x1bcf   :  { %v5415_v23 = vsel %vm642_vm6, %v5410_v51, 0  ;;  %v7224_v51 = vld [vmem:[#allocation14 + $0x2b8] sm:$0xf0] }
0x1bd0   :  { %5424 = vmatpush.bf16.msra.mxu0 %v5415_v23  ;;  %5786 = vmatpush.bf16.msrb.mxu2 %v7231_v20  ;;  %v7227_v23 = vor.u32 %v7634_v17, %v7224_v51  ;;  %v7152_v20 = vld [vmem:[#allocation14 + $0x230] sm:$0xf0]  ;;  %v7144_v17 = vld [vmem:[#allocation14 + $0x218] sm:$0xf0] }
0x1bd1   :  { %v7155_v26 = vor.u32 %v7617_v60, %v7152_v20  ;;  %v7647_v60 = vld [vmem:[#allocation17 + $0x210] sm:$0xff]  ;;  %v7661_v20 = vld [vmem:[#allocation17 + $0x280] sm:$0xff] }
0x1bd3   :  { %7097 = vmatmul.msk.bf16.vlgmr.msra.gmra.mxu0 %vm593_vm5, %v5377_v46  ;;  %v7607_v46 = vld [vmem:[#allocation11 + $0x90] sm:$0xff] }
0x1bd4   :  { %5539 = vmatpush.bf16.msrb.mxu1 %v7607_v46  ;;  %5811 = vmatpush.bf16.msrb.mxu0 %v7255_v54  ;;  %v7624_v54 = vld [vmem:[#allocation14 + $0x254] sm:$0xf0] }
0x1bd5   :  { %5787 = vmatpush.bf16.msrb.mxu2 %v7215_v52  ;;  %v7175_v55 = vor.u32 %v7624_v54, %v7174_v59  ;;  %v7136_v52 = vld [vmem:[#allocation14 + $0x210] sm:$0xf0]  ;;  %v8019_v59 = vld [vmem:[%s9036_s7 + $0x2] ss:$0 sm:$0xff] }
0x1bd6   :  { %v7139_v48 = vor.u32 %v7613_v33, %v7136_v52 }
0x1bd8   :  { %5540 = vmatpush.bf16.msrb.mxu1 %v7606_v11  ;;  %5812 = vmatpush.bf16.msrb.mxu0 %v7239_v19  ;;  %v7627_v11 = vld [vmem:[#allocation14 + $0x26c] sm:$0xf0]  ;;  %v7618_v19 = vld [vmem:[#allocation14 + $0x22c] sm:$0xf] }
0x1bd9   :  { %v7163_v14 = vor.u32 %v7618_v19, %v7160_v27  ;;  %v5615_v19 = vld [vmem:[#allocation16 + $0x8] sm:$0xf] }
0x1bda   :  { %v5619_v27 = vperm.slane %v5615_v19, 2  ;;  %v5617_v52 = vperm.slane %v5615_v19, 0  ;;  %v5618_v47 = vperm.slane %v5615_v19, 1 }
0x1bdc   :  { %5541 = vmatpush.bf16.msrb.mxu1 %v7605_v15  ;;  %5813 = vmatpush.bf16.msrb.mxu0 %v7223_v34  ;;  %v7625_v15 = vld [vmem:[#allocation14 + $0x264] sm:$0xf]  ;;  %v7614_v34 = vld [vmem:[#allocation14 + $0x20c] sm:$0xf] }
0x1bdd   :  { %v7147_v51 = vor.u32 %v7614_v34, %v7144_v17 }
0x1be0   :  { %5824 = vmatpush.bf16.msra.mxu1 %v7259_v36  ;;  %5814 = vmatpush.bf16.msrb.mxu0 %v7207_v7  ;;  %v7622_v36 = vld [vmem:[#allocation14 + $0x24c] sm:$0xf]  ;;  %v7651_v7 = vld [vmem:[#allocation17 + $0x230] sm:$0xff] }
0x1be4   :  { %5825 = vmatpush.bf16.msra.mxu1 %v7243_v3  ;;  %v7134_v3 = vld [vmem:[#allocation14 + $0x200] sm:$0xf] }
0x1be5   :  { %v7135_v10 = vor.u32 %v7615_v32, %v7134_v3 }
0x1be8   :  { %5826 = vmatpush.bf16.msra.mxu1 %v7227_v23 }
0x1c24   :  { %v5196_v21 = vpop.f32.mrf.mxu0 }
0x1c2a   :  { %v5081_v0 = vpop.f32.mrf.mxu2 }
0x1c2b   :  { %5439 = vxpose.xlu1.b32.cont [9/16] (narrow) %v5081_v0, 8  ;;  %v7198_v0 = vld [vmem:[#allocation14 + $0x280] sm:$0xf] }
0x1c2c   :  { %v5198_v41 = vpop.f32.mrf.mxu0 }
0x1c32   :  { %v5083_v2 = vpop.f32.mrf.mxu2 }
0x1c33   :  { %5440 = vxpose.xlu1.b32.cont [10/16] (narrow) %v5083_v2, 8  ;;  %v7631_v2 = vld [vmem:[#allocation14 + $0x28c] sm:$0xf0] }
0x1c3b   :  { %5441 = vxpose.xlu1.b32.cont [11/16] (narrow) %v5196_v21, 8  ;;  %v7629_v21 = vld [vmem:[#allocation14 + $0x284] sm:$0xf] }
0x1c43   :  { %5442 = vxpose.xlu1.b32.cont [12/16] (narrow) %v5198_v41, 8  ;;  %v7199_v41 = vor.u32 %v7631_v2, %v7198_v0  ;;  %v7668_v0 = vld [vmem:[#allocation17 + $0x2b8] sm:$0xff] }
0x1c44   :  { %v7676_v2 = vld [vmem:[#allocation17 + $0x2f8] sm:$0xff] }
0x1c45   :  { %5788 = vmatpush.bf16.msrb.mxu2 %v7199_v41  ;;  %v7652_v41 = vld [vmem:[#allocation17 + $0x238] sm:$0xff] }
0x1c4e   :  { %v5311_v28 = vpop.f32.mrf.mxu2 }
0x1c4f   :  { %5443 = vxpose.xlu1.b32.cont [13/16] (narrow) %v5311_v28, 8  ;;  %v7203_v28 = vor.u32 %v7629_v21, %v7200_v22  ;;  %v7660_v22 = vld [vmem:[#allocation17 + $0x278] sm:$0xff] }
0x1c50   :  { %v5426_v8 = vpop.f32.mrf.mxu0 }
0x1c51   :  { %5801 = vmatpush.bf16.msra.mxu3 %v7203_v28 }
0x1c56   :  { %v5313_v45 = vpop.f32.mrf.mxu2 }
0x1c57   :  { %5444 = vxpose.xlu1.b32.cont [14/16] (narrow) %v5313_v45, 8  ;;  %v7208_v45 = vld [vmem:[#allocation14 + $0x298] sm:$0xf0] }
0x1c58   :  { %v5428_v61 = vpop.f32.mrf.mxu0  ;;  %v7211_v46 = vor.u32 %v7630_v29, %v7208_v45  ;;  %v7659_v29 = vld [vmem:[#allocation17 + $0x270] sm:$0xff]  ;;  %v7666_v45 = vld [vmem:[#allocation17 + $0x2a8] sm:$0xff] }
0x1c5a   :  { %5827 = vmatpush.bf16.msra.mxu1 %v7211_v46  ;;  %v7674_v46 = vld [vmem:[#allocation17 + $0x2e8] sm:$0xff] }
0x1c5f   :  { %5445 = vxpose.xlu1.b32.cont [15/16] (narrow) %v5426_v8, 8  ;;  %v7182_v8 = vld [vmem:[#allocation14 + $0x260] sm:$0xf] }
0x1c67   :  { %5446 = vxpose.xlu1.b32.end [16/16] (narrow) %v5428_v61, 8  ;;  %v7183_v61 = vor.u32 %v7627_v11, %v7182_v8  ;;  %v7650_v8 = vld [vmem:[#allocation17 + $0x228] sm:$0xff]  ;;  %v7665_v11 = vld [vmem:[#allocation17 + $0x2a0] sm:$0xff] }
0x1c69   :  { %5789 = vmatpush.bf16.msrb.mxu2 %v7183_v61 }
0x1c6d   :  { %5790 = vmatpush.bf16.msrb.mxu2 %v7167_v30  ;;  %v7671_v30 = vld [vmem:[#allocation17 + $0x2d0] sm:$0xff] }
0x1c93   :  { %v5447_v56 = vpop.trf.xlu1 }
0x1c94   :  { %v5463_v39 = vpack.c.bf16 %v5447_v56, %v5447_v56  ;;  %v7184_v56 = vld [vmem:[#allocation14 + $0x270] sm:$0xf0] }
0x1c96   :  { %5542 = vmatmul.bf16.vlgmr.msrb.gmra.mxu1 %v5463_v39  ;;  %v7190_v39 = vld [vmem:[#allocation14 + $0x268] sm:$0xf] }
0x1d13   :  { %v5543_v18 = vpop.f32.mrf.mxu1 }
0x1d14   :  { %v5544_v1 = vadd.f32 %v8018_v43, %v5543_v18  ;;  %v7628_v43 = vld [vmem:[#allocation14 + $0x274] sm:$0xf0]  ;;  %v7187_v18 = vor.u32 %v7625_v15, %v7184_v56  ;;  %v7673_v15 = vld [vmem:[#allocation17 + $0x2e0] sm:$0xff] }
0x1d15   :  { %v7649_v56 = vld [vmem:[#allocation17 + $0x220] sm:$0xff] }
0x1d16   :  { %v9008_v63 = vadd.f32 %v5544_v1, %v8865_v42  ;;  %v7191_v1 = vor.u32 %v7628_v43, %v7190_v39  ;;  %5802 = vmatpush.bf16.msra.mxu3 %v7187_v18  ;;  %v7657_v39 = vld [vmem:[#allocation17 + $0x260] sm:$0xff] }
0x1d18   :  { %5552 = vadd.xlane.f32.xlu2 %v9008_v63  ;;  %5815 = vmatpush.bf16.msrb.mxu0 %v7191_v1  ;;  %v7664_v1 = vld [vmem:[#allocation17 + $0x298] sm:$0xff] }
0x1d1a   :  { %5803 = vmatpush.bf16.msra.mxu3 %v7171_v24 }
0x1d1b   :  { %v5545_v5 = vpop.f32.mrf.mxu1 }
0x1d1c   :  { %v7626_v5 = vld [vmem:[#allocation14 + $0x26c] sm:$0xf]  ;;  %5816 = vmatpush.bf16.msrb.mxu0 %v7175_v55  ;;  %v8020_v55 = vld [vmem:[#allocation13 + $0x2] ss:$0 sm:$0xff] }
0x1d1d   :  { %v7195_v38 = vor.u32 %v7626_v5, %v7192_v25  ;;  %v7672_v5 = vld [vmem:[#allocation17 + $0x2d8] sm:$0xff] }
0x1d1e   :  { %5804 = vmatpush.bf16.msra.mxu3 %v7155_v26  ;;  %v7648_v25 = vld [vmem:[#allocation17 + $0x218] sm:$0xff]  ;;  %v7645_v26 = vld [vmem:[#allocation17 + $0x200] sm:$0xff] }
0x1d1f   :  { %5828 = vmatpush.bf16.msra.mxu1 %v7195_v38  ;;  %v7656_v38 = vld [vmem:[#allocation17 + $0x258] sm:$0xff] }
0x1d20   :  { %5817 = vmatpush.bf16.msrb.mxu0 %v7159_v4  ;;  %v7653_v4 = vld [vmem:[#allocation17 + $0x240] sm:$0xff] }
0x1d22   :  { %5805 = vmatpush.bf16.msra.mxu3 %v7139_v48 }
0x1d24   :  { %5818 = vmatpush.bf16.msrb.mxu0 %v7143_v50 }
0x1d26   :  { %6120 = vmatpush.bf16.msrb.mxu3 %v7660_v22 }
0x1d28   :  { %6133 = vmatpush.bf16.msra.mxu0 %v7668_v0 }
0x1d2a   :  { %6121 = vmatpush.bf16.msrb.mxu3 %v7659_v29 }
0x1d2c   :  { %6134 = vmatpush.bf16.msra.mxu0 %v7667_v44 }
0x1d30   :  { %6135 = vmatpush.bf16.msra.mxu0 %v7666_v45 }
0x1d34   :  { %6136 = vmatpush.bf16.msra.mxu0 %v7665_v11 }
0x1d38   :  { %6137 = vmatpush.bf16.msra.mxu0 %v7664_v1 }
0x1d3c   :  { %6138 = vmatpush.bf16.msra.mxu0 %v7663_v12 }
0x1d8b   :  { %v5553_v42 = vpop.xlane.xlu2 %5552 }
0x1d8c   :  { %v5554_v37 = vmul.f32 %v5553_v42, %v8551_v16  ;;  %v7176_v42 = vld [vmem:[#allocation14 + $0x258] sm:$0xf0] }
0x1d8e   :  { %v9013_v40 = vsub.f32 %v9008_v63, %v5554_v37  ;;  %v7179_v37 = vor.u32 %v7622_v36, %v7176_v42 }
0x1d90   :  { %v5556_v13 = vmul.f32 %v9013_v40, %v9013_v40  ;;  %5829 = vmatpush.bf16.msra.mxu1 %v7179_v37 }
0x1d92   :  { %5557 = vadd.xlane.f32.xlu0 %v5556_v13  ;;  %v7150_v13 = vld [vmem:[#allocation14 + $0x220] sm:$0xf] }
0x1d93   :  { %v7151_v9 = vor.u32 %v7619_v35, %v7150_v13  ;;  %v7662_v13 = vld [vmem:[#allocation17 + $0x288] sm:$0xff] }
0x1d94   :  { %5830 = vmatpush.bf16.msra.mxu1 %v7163_v14  ;;  %v7670_v35 = vld [vmem:[#allocation17 + $0x2c8] sm:$0xff]  ;;  %6139 = vmatpush.bf16.msra.mxu0 %v7662_v13  ;;  %v5620_v14 = vperm.slane %v5615_v19, 3 }
0x1d95   :  { %5791 = vmatpush.bf16.msrb.mxu2 %v7151_v9  ;;  %v7655_v9 = vld [vmem:[#allocation17 + $0x250] sm:$0xff] }
0x1d98   :  { %5831 = vmatpush.bf16.msra.mxu1 %v7147_v51  ;;  %6140 = vmatpush.bf16.msra.mxu0 %v7661_v20 }
0x1d99   :  { %5792 = vmatpush.bf16.msrb.mxu2 %v7135_v10 }
0x1d9c   :  { %6146 = vmatpush.bf16.msrb.mxu1 %v7676_v2 }
0x1d9d   :  { %6107 = vmatpush.bf16.msra.mxu2 %v7652_v41 }
0x1da0   :  { %6147 = vmatpush.bf16.msrb.mxu1 %v7675_v6 }
0x1da1   :  { %6108 = vmatpush.bf16.msra.mxu2 %v7651_v7 }
0x1da4   :  { %6148 = vmatpush.bf16.msrb.mxu1 %v7674_v46 }
0x1da5   :  { %6109 = vmatpush.bf16.msra.mxu2 %v7650_v8 }
0x1da8   :  { %6149 = vmatpush.bf16.msrb.mxu1 %v7673_v15 }
0x1da9   :  { %6110 = vmatpush.bf16.msra.mxu2 %v7649_v56 }
0x1dac   :  { %6150 = vmatpush.bf16.msrb.mxu1 %v7672_v5 }
0x1dad   :  { %6111 = vmatpush.bf16.msra.mxu2 %v7648_v25 }
0x1db0   :  { %6151 = vmatpush.bf16.msrb.mxu1 %v7671_v30 }
0x1db1   :  { %6112 = vmatpush.bf16.msra.mxu2 %v7647_v60 }
0x1db4   :  { %6152 = vmatpush.bf16.msrb.mxu1 %v7670_v35 }
0x1db8   :  { %6153 = vmatpush.bf16.msrb.mxu1 %v7669_v31 }
0x1e05   :  { %v5558_v23 = vpop.xlane.xlu0 %5557 }
0x1e06   :  { %v5559_v21 = vmul.f32 %v5558_v23, %v8551_v16  ;;  %v7658_v16 = vld [vmem:[#allocation17 + $0x268] sm:$0xff] }
0x1e07   :  { %6122 = vmatpush.bf16.msrb.mxu3 %v7658_v16  ;;  %v8021_v16 = vld [vmem:[%s9041_s12 + $0x2] ss:$0 sm:$0xff] }
0x1e08   :  { %v5560_v28 = vadd.f32 1e-05, %v5559_v21 }
0x1e0a   :  { %8130 = vrsqrt.f32 %v5560_v28  ;;  %vm5567_vm4 = vweird.f32 %v5560_v28 }
0x1e0b   :  { %6123 = vmatpush.bf16.msrb.mxu3 %v7657_v39 }
0x1e0f   :  { %6124 = vmatpush.bf16.msrb.mxu3 %v7656_v38 }
0x1e10   :  { %v8131_v61 = vpop.eup %8130 }
0x1e11   :  { %v5562_v43 = vmul.f32 %v8131_v61, %v5560_v28  ;;  %vm5568_vm3 = vweird.f32 %v8131_v61 }
0x1e12   :  { %vm5569_vm5 = vmor %vm5567_vm4, %vm5568_vm3 }
0x1e13   :  { %v5563_v18 = vmul.f32 %v8131_v61, %v5562_v43  ;;  %6125 = vmatpush.bf16.msrb.mxu3 %v7655_v9 }
0x1e15   :  { %v5564_v57 = vmul.f32 0.5, %v5563_v18 }
0x1e17   :  { %v5565_v53 = vsub.f32 1.5, %v5564_v57  ;;  %6126 = vmatpush.bf16.msrb.mxu3 %v7654_v62 }
0x1e19   :  { %v5566_v58 = vmul.f32 %v8131_v61, %v5565_v53 }
0x1e1b   :  { %v5570_v54 = vsel %vm5569_vm5, %v8131_v61, %v5566_v58  ;;  %6127 = vmatpush.bf16.msrb.mxu3 %v7653_v4 }
0x1e1c   :  { %v5571_v24 = vmul.f32 %v5570_v54, %v9013_v40  ;;  %v7646_v40 = vld [vmem:[#allocation17 + $0x208] sm:$0xff] }
0x1e1d   :  { %6113 = vmatpush.bf16.msra.mxu2 %v7646_v40 }
0x1e1e   :  { %v5575_v36 = vmul.f32 %v8019_v59, %v5571_v24 }
0x1e20   :  { %v5579_v42 = vadd.f32 %v8020_v55, %v5575_v36 }
0x1e21   :  { %6114 = vmatpush.bf16.msra.mxu2 %v7645_v26 }
0x1e22   :  { %v5580_v37 = vpack.c.bf16 %v5579_v42, %v5579_v42 }
0x1e24   :  { %5793 = vmatmul.bf16.vlgmr.msrb.gmra.mxu2 %v5580_v37  ;;  %5806 = vmatmul.bf16.vlgmr.msra.gmra.mxu3 %v5580_v37 }
0x1e25   :  { %5819 = vmatmul.bf16.vlgmr.msrb.gmra.mxu0 %v5580_v37  ;;  %5832 = vmatmul.bf16.vlgmr.msra.gmra.mxu1 %v5580_v37 }
0x1ea2   :  { %v5820_v3 = vpop.f32.mrf.mxu0  ;;  %v5833_v32 = vpop.f32.mrf.mxu1 }
0x1ea3   :  { %v5821_v33 = vadd.f32 %v5820_v3, %v5619_v27  ;;  %v5834_v10 = vadd.f32 %v5833_v32, %v5620_v14 }
0x1ea5   :  { %v5839_v49 = vmax.f32 %v5821_v33, 0.0  ;;  %v5840_v48 = vmax.f32 %v5834_v10, 0.0 }
0x1ea7   :  { %v5843_v50 = vpack.c.bf16 %v5839_v49, %v5839_v49  ;;  %v5844_v34 = vpack.c.bf16 %v5840_v48, %v5840_v48  ;;  %v5794_v17 = vpop.f32.mrf.mxu2  ;;  %v5807_v51 = vpop.f32.mrf.mxu3 }
0x1ea8   :  { %v5795_v23 = vadd.f32 %v5794_v17, %v5617_v52  ;;  %v5808_v0 = vadd.f32 %v5807_v51, %v5618_v47 }
0x1ea9   :  { %6141 = vmatmul.bf16.vlgmr.msra.gmra.mxu0 %v5843_v50  ;;  %6154 = vmatmul.bf16.vlgmr.msrb.gmra.mxu1 %v5844_v34 }
0x1eaa   :  { %v5837_v2 = vmax.f32 %v5795_v23, 0.0  ;;  %v5838_v21 = vmax.f32 %v5808_v0, 0.0  ;;  %v5822_v41 = vpop.f32.mrf.mxu0  ;;  %v5835_v22 = vpop.f32.mrf.mxu1 }
0x1eac   :  { %v5841_v44 = vpack.c.bf16 %v5837_v2, %v5837_v2  ;;  %v5842_v6 = vpack.c.bf16 %v5838_v21, %v5838_v21 }
0x1eae   :  { %6115 = vmatmul.bf16.vlgmr.msra.gmra.mxu2 %v5841_v44  ;;  %6128 = vmatmul.bf16.vlgmr.msrb.gmra.mxu3 %v5842_v6 }
0x1eaf   :  { %v5796_v28 = vpop.f32.mrf.mxu2  ;;  %v5809_v7 = vpop.f32.mrf.mxu3 }
0x1f26   :  { %v6142_v29 = vpop.f32.mrf.mxu0  ;;  %v6155_v45 = vpop.f32.mrf.mxu1 }
0x1f2e   :  { %v6144_v46 = vpop.f32.mrf.mxu0  ;;  %v6157_v8 = vpop.f32.mrf.mxu1 }
0x1f31   :  { %v6116_v11 = vpop.f32.mrf.mxu2  ;;  %v6129_v15 = vpop.f32.mrf.mxu3 }
0x1f32   :  { %v6117_v61 = vadd.f32 %v8021_v16, %v6116_v11 }
0x1f34   :  { %v6130_v56 = vadd.f32 %v6129_v15, %v6117_v61 }
0x1f36   :  { %v6143_v39 = vadd.f32 %v6142_v29, %v6130_v56 }
0x1f38   :  { %v6156_v43 = vadd.f32 %v6155_v45, %v6143_v39 }
0x1f39   :  { %v6118_v18 = vpop.f32.mrf.mxu2  ;;  %v6131_v1 = vpop.f32.mrf.mxu3 }
0x1f3a   :  { %v6159_v5 = vadd.f32 %v6156_v43, %v9008_v63 }
0x1f3c   :  { %6160 = vst [vmem:[#allocation19] sm:$0xff] %v6159_v5 }
0x1f3d   :  { %6171 = dma.vmem_to_hbm [thread:$0]  %s6167_s19, 128, %s6169_s20, [#allocation4]  }
0x1f3e   :  { %8409 = dma.done.wait [#allocation4], 128  }
0x1f3f   :  { %8410 = vsyncadd [#allocation4], 4294967168 }
0x1f40   :  { %6176 = vsyncpa [#allocation3], 1 }
0x1f41   :  { %6177 = vsyncpa [#allocation6], 1 }
0x1f42   :  { %6178 = vsyncpa [#allocation9], 1 }
0x1f43   :  { %6179 = vsyncpa [#allocation12], 1 }
0x1f44   :  { %6180 = vsyncpa [#allocation15], 1 }
0x1f45   :  { %6181 = vsyncpa [#allocation18], 1 }
0x1f46   :  { %6182 = vsyncpa [#allocation4], 1 }

</bundles_post_ra>
